<compile_context>
chip_gen: v6e
topology: v6e:2x2x1
jax: 0.10.0
libtpu: 0.0.40
codegen_flags: <defaults>
</compile_context>

<pallas_src>
import jax
import jax.numpy as jnp
from jax.experimental import pallas as pl
from jax.experimental.pallas import tpu as pltpu


# ---------------------------------------------------------------------------
# Kernel A: conv1 as a transposed, lane-dense fused matmul.
#   out = relu(W1f @ P1^T + b1f)   W1f:(16,256)  P1^T:(256,400)  -> (16,400)
# ---------------------------------------------------------------------------
def _conv1_kernel(p1t_ref, w_ref, b_ref, o_ref):
    acc = jnp.dot(w_ref[...], p1t_ref[0], preferred_element_type=jnp.float32)
    o_ref[0] = jnp.maximum(acc + b_ref[...], 0.0)


def conv1_call(p1t, w1f, b1f):
    n, k, m = p1t.shape
    o = w1f.shape[0]
    return pl.pallas_call(
        _conv1_kernel,
        out_shape=jax.ShapeDtypeStruct((n, o, m), jnp.float32),
        grid=(n,),
        in_specs=[
            pl.BlockSpec((1, k, m), lambda i: (i, 0, 0)),
            pl.BlockSpec((o, k), lambda i: (0, 0)),
            pl.BlockSpec((o, 1), lambda i: (0, 0)),
        ],
        out_specs=pl.BlockSpec((1, o, m), lambda i: (i, 0, 0)),
        compiler_params=pltpu.CompilerParams(dimension_semantics=("parallel",)),
    )(p1t, w1f, b1f)


# ---------------------------------------------------------------------------
# Kernel B: conv2 + flatten + fc1 + fc2, fused.  Per sample:
#   f2^T = relu(W2f @ P2^T + b2f)                      (32, 100)   stays in VMEM
#   h    = relu(b_fc1 + sum_c f2^T[c,:] @ Wq[c])       (1, 256)    stays in VMEM
#   q    = h @ Wfc2 + b_fc2                            (1, A)      only HBM write
# The per-channel matmul loop contracts over (channel, spatial) without needing
# an in-kernel (32,100)->(1,3200) reshape; Wq rows were pre-permuted to match.
# ---------------------------------------------------------------------------
def _tail_kernel(p2t_ref, w2_ref, b2_ref, wq_ref, bfc1_ref, wfc2_ref, bfc2_ref,
                 o_ref):
    f2t = jnp.dot(w2_ref[...], p2t_ref[0], preferred_element_type=jnp.float32)
    f2t = jnp.maximum(f2t + b2_ref[...], 0.0)          # (32, 100)

    h = bfc1_ref[...]                                   # (1, 256) f32 accumulator
    for c in range(wq_ref.shape[0]):                    # 32 static row-sliced matmuls
        h = h + jnp.dot(f2t[c:c + 1, :].astype(wq_ref.dtype), wq_ref[c],
                        preferred_element_type=jnp.float32)
    h = jnp.maximum(h, 0.0)                             # (1, 256)

    q = jnp.dot(h, wfc2_ref[...], preferred_element_type=jnp.float32) + bfc2_ref[...]
    o_ref[0] = q                                        # (1, num_actions)


def tail_call(p2t, w2f, b2f, wq, bfc1, wfc2, bfc2):
    n, k2, m2 = p2t.shape          # (N, 256, 100)
    c2 = w2f.shape[0]              # 32
    hdim = wq.shape[-1]            # 256
    a = wfc2.shape[-1]             # num_actions
    return pl.pallas_call(
        _tail_kernel,
        out_shape=jax.ShapeDtypeStruct((n, 1, a), jnp.float32),
        grid=(n,),
        in_specs=[
            pl.BlockSpec((1, k2, m2), lambda i: (i, 0, 0)),
            pl.BlockSpec((c2, k2), lambda i: (0, 0)),
            pl.BlockSpec((c2, 1), lambda i: (0, 0)),
            pl.BlockSpec((c2, m2, hdim), lambda i: (0, 0, 0)),
            pl.BlockSpec((1, hdim), lambda i: (0, 0)),
            pl.BlockSpec((hdim, a), lambda i: (0, 0)),
            pl.BlockSpec((1, a), lambda i: (0, 0)),
        ],
        out_specs=pl.BlockSpec((1, 1, a), lambda i: (i, 0, 0)),
        compiler_params=pltpu.CompilerParams(dimension_semantics=("parallel",)),
    )(p2t, w2f, b2f, wq, bfc1, wfc2, bfc2)


# ---------------------------------------------------------------------------
# im2col (plain-JAX glue), TRANSPOSED: NCHW -> (N, K*K*C, OH*OW).
# Patch-dim ordering is (ki, kj, c), matching the (O, KH, KW, C) weight reshape.
# ---------------------------------------------------------------------------
def _im2col_T(x_nchw, ksize, stride, pad):
    xp = jnp.pad(x_nchw, ((0, 0), (0, 0), (pad, pad), (pad, pad)))
    n, c, hp, wp = xp.shape
    oh = (hp - ksize) // stride + 1
    ow = (wp - ksize) // stride + 1
    taps = []
    for ki in range(ksize):
        for kj in range(ksize):
            taps.append(xp[:, :, ki:ki + (oh - 1) * stride + 1:stride,
                           kj:kj + (ow - 1) * stride + 1:stride])
    t = jnp.stack(taps, axis=1)                        # (N, K*K, C, OH, OW)
    return t.reshape(n, ksize * ksize * c, oh * ow), oh, ow


# ---------------------------------------------------------------------------
# One-time parameter preprocessing (kept OUTSIDE the per-step jit).
# ---------------------------------------------------------------------------
def prepare_params(p, eps=1e-5):
    # TODO(synk): BatchNorm is eval mode only (running stats folded into the
    # conv weights/bias); training-mode batch statistics are not computed.
    o1, c1, k1, _ = p["w1"].shape
    o2, c2, k2, _ = p["w2"].shape
    s1 = p["g1"] / jnp.sqrt(p["v1"] + eps)
    w1f = jnp.transpose(p["w1"], (0, 2, 3, 1)).reshape(o1, k1 * k1 * c1) * s1[:, None]
    b1f = (p["be1"] + s1 * (p["b1"] - p["m1"])).reshape(o1, 1)
    s2 = p["g2"] / jnp.sqrt(p["v2"] + eps)
    w2f = jnp.transpose(p["w2"], (0, 2, 3, 1)).reshape(o2, k2 * k2 * c2) * s2[:, None]
    b2f = (p["be2"] + s2 * (p["b2"] - p["m2"])).reshape(o2, 1)

    hdim, flat = p["fc1_w"].shape                       # (256, 3200)
    spat = flat // o2                                   # 100 spatial positions
    # PyTorch flattens (c, h, w); the kernel holds f2 as (c, h*w), so permute the
    # fc1 weight rows to wq[c, s, o] = fc1_w[o, c*spat + s] and store as bf16.
    wq = p["fc1_w"].reshape(hdim, o2, spat).transpose(1, 2, 0).astype(jnp.bfloat16)

    return dict(
        w1f=w1f.astype(jnp.float32), b1f=b1f.astype(jnp.float32),
        w2f=w2f.astype(jnp.float32), b2f=b2f.astype(jnp.float32),
        wq=wq,
        bfc1=p["fc1_b"].reshape(1, hdim).astype(jnp.float32),
        wfc2=p["fc2_w"].T.astype(jnp.float32),
        bfc2=p["fc2_b"].reshape(1, -1).astype(jnp.float32),
    )


# ---------------------------------------------------------------------------
# Full DQN forward (matches the PyTorch module semantics, eval-mode BN).
# ---------------------------------------------------------------------------
def dqn_forward(x_nchw, pp):
    n = x_nchw.shape[0]
    p1t, oh1, ow1 = _im2col_T(x_nchw, ksize=8, stride=4, pad=2)    # (N, 256, 400)
    f1t = conv1_call(p1t, pp["w1f"], pp["b1f"])                     # (N, 16, 400)
    f1 = f1t.reshape(n, pp["w1f"].shape[0], oh1, ow1)               # (N, 16, 20, 20)
    p2t, _, _ = _im2col_T(f1, ksize=4, stride=2, pad=1)             # (N, 256, 100)
    q = tail_call(p2t, pp["w2f"], pp["b2f"], pp["wq"], pp["bfc1"],
                  pp["wfc2"], pp["bfc2"])                           # (N, 1, A)
    return q[:, 0, :]


# ---------------------------------------------------------------------------
# Pure-JAX reference (for sanity checking the Pallas path).
# ---------------------------------------------------------------------------
def dqn_reference(x, p, eps=1e-5):
    def conv(x, w, b, stride, pad):
        y = jax.lax.conv_general_dilated(
            x, w, window_strides=(stride, stride),
            padding=((pad, pad), (pad, pad)),
            dimension_numbers=("NCHW", "OIHW", "NCHW"),
            precision=jax.lax.Precision.HIGHEST)
        return y + b[None, :, None, None]

    def bn(x, g, be, m, v):
        inv = g / jnp.sqrt(v + eps)
        return (x - m[None, :, None, None]) * inv[None, :, None, None] \
            + be[None, :, None, None]

    y = jnp.maximum(bn(conv(x, p["w1"], p["b1"], 4, 2),
                       p["g1"], p["be1"], p["m1"], p["v1"]), 0.0)
    y = jnp.maximum(bn(conv(y, p["w2"], p["b2"], 2, 1),
                       p["g2"], p["be2"], p["m2"], p["v2"]), 0.0)
    flat = y.reshape(y.shape[0], -1)
    h = jnp.maximum(
        jnp.dot(flat, p["fc1_w"].T, precision=jax.lax.Precision.HIGHEST)
        + p["fc1_b"], 0.0)
    return (jnp.dot(h, p["fc2_w"].T, precision=jax.lax.Precision.HIGHEST)
            + p["fc2_b"])


if __name__ == "__main__":
    f32 = jnp.float32
    key = jax.random.PRNGKey(0)
    ks = jax.random.split(key, 17)

    params = dict(
        # Conv1: Conv2d(4, 16, k=8, s=4, p=2) + BatchNorm2d(16)
        w1=0.05 * jax.random.normal(ks[0], (16, 4, 8, 8), f32),
        b1=0.05 * jax.random.normal(ks[1], (16,), f32),
        g1=1.0 + 0.1 * jax.random.normal(ks[2], (16,), f32),
        be1=0.1 * jax.random.normal(ks[3], (16,), f32),
        m1=0.1 * jax.random.normal(ks[4], (16,), f32),
        v1=1.0 + 0.5 * jax.random.uniform(ks[5], (16,), f32),
        # Conv2: Conv2d(16, 32, k=4, s=2, p=1) + BatchNorm2d(32)
        w2=0.05 * jax.random.normal(ks[6], (32, 16, 4, 4), f32),
        b2=0.05 * jax.random.normal(ks[7], (32,), f32),
        g2=1.0 + 0.1 * jax.random.normal(ks[8], (32,), f32),
        be2=0.1 * jax.random.normal(ks[9], (32,), f32),
        m2=0.1 * jax.random.normal(ks[10], (32,), f32),
        v2=1.0 + 0.5 * jax.random.uniform(ks[11], (32,), f32),
        # Classifier: Linear(3200, 256) -> ReLU -> Linear(256, 2)
        fc1_w=0.02 * jax.random.normal(ks[12], (256, 3200), f32),
        fc1_b=0.02 * jax.random.normal(ks[13], (256,), f32),
        fc2_w=0.05 * jax.random.normal(ks[14], (2, 256), f32),
        fc2_b=0.05 * jax.random.normal(ks[15], (2,), f32),
    )

    # Input: batch=2, in_channels=4, spatial 80x80 (required so that the feature
    # map flattens to 10*10*32 = 3200, as hard-coded in the module).
    x = jax.random.normal(ks[16], (2, 4, 80, 80), f32)

    # One-time weight preprocessing (BN fold, layout permute, bf16 cast) outside
    # the jitted forward so it is not repeated per call.
    prepped = jax.tree_util.tree_map(jax.block_until_ready, prepare_params(params))

    q = jax.jit(dqn_forward)(x, prepped)
    q = jax.block_until_ready(q)

    ref = dqn_reference(x, params)
    assert q.shape == (2, 2), q.shape
    if not jnp.allclose(q, ref, atol=1e-2, rtol=1e-2):
        raise ValueError(f"Pallas/reference mismatch:\n{q}\n{ref}")

    print("KERNEL_OK")
</pallas_src>

<mosaic_0001>
module attributes {stable_mosaic.version = 11 : i64} {
  func.func @_conv1_kernel(%arg0: i32, %arg1: memref<1x256x400xf32, #tpu.memory_space<vmem>>, %arg2: memref<16x256xf32, #tpu.memory_space<vmem>>, %arg3: memref<16x1xf32, #tpu.memory_space<vmem>>, %arg4: memref<1x16x400xf32, #tpu.memory_space<vmem>>) attributes {dimension_semantics = [#tpu.dimension_semantics<parallel>], iteration_bounds = array<i64: 2>, scalar_prefetch = 0 : i64, scratch_operands = 0 : i64, tpu.core_type = #tpu.core_type<tc>, window_params = [{transform_indices = @transform_0, window_bounds = array<i64: 1, 256, 400>}, {pipeline_mode = #tpu.pipeline_mode<synchronous>, transform_indices = @transform_1, window_bounds = array<i64: 16, 256>}, {pipeline_mode = #tpu.pipeline_mode<synchronous>, transform_indices = @transform_2, window_bounds = array<i64: 16, 1>}, {transform_indices = @transform_3, window_bounds = array<i64: 1, 16, 400>}]} {
    %c0 = arith.constant 0 : index
    %c0_0 = arith.constant 0 : index
    %0 = vector.load %arg2[%c0, %c0_0] : memref<16x256xf32, #tpu.memory_space<vmem>>, vector<16x256xf32>
    %c0_1 = arith.constant 0 : index
    %c0_2 = arith.constant 0 : index
    %c0_3 = arith.constant 0 : index
    %1 = vector.load %arg1[%c0_1, %c0_2, %c0_3] : memref<1x256x400xf32, #tpu.memory_space<vmem>>, vector<1x256x400xf32>
    %2 = vector.shape_cast %1 : vector<1x256x400xf32> to vector<256x400xf32>
    %cst = arith.constant dense<0.000000e+00> : vector<16x400xf32>
    %3 = tpu.matmul %0, %2, %cst {dimension_numbers = #tpu.dot_dimension_numbers<[1], [0], [0], [1], [0, 0, 1, 1], [], []>} : vector<16x256xf32>, vector<256x400xf32>, vector<16x400xf32> -> vector<16x400xf32>
    %c0_4 = arith.constant 0 : index
    %c0_5 = arith.constant 0 : index
    %4 = vector.load %arg3[%c0_4, %c0_5] : memref<16x1xf32, #tpu.memory_space<vmem>>, vector<16x1xf32>
    %5 = vector.broadcast %4 : vector<16x1xf32> to vector<16x400xf32>
    %6 = arith.addf %3, %5 : vector<16x400xf32>
    %cst_6 = arith.constant 0.000000e+00 : f32
    %7 = vector.broadcast %cst_6 : f32 to vector<16x400xf32>
    %8 = arith.maximumf %6, %7 : vector<16x400xf32>
    %c0_7 = arith.constant 0 : index
    %c0_8 = arith.constant 0 : index
    %c0_9 = arith.constant 0 : index
    %9 = vector.load %arg4[%c0_7, %c0_8, %c0_9] : memref<1x16x400xf32, #tpu.memory_space<vmem>>, vector<1x16x400xf32>
    %10 = vector.shape_cast %9 : vector<1x16x400xf32> to vector<16x400xf32>
    %11 = vector.shape_cast %8 : vector<16x400xf32> to vector<1x16x400xf32>
    tpu.vector_store %arg4[%c0_7, %c0_8, %c0_9], %11 {strides = array<i32>} : memref<1x16x400xf32, #tpu.memory_space<vmem>>, vector<1x16x400xf32>,
    return
  }
  func.func @transform_0(%arg0: i32) -> (i32, i32, i32) {
    %c0_i32 = arith.constant 0 : i32
    %c0_i32_0 = arith.constant 0 : i32
    %c0_i32_1 = arith.constant 0 : i32
    return %arg0, %c0_i32, %c0_i32_0 : i32, i32, i32
  }
  func.func @transform_1(%arg0: i32) -> (i32, i32) {
    %c0_i32 = arith.constant 0 : i32
    %c0_i32_0 = arith.constant 0 : i32
    %c0_i32_1 = arith.constant 0 : i32
    return %c0_i32, %c0_i32_0 : i32, i32
  }
  func.func @transform_2(%arg0: i32) -> (i32, i32) {
    %c0_i32 = arith.constant 0 : i32
    %c0_i32_0 = arith.constant 0 : i32
    %c0_i32_1 = arith.constant 0 : i32
    return %c0_i32, %c0_i32_0 : i32, i32
  }
  func.func @transform_3(%arg0: i32) -> (i32, i32, i32) {
    %c0_i32 = arith.constant 0 : i32
    %c0_i32_0 = arith.constant 0 : i32
    %c0_i32_1 = arith.constant 0 : i32
    return %arg0, %c0_i32, %c0_i32_0 : i32, i32, i32
  }
}

module attributes {stable_mosaic.version = 11 : i64} {
  func.func @_tail_kernel(%arg0: i32, %arg1: memref<1x256x100xf32, #tpu.memory_space<vmem>>, %arg2: memref<32x256xf32, #tpu.memory_space<vmem>>, %arg3: memref<32x1xf32, #tpu.memory_space<vmem>>, %arg4: memref<32x100x256xbf16, #tpu.memory_space<vmem>>, %arg5: memref<1x256xf32, #tpu.memory_space<vmem>>, %arg6: memref<256x2xf32, #tpu.memory_space<vmem>>, %arg7: memref<1x2xf32, #tpu.memory_space<vmem>>, %arg8: memref<1x1x2xf32, #tpu.memory_space<vmem>>) attributes {dimension_semantics = [#tpu.dimension_semantics<parallel>], iteration_bounds = array<i64: 2>, scalar_prefetch = 0 : i64, scratch_operands = 0 : i64, tpu.core_type = #tpu.core_type<tc>, window_params = [{transform_indices = @transform_0, window_bounds = array<i64: 1, 256, 100>}, {pipeline_mode = #tpu.pipeline_mode<synchronous>, transform_indices = @transform_1, window_bounds = array<i64: 32, 256>}, {pipeline_mode = #tpu.pipeline_mode<synchronous>, transform_indices = @transform_2, window_bounds = array<i64: 32, 1>}, {pipeline_mode = #tpu.pipeline_mode<synchronous>, transform_indices = @transform_3, window_bounds = array<i64: 32, 100, 256>}, {pipeline_mode = #tpu.pipeline_mode<synchronous>, transform_indices = @transform_4, window_bounds = array<i64: 1, 256>}, {pipeline_mode = #tpu.pipeline_mode<synchronous>, transform_indices = @transform_5, window_bounds = array<i64: 256, 2>}, {pipeline_mode = #tpu.pipeline_mode<synchronous>, transform_indices = @transform_6, window_bounds = array<i64: 1, 2>}, {transform_indices = @transform_7, window_bounds = array<i64: 1, 1, 2>}]} {
    %c0 = arith.constant 0 : index
    %c0_0 = arith.constant 0 : index
    %0 = vector.load %arg2[%c0, %c0_0] : memref<32x256xf32, #tpu.memory_space<vmem>>, vector<32x256xf32>
    %c0_1 = arith.constant 0 : index
    %c0_2 = arith.constant 0 : index
    %c0_3 = arith.constant 0 : index
    %1 = vector.load %arg1[%c0_1, %c0_2, %c0_3] : memref<1x256x100xf32, #tpu.memory_space<vmem>>, vector<1x256x100xf32>
    %2 = vector.shape_cast %1 : vector<1x256x100xf32> to vector<256x100xf32>
    %cst = arith.constant dense<0.000000e+00> : vector<32x100xf32>
    %3 = tpu.matmul %0, %2, %cst {dimension_numbers = #tpu.dot_dimension_numbers<[1], [0], [0], [1], [0, 0, 1, 1], [], []>} : vector<32x256xf32>, vector<256x100xf32>, vector<32x100xf32> -> vector<32x100xf32>
    %c0_4 = arith.constant 0 : index
    %c0_5 = arith.constant 0 : index
    %4 = vector.load %arg3[%c0_4, %c0_5] : memref<32x1xf32, #tpu.memory_space<vmem>>, vector<32x1xf32>
    %5 = vector.broadcast %4 : vector<32x1xf32> to vector<32x100xf32>
    %6 = arith.addf %3, %5 : vector<32x100xf32>
    %cst_6 = arith.constant 0.000000e+00 : f32
    %7 = vector.broadcast %cst_6 : f32 to vector<32x100xf32>
    %8 = arith.maximumf %6, %7 : vector<32x100xf32>
    %c0_7 = arith.constant 0 : index
    %c0_8 = arith.constant 0 : index
    %9 = vector.load %arg5[%c0_7, %c0_8] : memref<1x256xf32, #tpu.memory_space<vmem>>, vector<1x256xf32>
    %10 = vector.extract_strided_slice %8 {offsets = [0, 0], sizes = [1, 100], strides = [1, 1]} : vector<32x100xf32> to vector<1x100xf32>
    %11 = arith.truncf %10 : vector<1x100xf32> to vector<1x100xbf16>
    %c0_9 = arith.constant 0 : index
    %c0_10 = arith.constant 0 : index
    %c0_11 = arith.constant 0 : index
    %12 = vector.load %arg4[%c0_9, %c0_10, %c0_11] : memref<32x100x256xbf16, #tpu.memory_space<vmem>>, vector<1x100x256xbf16>
    %13 = vector.shape_cast %12 : vector<1x100x256xbf16> to vector<100x256xbf16>
    %cst_12 = arith.constant dense<0.000000e+00> : vector<1x256xf32>
    %14 = tpu.matmul %11, %13, %cst_12 {dimension_numbers = #tpu.dot_dimension_numbers<[1], [0], [0], [1], [0, 0, 1, 1], [], []>} : vector<1x100xbf16>, vector<100x256xbf16>, vector<1x256xf32> -> vector<1x256xf32>
    %15 = arith.addf %9, %14 : vector<1x256xf32>
    %16 = vector.extract_strided_slice %8 {offsets = [1, 0], sizes = [1, 100], strides = [1, 1]} : vector<32x100xf32> to vector<1x100xf32>
    %17 = arith.truncf %16 : vector<1x100xf32> to vector<1x100xbf16>
    %c1 = arith.constant 1 : index
    %c0_13 = arith.constant 0 : index
    %c0_14 = arith.constant 0 : index
    %18 = vector.load %arg4[%c1, %c0_13, %c0_14] : memref<32x100x256xbf16, #tpu.memory_space<vmem>>, vector<1x100x256xbf16>
    %19 = vector.shape_cast %18 : vector<1x100x256xbf16> to vector<100x256xbf16>
    %cst_15 = arith.constant dense<0.000000e+00> : vector<1x256xf32>
    %20 = tpu.matmul %17, %19, %cst_15 {dimension_numbers = #tpu.dot_dimension_numbers<[1], [0], [0], [1], [0, 0, 1, 1], [], []>} : vector<1x100xbf16>, vector<100x256xbf16>, vector<1x256xf32> -> vector<1x256xf32>
    %21 = arith.addf %15, %20 : vector<1x256xf32>
    %22 = vector.extract_strided_slice %8 {offsets = [2, 0], sizes = [1, 100], strides = [1, 1]} : vector<32x100xf32> to vector<1x100xf32>
    %23 = arith.truncf %22 : vector<1x100xf32> to vector<1x100xbf16>
    %c2 = arith.constant 2 : index
    %c0_16 = arith.constant 0 : index
    %c0_17 = arith.constant 0 : index
    %24 = vector.load %arg4[%c2, %c0_16, %c0_17] : memref<32x100x256xbf16, #tpu.memory_space<vmem>>, vector<1x100x256xbf16>
    %25 = vector.shape_cast %24 : vector<1x100x256xbf16> to vector<100x256xbf16>
    %cst_18 = arith.constant dense<0.000000e+00> : vector<1x256xf32>
    %26 = tpu.matmul %23, %25, %cst_18 {dimension_numbers = #tpu.dot_dimension_numbers<[1], [0], [0], [1], [0, 0, 1, 1], [], []>} : vector<1x100xbf16>, vector<100x256xbf16>, vector<1x256xf32> -> vector<1x256xf32>
    %27 = arith.addf %21, %26 : vector<1x256xf32>
    %28 = vector.extract_strided_slice %8 {offsets = [3, 0], sizes = [1, 100], strides = [1, 1]} : vector<32x100xf32> to vector<1x100xf32>
    %29 = arith.truncf %28 : vector<1x100xf32> to vector<1x100xbf16>
    %c3 = arith.constant 3 : index
    %c0_19 = arith.constant 0 : index
    %c0_20 = arith.constant 0 : index
    %30 = vector.load %arg4[%c3, %c0_19, %c0_20] : memref<32x100x256xbf16, #tpu.memory_space<vmem>>, vector<1x100x256xbf16>
    %31 = vector.shape_cast %30 : vector<1x100x256xbf16> to vector<100x256xbf16>
    %cst_21 = arith.constant dense<0.000000e+00> : vector<1x256xf32>
    %32 = tpu.matmul %29, %31, %cst_21 {dimension_numbers = #tpu.dot_dimension_numbers<[1], [0], [0], [1], [0, 0, 1, 1], [], []>} : vector<1x100xbf16>, vector<100x256xbf16>, vector<1x256xf32> -> vector<1x256xf32>
    %33 = arith.addf %27, %32 : vector<1x256xf32>
    %34 = vector.extract_strided_slice %8 {offsets = [4, 0], sizes = [1, 100], strides = [1, 1]} : vector<32x100xf32> to vector<1x100xf32>
    %35 = arith.truncf %34 : vector<1x100xf32> to vector<1x100xbf16>
    %c4 = arith.constant 4 : index
    %c0_22 = arith.constant 0 : index
    %c0_23 = arith.constant 0 : index
    %36 = vector.load %arg4[%c4, %c0_22, %c0_23] : memref<32x100x256xbf16, #tpu.memory_space<vmem>>, vector<1x100x256xbf16>
    %37 = vector.shape_cast %36 : vector<1x100x256xbf16> to vector<100x256xbf16>
    %cst_24 = arith.constant dense<0.000000e+00> : vector<1x256xf32>
    %38 = tpu.matmul %35, %37, %cst_24 {dimension_numbers = #tpu.dot_dimension_numbers<[1], [0], [0], [1], [0, 0, 1, 1], [], []>} : vector<1x100xbf16>, vector<100x256xbf16>, vector<1x256xf32> -> vector<1x256xf32>
    %39 = arith.addf %33, %38 : vector<1x256xf32>
    %40 = vector.extract_strided_slice %8 {offsets = [5, 0], sizes = [1, 100], strides = [1, 1]} : vector<32x100xf32> to vector<1x100xf32>
    %41 = arith.truncf %40 : vector<1x100xf32> to vector<1x100xbf16>
    %c5 = arith.constant 5 : index
    %c0_25 = arith.constant 0 : index
    %c0_26 = arith.constant 0 : index
    %42 = vector.load %arg4[%c5, %c0_25, %c0_26] : memref<32x100x256xbf16, #tpu.memory_space<vmem>>, vector<1x100x256xbf16>
    %43 = vector.shape_cast %42 : vector<1x100x256xbf16> to vector<100x256xbf16>
    %cst_27 = arith.constant dense<0.000000e+00> : vector<1x256xf32>
    %44 = tpu.matmul %41, %43, %cst_27 {dimension_numbers = #tpu.dot_dimension_numbers<[1], [0], [0], [1], [0, 0, 1, 1], [], []>} : vector<1x100xbf16>, vector<100x256xbf16>, vector<1x256xf32> -> vector<1x256xf32>
    %45 = arith.addf %39, %44 : vector<1x256xf32>
    %46 = vector.extract_strided_slice %8 {offsets = [6, 0], sizes = [1, 100], strides = [1, 1]} : vector<32x100xf32> to vector<1x100xf32>
    %47 = arith.truncf %46 : vector<1x100xf32> to vector<1x100xbf16>
    %c6 = arith.constant 6 : index
    %c0_28 = arith.constant 0 : index
    %c0_29 = arith.constant 0 : index
    %48 = vector.load %arg4[%c6, %c0_28, %c0_29] : memref<32x100x256xbf16, #tpu.memory_space<vmem>>, vector<1x100x256xbf16>
    %49 = vector.shape_cast %48 : vector<1x100x256xbf16> to vector<100x256xbf16>
    %cst_30 = arith.constant dense<0.000000e+00> : vector<1x256xf32>
    %50 = tpu.matmul %47, %49, %cst_30 {dimension_numbers = #tpu.dot_dimension_numbers<[1], [0], [0], [1], [0, 0, 1, 1], [], []>} : vector<1x100xbf16>, vector<100x256xbf16>, vector<1x256xf32> -> vector<1x256xf32>
    %51 = arith.addf %45, %50 : vector<1x256xf32>
    %52 = vector.extract_strided_slice %8 {offsets = [7, 0], sizes = [1, 100], strides = [1, 1]} : vector<32x100xf32> to vector<1x100xf32>
    %53 = arith.truncf %52 : vector<1x100xf32> to vector<1x100xbf16>
    %c7 = arith.constant 7 : index
    %c0_31 = arith.constant 0 : index
    %c0_32 = arith.constant 0 : index
    %54 = vector.load %arg4[%c7, %c0_31, %c0_32] : memref<32x100x256xbf16, #tpu.memory_space<vmem>>, vector<1x100x256xbf16>
    %55 = vector.shape_cast %54 : vector<1x100x256xbf16> to vector<100x256xbf16>
    %cst_33 = arith.constant dense<0.000000e+00> : vector<1x256xf32>
    %56 = tpu.matmul %53, %55, %cst_33 {dimension_numbers = #tpu.dot_dimension_numbers<[1], [0], [0], [1], [0, 0, 1, 1], [], []>} : vector<1x100xbf16>, vector<100x256xbf16>, vector<1x256xf32> -> vector<1x256xf32>
    %57 = arith.addf %51, %56 : vector<1x256xf32>
    %58 = vector.extract_strided_slice %8 {offsets = [8, 0], sizes = [1, 100], strides = [1, 1]} : vector<32x100xf32> to vector<1x100xf32>
    %59 = arith.truncf %58 : vector<1x100xf32> to vector<1x100xbf16>
    %c8 = arith.constant 8 : index
    %c0_34 = arith.constant 0 : index
    %c0_35 = arith.constant 0 : index
    %60 = vector.load %arg4[%c8, %c0_34, %c0_35] : memref<32x100x256xbf16, #tpu.memory_space<vmem>>, vector<1x100x256xbf16>
    %61 = vector.shape_cast %60 : vector<1x100x256xbf16> to vector<100x256xbf16>
    %cst_36 = arith.constant dense<0.000000e+00> : vector<1x256xf32>
    %62 = tpu.matmul %59, %61, %cst_36 {dimension_numbers = #tpu.dot_dimension_numbers<[1], [0], [0], [1], [0, 0, 1, 1], [], []>} : vector<1x100xbf16>, vector<100x256xbf16>, vector<1x256xf32> -> vector<1x256xf32>
    %63 = arith.addf %57, %62 : vector<1x256xf32>
    %64 = vector.extract_strided_slice %8 {offsets = [9, 0], sizes = [1, 100], strides = [1, 1]} : vector<32x100xf32> to vector<1x100xf32>
    %65 = arith.truncf %64 : vector<1x100xf32> to vector<1x100xbf16>
    %c9 = arith.constant 9 : index
    %c0_37 = arith.constant 0 : index
    %c0_38 = arith.constant 0 : index
    %66 = vector.load %arg4[%c9, %c0_37, %c0_38] : memref<32x100x256xbf16, #tpu.memory_space<vmem>>, vector<1x100x256xbf16>
    %67 = vector.shape_cast %66 : vector<1x100x256xbf16> to vector<100x256xbf16>
    %cst_39 = arith.constant dense<0.000000e+00> : vector<1x256xf32>
    %68 = tpu.matmul %65, %67, %cst_39 {dimension_numbers = #tpu.dot_dimension_numbers<[1], [0], [0], [1], [0, 0, 1, 1], [], []>} : vector<1x100xbf16>, vector<100x256xbf16>, vector<1x256xf32> -> vector<1x256xf32>
    %69 = arith.addf %63, %68 : vector<1x256xf32>
    %70 = vector.extract_strided_slice %8 {offsets = [10, 0], sizes = [1, 100], strides = [1, 1]} : vector<32x100xf32> to vector<1x100xf32>
    %71 = arith.truncf %70 : vector<1x100xf32> to vector<1x100xbf16>
    %c10 = arith.constant 10 : index
    %c0_40 = arith.constant 0 : index
    %c0_41 = arith.constant 0 : index
    %72 = vector.load %arg4[%c10, %c0_40, %c0_41] : memref<32x100x256xbf16, #tpu.memory_space<vmem>>, vector<1x100x256xbf16>
    %73 = vector.shape_cast %72 : vector<1x100x256xbf16> to vector<100x256xbf16>
    %cst_42 = arith.constant dense<0.000000e+00> : vector<1x256xf32>
    %74 = tpu.matmul %71, %73, %cst_42 {dimension_numbers = #tpu.dot_dimension_numbers<[1], [0], [0], [1], [0, 0, 1, 1], [], []>} : vector<1x100xbf16>, vector<100x256xbf16>, vector<1x256xf32> -> vector<1x256xf32>
    %75 = arith.addf %69, %74 : vector<1x256xf32>
    %76 = vector.extract_strided_slice %8 {offsets = [11, 0], sizes = [1, 100], strides = [1, 1]} : vector<32x100xf32> to vector<1x100xf32>
    %77 = arith.truncf %76 : vector<1x100xf32> to vector<1x100xbf16>
    %c11 = arith.constant 11 : index
    %c0_43 = arith.constant 0 : index
    %c0_44 = arith.constant 0 : index
    %78 = vector.load %arg4[%c11, %c0_43, %c0_44] : memref<32x100x256xbf16, #tpu.memory_space<vmem>>, vector<1x100x256xbf16>
    %79 = vector.shape_cast %78 : vector<1x100x256xbf16> to vector<100x256xbf16>
    %cst_45 = arith.constant dense<0.000000e+00> : vector<1x256xf32>
    %80 = tpu.matmul %77, %79, %cst_45 {dimension_numbers = #tpu.dot_dimension_numbers<[1], [0], [0], [1], [0, 0, 1, 1], [], []>} : vector<1x100xbf16>, vector<100x256xbf16>, vector<1x256xf32> -> vector<1x256xf32>
    %81 = arith.addf %75, %80 : vector<1x256xf32>
    %82 = vector.extract_strided_slice %8 {offsets = [12, 0], sizes = [1, 100], strides = [1, 1]} : vector<32x100xf32> to vector<1x100xf32>
    %83 = arith.truncf %82 : vector<1x100xf32> to vector<1x100xbf16>
    %c12 = arith.constant 12 : index
    %c0_46 = arith.constant 0 : index
    %c0_47 = arith.constant 0 : index
    %84 = vector.load %arg4[%c12, %c0_46, %c0_47] : memref<32x100x256xbf16, #tpu.memory_space<vmem>>, vector<1x100x256xbf16>
    %85 = vector.shape_cast %84 : vector<1x100x256xbf16> to vector<100x256xbf16>
    %cst_48 = arith.constant dense<0.000000e+00> : vector<1x256xf32>
    %86 = tpu.matmul %83, %85, %cst_48 {dimension_numbers = #tpu.dot_dimension_numbers<[1], [0], [0], [1], [0, 0, 1, 1], [], []>} : vector<1x100xbf16>, vector<100x256xbf16>, vector<1x256xf32> -> vector<1x256xf32>
    %87 = arith.addf %81, %86 : vector<1x256xf32>
    %88 = vector.extract_strided_slice %8 {offsets = [13, 0], sizes = [1, 100], strides = [1, 1]} : vector<32x100xf32> to vector<1x100xf32>
    %89 = arith.truncf %88 : vector<1x100xf32> to vector<1x100xbf16>
    %c13 = arith.constant 13 : index
    %c0_49 = arith.constant 0 : index
    %c0_50 = arith.constant 0 : index
    %90 = vector.load %arg4[%c13, %c0_49, %c0_50] : memref<32x100x256xbf16, #tpu.memory_space<vmem>>, vector<1x100x256xbf16>
    %91 = vector.shape_cast %90 : vector<1x100x256xbf16> to vector<100x256xbf16>
    %cst_51 = arith.constant dense<0.000000e+00> : vector<1x256xf32>
    %92 = tpu.matmul %89, %91, %cst_51 {dimension_numbers = #tpu.dot_dimension_numbers<[1], [0], [0], [1], [0, 0, 1, 1], [], []>} : vector<1x100xbf16>, vector<100x256xbf16>, vector<1x256xf32> -> vector<1x256xf32>
    %93 = arith.addf %87, %92 : vector<1x256xf32>
    %94 = vector.extract_strided_slice %8 {offsets = [14, 0], sizes = [1, 100], strides = [1, 1]} : vector<32x100xf32> to vector<1x100xf32>
    %95 = arith.truncf %94 : vector<1x100xf32> to vector<1x100xbf16>
    %c14 = arith.constant 14 : index
    %c0_52 = arith.constant 0 : index
    %c0_53 = arith.constant 0 : index
    %96 = vector.load %arg4[%c14, %c0_52, %c0_53] : memref<32x100x256xbf16, #tpu.memory_space<vmem>>, vector<1x100x256xbf16>
    %97 = vector.shape_cast %96 : vector<1x100x256xbf16> to vector<100x256xbf16>
    %cst_54 = arith.constant dense<0.000000e+00> : vector<1x256xf32>
    %98 = tpu.matmul %95, %97, %cst_54 {dimension_numbers = #tpu.dot_dimension_numbers<[1], [0], [0], [1], [0, 0, 1, 1], [], []>} : vector<1x100xbf16>, vector<100x256xbf16>, vector<1x256xf32> -> vector<1x256xf32>
    %99 = arith.addf %93, %98 : vector<1x256xf32>
    %100 = vector.extract_strided_slice %8 {offsets = [15, 0], sizes = [1, 100], strides = [1, 1]} : vector<32x100xf32> to vector<1x100xf32>
    %101 = arith.truncf %100 : vector<1x100xf32> to vector<1x100xbf16>
    %c15 = arith.constant 15 : index
    %c0_55 = arith.constant 0 : index
    %c0_56 = arith.constant 0 : index
    %102 = vector.load %arg4[%c15, %c0_55, %c0_56] : memref<32x100x256xbf16, #tpu.memory_space<vmem>>, vector<1x100x256xbf16>
    %103 = vector.shape_cast %102 : vector<1x100x256xbf16> to vector<100x256xbf16>
    %cst_57 = arith.constant dense<0.000000e+00> : vector<1x256xf32>
    %104 = tpu.matmul %101, %103, %cst_57 {dimension_numbers = #tpu.dot_dimension_numbers<[1], [0], [0], [1], [0, 0, 1, 1], [], []>} : vector<1x100xbf16>, vector<100x256xbf16>, vector<1x256xf32> -> vector<1x256xf32>
    %105 = arith.addf %99, %104 : vector<1x256xf32>
    %106 = vector.extract_strided_slice %8 {offsets = [16, 0], sizes = [1, 100], strides = [1, 1]} : vector<32x100xf32> to vector<1x100xf32>
    %107 = arith.truncf %106 : vector<1x100xf32> to vector<1x100xbf16>
    %c16 = arith.constant 16 : index
    %c0_58 = arith.constant 0 : index
    %c0_59 = arith.constant 0 : index
    %108 = vector.load %arg4[%c16, %c0_58, %c0_59] : memref<32x100x256xbf16, #tpu.memory_space<vmem>>, vector<1x100x256xbf16>
    %109 = vector.shape_cast %108 : vector<1x100x256xbf16> to vector<100x256xbf16>
    %cst_60 = arith.constant dense<0.000000e+00> : vector<1x256xf32>
    %110 = tpu.matmul %107, %109, %cst_60 {dimension_numbers = #tpu.dot_dimension_numbers<[1], [0], [0], [1], [0, 0, 1, 1], [], []>} : vector<1x100xbf16>, vector<100x256xbf16>, vector<1x256xf32> -> vector<1x256xf32>
    %111 = arith.addf %105, %110 : vector<1x256xf32>
    %112 = vector.extract_strided_slice %8 {offsets = [17, 0], sizes = [1, 100], strides = [1, 1]} : vector<32x100xf32> to vector<1x100xf32>
    %113 = arith.truncf %112 : vector<1x100xf32> to vector<1x100xbf16>
    %c17 = arith.constant 17 : index
    %c0_61 = arith.constant 0 : index
    %c0_62 = arith.constant 0 : index
    %114 = vector.load %arg4[%c17, %c0_61, %c0_62] : memref<32x100x256xbf16, #tpu.memory_space<vmem>>, vector<1x100x256xbf16>
    %115 = vector.shape_cast %114 : vector<1x100x256xbf16> to vector<100x256xbf16>
    %cst_63 = arith.constant dense<0.000000e+00> : vector<1x256xf32>
    %116 = tpu.matmul %113, %115, %cst_63 {dimension_numbers = #tpu.dot_dimension_numbers<[1], [0], [0], [1], [0, 0, 1, 1], [], []>} : vector<1x100xbf16>, vector<100x256xbf16>, vector<1x256xf32> -> vector<1x256xf32>
    %117 = arith.addf %111, %116 : vector<1x256xf32>
    %118 = vector.extract_strided_slice %8 {offsets = [18, 0], sizes = [1, 100], strides = [1, 1]} : vector<32x100xf32> to vector<1x100xf32>
    %119 = arith.truncf %118 : vector<1x100xf32> to vector<1x100xbf16>
    %c18 = arith.constant 18 : index
    %c0_64 = arith.constant 0 : index
    %c0_65 = arith.constant 0 : index
    %120 = vector.load %arg4[%c18, %c0_64, %c0_65] : memref<32x100x256xbf16, #tpu.memory_space<vmem>>, vector<1x100x256xbf16>
    %121 = vector.shape_cast %120 : vector<1x100x256xbf16> to vector<100x256xbf16>
    %cst_66 = arith.constant dense<0.000000e+00> : vector<1x256xf32>
    %122 = tpu.matmul %119, %121, %cst_66 {dimension_numbers = #tpu.dot_dimension_numbers<[1], [0], [0], [1], [0, 0, 1, 1], [], []>} : vector<1x100xbf16>, vector<100x256xbf16>, vector<1x256xf32> -> vector<1x256xf32>
    %123 = arith.addf %117, %122 : vector<1x256xf32>
    %124 = vector.extract_strided_slice %8 {offsets = [19, 0], sizes = [1, 100], strides = [1, 1]} : vector<32x100xf32> to vector<1x100xf32>
    %125 = arith.truncf %124 : vector<1x100xf32> to vector<1x100xbf16>
    %c19 = arith.constant 19 : index
    %c0_67 = arith.constant 0 : index
    %c0_68 = arith.constant 0 : index
    %126 = vector.load %arg4[%c19, %c0_67, %c0_68] : memref<32x100x256xbf16, #tpu.memory_space<vmem>>, vector<1x100x256xbf16>
    %127 = vector.shape_cast %126 : vector<1x100x256xbf16> to vector<100x256xbf16>
    %cst_69 = arith.constant dense<0.000000e+00> : vector<1x256xf32>
    %128 = tpu.matmul %125, %127, %cst_69 {dimension_numbers = #tpu.dot_dimension_numbers<[1], [0], [0], [1], [0, 0, 1, 1], [], []>} : vector<1x100xbf16>, vector<100x256xbf16>, vector<1x256xf32> -> vector<1x256xf32>
    %129 = arith.addf %123, %128 : vector<1x256xf32>
    %130 = vector.extract_strided_slice %8 {offsets = [20, 0], sizes = [1, 100], strides = [1, 1]} : vector<32x100xf32> to vector<1x100xf32>
    %131 = arith.truncf %130 : vector<1x100xf32> to vector<1x100xbf16>
    %c20 = arith.constant 20 : index
    %c0_70 = arith.constant 0 : index
    %c0_71 = arith.constant 0 : index
    %132 = vector.load %arg4[%c20, %c0_70, %c0_71] : memref<32x100x256xbf16, #tpu.memory_space<vmem>>, vector<1x100x256xbf16>
    %133 = vector.shape_cast %132 : vector<1x100x256xbf16> to vector<100x256xbf16>
    %cst_72 = arith.constant dense<0.000000e+00> : vector<1x256xf32>
    %134 = tpu.matmul %131, %133, %cst_72 {dimension_numbers = #tpu.dot_dimension_numbers<[1], [0], [0], [1], [0, 0, 1, 1], [], []>} : vector<1x100xbf16>, vector<100x256xbf16>, vector<1x256xf32> -> vector<1x256xf32>
    %135 = arith.addf %129, %134 : vector<1x256xf32>
    %136 = vector.extract_strided_slice %8 {offsets = [21, 0], sizes = [1, 100], strides = [1, 1]} : vector<32x100xf32> to vector<1x100xf32>
    %137 = arith.truncf %136 : vector<1x100xf32> to vector<1x100xbf16>
    %c21 = arith.constant 21 : index
    %c0_73 = arith.constant 0 : index
    %c0_74 = arith.constant 0 : index
    %138 = vector.load %arg4[%c21, %c0_73, %c0_74] : memref<32x100x256xbf16, #tpu.memory_space<vmem>>, vector<1x100x256xbf16>
    %139 = vector.shape_cast %138 : vector<1x100x256xbf16> to vector<100x256xbf16>
    %cst_75 = arith.constant dense<0.000000e+00> : vector<1x256xf32>
    %140 = tpu.matmul %137, %139, %cst_75 {dimension_numbers = #tpu.dot_dimension_numbers<[1], [0], [0], [1], [0, 0, 1, 1], [], []>} : vector<1x100xbf16>, vector<100x256xbf16>, vector<1x256xf32> -> vector<1x256xf32>
    %141 = arith.addf %135, %140 : vector<1x256xf32>
    %142 = vector.extract_strided_slice %8 {offsets = [22, 0], sizes = [1, 100], strides = [1, 1]} : vector<32x100xf32> to vector<1x100xf32>
    %143 = arith.truncf %142 : vector<1x100xf32> to vector<1x100xbf16>
    %c22 = arith.constant 22 : index
    %c0_76 = arith.constant 0 : index
    %c0_77 = arith.constant 0 : index
    %144 = vector.load %arg4[%c22, %c0_76, %c0_77] : memref<32x100x256xbf16, #tpu.memory_space<vmem>>, vector<1x100x256xbf16>
    %145 = vector.shape_cast %144 : vector<1x100x256xbf16> to vector<100x256xbf16>
    %cst_78 = arith.constant dense<0.000000e+00> : vector<1x256xf32>
    %146 = tpu.matmul %143, %145, %cst_78 {dimension_numbers = #tpu.dot_dimension_numbers<[1], [0], [0], [1], [0, 0, 1, 1], [], []>} : vector<1x100xbf16>, vector<100x256xbf16>, vector<1x256xf32> -> vector<1x256xf32>
    %147 = arith.addf %141, %146 : vector<1x256xf32>
    %148 = vector.extract_strided_slice %8 {offsets = [23, 0], sizes = [1, 100], strides = [1, 1]} : vector<32x100xf32> to vector<1x100xf32>
    %149 = arith.truncf %148 : vector<1x100xf32> to vector<1x100xbf16>
    %c23 = arith.constant 23 : index
    %c0_79 = arith.constant 0 : index
    %c0_80 = arith.constant 0 : index
    %150 = vector.load %arg4[%c23, %c0_79, %c0_80] : memref<32x100x256xbf16, #tpu.memory_space<vmem>>, vector<1x100x256xbf16>
    %151 = vector.shape_cast %150 : vector<1x100x256xbf16> to vector<100x256xbf16>
    %cst_81 = arith.constant dense<0.000000e+00> : vector<1x256xf32>
    %152 = tpu.matmul %149, %151, %cst_81 {dimension_numbers = #tpu.dot_dimension_numbers<[1], [0], [0], [1], [0, 0, 1, 1], [], []>} : vector<1x100xbf16>, vector<100x256xbf16>, vector<1x256xf32> -> vector<1x256xf32>
    %153 = arith.addf %147, %152 : vector<1x256xf32>
    %154 = vector.extract_strided_slice %8 {offsets = [24, 0], sizes = [1, 100], strides = [1, 1]} : vector<32x100xf32> to vector<1x100xf32>
    %155 = arith.truncf %154 : vector<1x100xf32> to vector<1x100xbf16>
    %c24 = arith.constant 24 : index
    %c0_82 = arith.constant 0 : index
    %c0_83 = arith.constant 0 : index
    %156 = vector.load %arg4[%c24, %c0_82, %c0_83] : memref<32x100x256xbf16, #tpu.memory_space<vmem>>, vector<1x100x256xbf16>
    %157 = vector.shape_cast %156 : vector<1x100x256xbf16> to vector<100x256xbf16>
    %cst_84 = arith.constant dense<0.000000e+00> : vector<1x256xf32>
    %158 = tpu.matmul %155, %157, %cst_84 {dimension_numbers = #tpu.dot_dimension_numbers<[1], [0], [0], [1], [0, 0, 1, 1], [], []>} : vector<1x100xbf16>, vector<100x256xbf16>, vector<1x256xf32> -> vector<1x256xf32>
    %159 = arith.addf %153, %158 : vector<1x256xf32>
    %160 = vector.extract_strided_slice %8 {offsets = [25, 0], sizes = [1, 100], strides = [1, 1]} : vector<32x100xf32> to vector<1x100xf32>
    %161 = arith.truncf %160 : vector<1x100xf32> to vector<1x100xbf16>
    %c25 = arith.constant 25 : index
    %c0_85 = arith.constant 0 : index
    %c0_86 = arith.constant 0 : index
    %162 = vector.load %arg4[%c25, %c0_85, %c0_86] : memref<32x100x256xbf16, #tpu.memory_space<vmem>>, vector<1x100x256xbf16>
    %163 = vector.shape_cast %162 : vector<1x100x256xbf16> to vector<100x256xbf16>
    %cst_87 = arith.constant dense<0.000000e+00> : vector<1x256xf32>
    %164 = tpu.matmul %161, %163, %cst_87 {dimension_numbers = #tpu.dot_dimension_numbers<[1], [0], [0], [1], [0, 0, 1, 1], [], []>} : vector<1x100xbf16>, vector<100x256xbf16>, vector<1x256xf32> -> vector<1x256xf32>
    %165 = arith.addf %159, %164 : vector<1x256xf32>
    %166 = vector.extract_strided_slice %8 {offsets = [26, 0], sizes = [1, 100], strides = [1, 1]} : vector<32x100xf32> to vector<1x100xf32>
    %167 = arith.truncf %166 : vector<1x100xf32> to vector<1x100xbf16>
    %c26 = arith.constant 26 : index
    %c0_88 = arith.constant 0 : index
    %c0_89 = arith.constant 0 : index
    %168 = vector.load %arg4[%c26, %c0_88, %c0_89] : memref<32x100x256xbf16, #tpu.memory_space<vmem>>, vector<1x100x256xbf16>
    %169 = vector.shape_cast %168 : vector<1x100x256xbf16> to vector<100x256xbf16>
    %cst_90 = arith.constant dense<0.000000e+00> : vector<1x256xf32>
    %170 = tpu.matmul %167, %169, %cst_90 {dimension_numbers = #tpu.dot_dimension_numbers<[1], [0], [0], [1], [0, 0, 1, 1], [], []>} : vector<1x100xbf16>, vector<100x256xbf16>, vector<1x256xf32> -> vector<1x256xf32>
    %171 = arith.addf %165, %170 : vector<1x256xf32>
    %172 = vector.extract_strided_slice %8 {offsets = [27, 0], sizes = [1, 100], strides = [1, 1]} : vector<32x100xf32> to vector<1x100xf32>
    %173 = arith.truncf %172 : vector<1x100xf32> to vector<1x100xbf16>
    %c27 = arith.constant 27 : index
    %c0_91 = arith.constant 0 : index
    %c0_92 = arith.constant 0 : index
    %174 = vector.load %arg4[%c27, %c0_91, %c0_92] : memref<32x100x256xbf16, #tpu.memory_space<vmem>>, vector<1x100x256xbf16>
    %175 = vector.shape_cast %174 : vector<1x100x256xbf16> to vector<100x256xbf16>
    %cst_93 = arith.constant dense<0.000000e+00> : vector<1x256xf32>
    %176 = tpu.matmul %173, %175, %cst_93 {dimension_numbers = #tpu.dot_dimension_numbers<[1], [0], [0], [1], [0, 0, 1, 1], [], []>} : vector<1x100xbf16>, vector<100x256xbf16>, vector<1x256xf32> -> vector<1x256xf32>
    %177 = arith.addf %171, %176 : vector<1x256xf32>
    %178 = vector.extract_strided_slice %8 {offsets = [28, 0], sizes = [1, 100], strides = [1, 1]} : vector<32x100xf32> to vector<1x100xf32>
    %179 = arith.truncf %178 : vector<1x100xf32> to vector<1x100xbf16>
    %c28 = arith.constant 28 : index
    %c0_94 = arith.constant 0 : index
    %c0_95 = arith.constant 0 : index
    %180 = vector.load %arg4[%c28, %c0_94, %c0_95] : memref<32x100x256xbf16, #tpu.memory_space<vmem>>, vector<1x100x256xbf16>
    %181 = vector.shape_cast %180 : vector<1x100x256xbf16> to vector<100x256xbf16>
    %cst_96 = arith.constant dense<0.000000e+00> : vector<1x256xf32>
    %182 = tpu.matmul %179, %181, %cst_96 {dimension_numbers = #tpu.dot_dimension_numbers<[1], [0], [0], [1], [0, 0, 1, 1], [], []>} : vector<1x100xbf16>, vector<100x256xbf16>, vector<1x256xf32> -> vector<1x256xf32>
    %183 = arith.addf %177, %182 : vector<1x256xf32>
    %184 = vector.extract_strided_slice %8 {offsets = [29, 0], sizes = [1, 100], strides = [1, 1]} : vector<32x100xf32> to vector<1x100xf32>
    %185 = arith.truncf %184 : vector<1x100xf32> to vector<1x100xbf16>
    %c29 = arith.constant 29 : index
    %c0_97 = arith.constant 0 : index
    %c0_98 = arith.constant 0 : index
    %186 = vector.load %arg4[%c29, %c0_97, %c0_98] : memref<32x100x256xbf16, #tpu.memory_space<vmem>>, vector<1x100x256xbf16>
    %187 = vector.shape_cast %186 : vector<1x100x256xbf16> to vector<100x256xbf16>
    %cst_99 = arith.constant dense<0.000000e+00> : vector<1x256xf32>
    %188 = tpu.matmul %185, %187, %cst_99 {dimension_numbers = #tpu.dot_dimension_numbers<[1], [0], [0], [1], [0, 0, 1, 1], [], []>} : vector<1x100xbf16>, vector<100x256xbf16>, vector<1x256xf32> -> vector<1x256xf32>
    %189 = arith.addf %183, %188 : vector<1x256xf32>
    %190 = vector.extract_strided_slice %8 {offsets = [30, 0], sizes = [1, 100], strides = [1, 1]} : vector<32x100xf32> to vector<1x100xf32>
    %191 = arith.truncf %190 : vector<1x100xf32> to vector<1x100xbf16>
    %c30 = arith.constant 30 : index
    %c0_100 = arith.constant 0 : index
    %c0_101 = arith.constant 0 : index
    %192 = vector.load %arg4[%c30, %c0_100, %c0_101] : memref<32x100x256xbf16, #tpu.memory_space<vmem>>, vector<1x100x256xbf16>
    %193 = vector.shape_cast %192 : vector<1x100x256xbf16> to vector<100x256xbf16>
    %cst_102 = arith.constant dense<0.000000e+00> : vector<1x256xf32>
    %194 = tpu.matmul %191, %193, %cst_102 {dimension_numbers = #tpu.dot_dimension_numbers<[1], [0], [0], [1], [0, 0, 1, 1], [], []>} : vector<1x100xbf16>, vector<100x256xbf16>, vector<1x256xf32> -> vector<1x256xf32>
    %195 = arith.addf %189, %194 : vector<1x256xf32>
    %196 = vector.extract_strided_slice %8 {offsets = [31, 0], sizes = [1, 100], strides = [1, 1]} : vector<32x100xf32> to vector<1x100xf32>
    %197 = arith.truncf %196 : vector<1x100xf32> to vector<1x100xbf16>
    %c31 = arith.constant 31 : index
    %c0_103 = arith.constant 0 : index
    %c0_104 = arith.constant 0 : index
    %198 = vector.load %arg4[%c31, %c0_103, %c0_104] : memref<32x100x256xbf16, #tpu.memory_space<vmem>>, vector<1x100x256xbf16>
    %199 = vector.shape_cast %198 : vector<1x100x256xbf16> to vector<100x256xbf16>
    %cst_105 = arith.constant dense<0.000000e+00> : vector<1x256xf32>
    %200 = tpu.matmul %197, %199, %cst_105 {dimension_numbers = #tpu.dot_dimension_numbers<[1], [0], [0], [1], [0, 0, 1, 1], [], []>} : vector<1x100xbf16>, vector<100x256xbf16>, vector<1x256xf32> -> vector<1x256xf32>
    %201 = arith.addf %195, %200 : vector<1x256xf32>
    %cst_106 = arith.constant 0.000000e+00 : f32
    %202 = vector.broadcast %cst_106 : f32 to vector<1x256xf32>
    %203 = arith.maximumf %201, %202 : vector<1x256xf32>
    %c0_107 = arith.constant 0 : index
    %c0_108 = arith.constant 0 : index
    %204 = vector.load %arg6[%c0_107, %c0_108] : memref<256x2xf32, #tpu.memory_space<vmem>>, vector<256x2xf32>
    %cst_109 = arith.constant dense<0.000000e+00> : vector<1x2xf32>
    %205 = tpu.matmul %203, %204, %cst_109 {dimension_numbers = #tpu.dot_dimension_numbers<[1], [0], [0], [1], [0, 0, 1, 1], [], []>} : vector<1x256xf32>, vector<256x2xf32>, vector<1x2xf32> -> vector<1x2xf32>
    %c0_110 = arith.constant 0 : index
    %c0_111 = arith.constant 0 : index
    %206 = vector.load %arg7[%c0_110, %c0_111] : memref<1x2xf32, #tpu.memory_space<vmem>>, vector<1x2xf32>
    %207 = arith.addf %205, %206 : vector<1x2xf32>
    %c0_112 = arith.constant 0 : index
    %c0_113 = arith.constant 0 : index
    %c0_114 = arith.constant 0 : index
    %208 = vector.load %arg8[%c0_112, %c0_113, %c0_114] : memref<1x1x2xf32, #tpu.memory_space<vmem>>, vector<1x1x2xf32>
    %209 = vector.shape_cast %208 : vector<1x1x2xf32> to vector<1x2xf32>
    %210 = vector.shape_cast %207 : vector<1x2xf32> to vector<1x1x2xf32>
    tpu.vector_store %arg8[%c0_112, %c0_113, %c0_114], %210 {strides = array<i32>} : memref<1x1x2xf32, #tpu.memory_space<vmem>>, vector<1x1x2xf32>,
    return
  }
  func.func @transform_0(%arg0: i32) -> (i32, i32, i32) {
    %c0_i32 = arith.constant 0 : i32
    %c0_i32_0 = arith.constant 0 : i32
    %c0_i32_1 = arith.constant 0 : i32
    return %arg0, %c0_i32, %c0_i32_0 : i32, i32, i32
  }
  func.func @transform_1(%arg0: i32) -> (i32, i32) {
    %c0_i32 = arith.constant 0 : i32
    %c0_i32_0 = arith.constant 0 : i32
    %c0_i32_1 = arith.constant 0 : i32
    return %c0_i32, %c0_i32_0 : i32, i32
  }
  func.func @transform_2(%arg0: i32) -> (i32, i32) {
    %c0_i32 = arith.constant 0 : i32
    %c0_i32_0 = arith.constant 0 : i32
    %c0_i32_1 = arith.constant 0 : i32
    return %c0_i32, %c0_i32_0 : i32, i32
  }
  func.func @transform_3(%arg0: i32) -> (i32, i32, i32) {
    %c0_i32 = arith.constant 0 : i32
    %c0_i32_0 = arith.constant 0 : i32
    %c0_i32_1 = arith.constant 0 : i32
    %c0_i32_2 = arith.constant 0 : i32
    return %c0_i32, %c0_i32_0, %c0_i32_1 : i32, i32, i32
  }
  func.func @transform_4(%arg0: i32) -> (i32, i32) {
    %c0_i32 = arith.constant 0 : i32
    %c0_i32_0 = arith.constant 0 : i32
    %c0_i32_1 = arith.constant 0 : i32
    return %c0_i32, %c0_i32_0 : i32, i32
  }
  func.func @transform_5(%arg0: i32) -> (i32, i32) {
    %c0_i32 = arith.constant 0 : i32
    %c0_i32_0 = arith.constant 0 : i32
    %c0_i32_1 = arith.constant 0 : i32
    return %c0_i32, %c0_i32_0 : i32, i32
  }
  func.func @transform_6(%arg0: i32) -> (i32, i32) {
    %c0_i32 = arith.constant 0 : i32
    %c0_i32_0 = arith.constant 0 : i32
    %c0_i32_1 = arith.constant 0 : i32
    return %c0_i32, %c0_i32_0 : i32, i32
  }
  func.func @transform_7(%arg0: i32) -> (i32, i32, i32) {
    %c0_i32 = arith.constant 0 : i32
    %c0_i32_0 = arith.constant 0 : i32
    %c0_i32_1 = arith.constant 0 : i32
    return %arg0, %c0_i32, %c0_i32_0 : i32, i32, i32
  }
}

</mosaic_0001>

<bundles_post_ra>
// kernel: dqn_forward.2
= control target key start
LH: loop header
LB: loop body
LE: loop exit
PB: predicated region body
PF: predicated region fallthrough
CT: control target
= control target key end

     0   :  { %s593_s12 = smov 0   ;;  %s764_s0 = inlined_call_operand.vmem [shape: f32[2,256,400], index: 0, kind: input, shape index: {}]   ;;  %s765_s1 = inlined_call_operand.vmem [shape: f32[16,256], index: 1, kind: input, shape index: {}]   ;;  %s766_s2 = inlined_call_operand.vmem [shape: f32[16,1], index: 2, kind: input, shape index: {}]   ;;  %s767_s3 = inlined_call_operand.vmem [shape: f32[2,16,400], index: 3, kind: output, shape index: {}]  }
   0x1 LB: > { %s541_s13 = sadd.s32 4294967295, %s570_s12   ;;  %p545_p0 = scmp.ge.s32.totalorder %s570_s12, 1  ;;  %s570_s12 = sphi %s593_s12, %s13_s12  }
   0x2   : > { %p137_p1 = scmp.lt.s32.totalorder %s570_s12, 3 }
   0x4   : > { %p138_p2 = pnand %p545_p0, %p137_p1 }
   0x5   : > { %p161_p3 = scmp.lt.s32.totalorder (!%p138_p2), %s541_s13, 1 }
   0x6   : > { %141 = sbr.rel (%p138_p2) target bundleno = 283 (0x11b), region = 32 }
   0xb   : > { %v172_v0 = vld [vmem:[%s765_s1 + $0x8] sm:$0xff]  ;;  %v303_v1 = vld [vmem:[%s766_s2] sm:$0xff]  ;;  %s769_s13 = smov (!%p161_p3, %s541_s13), 1  ;;  %v572_v2 = vmov 0   ;;  %vm480_vm0 = vcmask 130048  }
   0xc   : > { %379 = vmatprep.mubr.f32.mxu0 %v172_v0  ;;  %456 = vmatprep.mubr.f32.mxu1 %v172_v0  ;;  %s552_s18 = sshll.u32 %s769_s13, 10  ;;  %s553_s30 = sshll.u32 %s769_s13, 6 }
   0xd   : > { %563 = vset.pattern.permute.xlu0 %v572_v2  ;;  %s613_s21 = scalar_lea.vmem %s764_s0, %s552_s18  ;;  %s170_s6 = scalar_lea.vmem %s767_s3, %s553_s30 }
   0xe   : > { %307 = vperm.xlu0 %563, %v303_v1   ;;  %v236_v3 = vld [vmem:[%s613_s21 + $0x1e8] sm:$0xff]  ;;  %v238_v4 = vld [vmem:[%s613_s21 + $0x1f8] sm:$0xff]  ;;  %v235_v5 = vld [vmem:[%s613_s21 + $0x1e0] sm:$0xff] }
   0xf   : > { %315 = vmatprep.subr.mxu0 %v236_v3  ;;  %392 = vmatprep.subr.mxu1 %v238_v4  ;;  %v237_v6 = vld [vmem:[%s613_s21 + $0x1f0] sm:$0xff]  ;;  %v232_v7 = vld [vmem:[%s613_s21 + $0x1c8] sm:$0xff]  ;;  %v234_v8 = vld [vmem:[%s613_s21 + $0x1d8] sm:$0xff] }
  0x10   : > { %316 = vmatpush1.msra.mxu0 %v235_v5  ;;  %393 = vmatpush1.msra.mxu1 %v237_v6  ;;  %v231_v9 = vld [vmem:[%s613_s21 + $0x1c0] sm:$0xff]  ;;  %v233_v10 = vld [vmem:[%s613_s21 + $0x1d0] sm:$0xff]  ;;  %v228_v11 = vld [vmem:[%s613_s21 + $0x1a8] sm:$0xff] }
  0x11   : > { %317 = vmatprep.subr.mxu0 %v232_v7  ;;  %394 = vmatprep.subr.mxu1 %v234_v8  ;;  %v230_v12 = vld [vmem:[%s613_s21 + $0x1b8] sm:$0xff]  ;;  %v227_v13 = vld [vmem:[%s613_s21 + $0x1a0] sm:$0xff]  ;;  %v229_v14 = vld [vmem:[%s613_s21 + $0x1b0] sm:$0xff] }
  0x12   : > { %318 = vmatpush1.msra.mxu0 %v231_v9  ;;  %395 = vmatpush1.msra.mxu1 %v233_v10  ;;  %v224_v15 = vld [vmem:[%s613_s21 + $0x188] sm:$0xff]  ;;  %v226_v16 = vld [vmem:[%s613_s21 + $0x198] sm:$0xff]  ;;  %v223_v17 = vld [vmem:[%s613_s21 + $0x180] sm:$0xff] }
  0x13   : > { %319 = vmatprep.subr.mxu0 %v228_v11  ;;  %396 = vmatprep.subr.mxu1 %v230_v12  ;;  %v225_v18 = vld [vmem:[%s613_s21 + $0x190] sm:$0xff]  ;;  %v220_v19 = vld [vmem:[%s613_s21 + $0x168] sm:$0xff]  ;;  %v222_v20 = vld [vmem:[%s613_s21 + $0x178] sm:$0xff] }
  0x14   : > { %320 = vmatpush1.msra.mxu0 %v227_v13  ;;  %397 = vmatpush1.msra.mxu1 %v229_v14  ;;  %v219_v21 = vld [vmem:[%s613_s21 + $0x160] sm:$0xff]  ;;  %v221_v22 = vld [vmem:[%s613_s21 + $0x170] sm:$0xff]  ;;  %v216_v23 = vld [vmem:[%s613_s21 + $0x148] sm:$0xff] }
  0x15   : > { %321 = vmatprep.subr.mxu0 %v224_v15  ;;  %398 = vmatprep.subr.mxu1 %v226_v16  ;;  %v218_v24 = vld [vmem:[%s613_s21 + $0x158] sm:$0xff]  ;;  %v215_v25 = vld [vmem:[%s613_s21 + $0x140] sm:$0xff]  ;;  %v217_v26 = vld [vmem:[%s613_s21 + $0x150] sm:$0xff] }
  0x16   : > { %322 = vmatpush1.msra.mxu0 %v223_v17  ;;  %399 = vmatpush1.msra.mxu1 %v225_v18  ;;  %v212_v27 = vld [vmem:[%s613_s21 + $0x128] sm:$0xff]  ;;  %v214_v28 = vld [vmem:[%s613_s21 + $0x138] sm:$0xff]  ;;  %v211_v29 = vld [vmem:[%s613_s21 + $0x120] sm:$0xff] }
  0x17   : > { %323 = vmatprep.subr.mxu0 %v220_v19  ;;  %400 = vmatprep.subr.mxu1 %v222_v20  ;;  %v213_v30 = vld [vmem:[%s613_s21 + $0x130] sm:$0xff]  ;;  %v208_v31 = vld [vmem:[%s613_s21 + $0x108] sm:$0xff]  ;;  %v210_v32 = vld [vmem:[%s613_s21 + $0x118] sm:$0xff] }
  0x18   : > { %324 = vmatpush1.msra.mxu0 %v219_v21  ;;  %401 = vmatpush1.msra.mxu1 %v221_v22  ;;  %v207_v33 = vld [vmem:[%s613_s21 + $0x100] sm:$0xff]  ;;  %v209_v34 = vld [vmem:[%s613_s21 + $0x110] sm:$0xff]  ;;  %v204_v35 = vld [vmem:[%s613_s21 + $0xe8] sm:$0xff] }
  0x19   : > { %325 = vmatprep.subr.mxu0 %v216_v23  ;;  %402 = vmatprep.subr.mxu1 %v218_v24  ;;  %v206_v36 = vld [vmem:[%s613_s21 + $0xf8] sm:$0xff]  ;;  %v203_v37 = vld [vmem:[%s613_s21 + $0xe0] sm:$0xff]  ;;  %v205_v38 = vld [vmem:[%s613_s21 + $0xf0] sm:$0xff] }
  0x1a   : > { %326 = vmatpush1.msra.mxu0 %v215_v25  ;;  %403 = vmatpush1.msra.mxu1 %v217_v26  ;;  %v200_v39 = vld [vmem:[%s613_s21 + $0xc8] sm:$0xff]  ;;  %v202_v40 = vld [vmem:[%s613_s21 + $0xd8] sm:$0xff]  ;;  %v199_v41 = vld [vmem:[%s613_s21 + $0xc0] sm:$0xff] }
  0x1b   : > { %327 = vmatprep.subr.mxu0 %v212_v27  ;;  %404 = vmatprep.subr.mxu1 %v214_v28  ;;  %v201_v42 = vld [vmem:[%s613_s21 + $0xd0] sm:$0xff]  ;;  %v196_v43 = vld [vmem:[%s613_s21 + $0xa8] sm:$0xff]  ;;  %v198_v44 = vld [vmem:[%s613_s21 + $0xb8] sm:$0xff] }
  0x1c   : > { %328 = vmatpush1.msra.mxu0 %v211_v29  ;;  %405 = vmatpush1.msra.mxu1 %v213_v30  ;;  %v195_v45 = vld [vmem:[%s613_s21 + $0xa0] sm:$0xff]  ;;  %v197_v46 = vld [vmem:[%s613_s21 + $0xb0] sm:$0xff]  ;;  %v192_v47 = vld [vmem:[%s613_s21 + $0x88] sm:$0xff] }
  0x1d   : > { %329 = vmatprep.subr.mxu0 %v208_v31  ;;  %406 = vmatprep.subr.mxu1 %v210_v32  ;;  %v194_v48 = vld [vmem:[%s613_s21 + $0x98] sm:$0xff]  ;;  %v191_v49 = vld [vmem:[%s613_s21 + $0x80] sm:$0xff]  ;;  %v193_v50 = vld [vmem:[%s613_s21 + $0x90] sm:$0xff] }
  0x1e   : > { %330 = vmatpush1.msra.mxu0 %v207_v33  ;;  %407 = vmatpush1.msra.mxu1 %v209_v34  ;;  %v188_v51 = vld [vmem:[%s613_s21 + $0x68] sm:$0xff]  ;;  %v190_v52 = vld [vmem:[%s613_s21 + $0x78] sm:$0xff]  ;;  %v187_v53 = vld [vmem:[%s613_s21 + $0x60] sm:$0xff] }
  0x1f   : > { %331 = vmatprep.subr.mxu0 %v204_v35  ;;  %408 = vmatprep.subr.mxu1 %v206_v36  ;;  %v189_v54 = vld [vmem:[%s613_s21 + $0x70] sm:$0xff]  ;;  %v184_v55 = vld [vmem:[%s613_s21 + $0x48] sm:$0xff]  ;;  %v186_v56 = vld [vmem:[%s613_s21 + $0x58] sm:$0xff] }
  0x20   : > { %332 = vmatpush1.msra.mxu0 %v203_v37  ;;  %409 = vmatpush1.msra.mxu1 %v205_v38  ;;  %v183_v57 = vld [vmem:[%s613_s21 + $0x40] sm:$0xff]  ;;  %v185_v58 = vld [vmem:[%s613_s21 + $0x50] sm:$0xff]  ;;  %v180_v59 = vld [vmem:[%s613_s21 + $0x28] sm:$0xff] }
  0x21   : > { %333 = vmatprep.subr.mxu0 %v200_v39  ;;  %410 = vmatprep.subr.mxu1 %v202_v40  ;;  %v182_v60 = vld [vmem:[%s613_s21 + $0x38] sm:$0xff]  ;;  %v179_v61 = vld [vmem:[%s613_s21 + $0x20] sm:$0xff]  ;;  %v181_v62 = vld [vmem:[%s613_s21 + $0x30] sm:$0xff] }
  0x22   : > { %334 = vmatpush1.msra.mxu0 %v199_v41  ;;  %411 = vmatpush1.msra.mxu1 %v201_v42  ;;  %v176_v63 = vld [vmem:[%s613_s21 + $0x8] sm:$0xff]  ;;  %v178_v0 = vld [vmem:[%s613_s21 + $0x18] sm:$0xff]  ;;  %v175_v1 = vld [vmem:[%s613_s21] sm:$0xff] }
  0x23   : > { %335 = vmatprep.subr.mxu0 %v196_v43  ;;  %412 = vmatprep.subr.mxu1 %v198_v44  ;;  %v177_v2 = vld [vmem:[%s613_s21 + $0x10] sm:$0xff]  ;;  %v300_v3 = vld [vmem:[%s613_s21 + $0x3e8] sm:$0xff]  ;;  %v302_v4 = vld [vmem:[%s613_s21 + $0x3f8] sm:$0xff] }
  0x24   : > { %336 = vmatpush1.msra.mxu0 %v195_v45  ;;  %413 = vmatpush1.msra.mxu1 %v197_v46  ;;  %v299_v5 = vld [vmem:[%s613_s21 + $0x3e0] sm:$0xff]  ;;  %v301_v6 = vld [vmem:[%s613_s21 + $0x3f0] sm:$0xff]  ;;  %v296_v7 = vld [vmem:[%s613_s21 + $0x3c8] sm:$0xff] }
  0x25   : > { %337 = vmatprep.subr.mxu0 %v192_v47  ;;  %414 = vmatprep.subr.mxu1 %v194_v48  ;;  %v298_v8 = vld [vmem:[%s613_s21 + $0x3d8] sm:$0xff]  ;;  %v295_v9 = vld [vmem:[%s613_s21 + $0x3c0] sm:$0xff]  ;;  %v297_v10 = vld [vmem:[%s613_s21 + $0x3d0] sm:$0xff] }
  0x26   : > { %338 = vmatpush1.msra.mxu0 %v191_v49  ;;  %415 = vmatpush1.msra.mxu1 %v193_v50  ;;  %v292_v11 = vld [vmem:[%s613_s21 + $0x3a8] sm:$0xff]  ;;  %v294_v12 = vld [vmem:[%s613_s21 + $0x3b8] sm:$0xff]  ;;  %v291_v13 = vld [vmem:[%s613_s21 + $0x3a0] sm:$0xff] }
  0x27   : > { %339 = vmatprep.subr.mxu0 %v188_v51  ;;  %416 = vmatprep.subr.mxu1 %v190_v52  ;;  %v293_v14 = vld [vmem:[%s613_s21 + $0x3b0] sm:$0xff]  ;;  %v288_v15 = vld [vmem:[%s613_s21 + $0x388] sm:$0xff]  ;;  %v290_v16 = vld [vmem:[%s613_s21 + $0x398] sm:$0xff] }
  0x28   : > { %340 = vmatpush1.msra.mxu0 %v187_v53  ;;  %417 = vmatpush1.msra.mxu1 %v189_v54  ;;  %v287_v17 = vld [vmem:[%s613_s21 + $0x380] sm:$0xff]  ;;  %v289_v18 = vld [vmem:[%s613_s21 + $0x390] sm:$0xff]  ;;  %v284_v19 = vld [vmem:[%s613_s21 + $0x368] sm:$0xff] }
  0x29   : > { %341 = vmatprep.subr.mxu0 %v184_v55  ;;  %418 = vmatprep.subr.mxu1 %v186_v56  ;;  %v286_v20 = vld [vmem:[%s613_s21 + $0x378] sm:$0xff]  ;;  %v283_v21 = vld [vmem:[%s613_s21 + $0x360] sm:$0xff]  ;;  %v285_v22 = vld [vmem:[%s613_s21 + $0x370] sm:$0xff] }
  0x2a   : > { %342 = vmatpush1.msra.mxu0 %v183_v57  ;;  %419 = vmatpush1.msra.mxu1 %v185_v58  ;;  %v280_v23 = vld [vmem:[%s613_s21 + $0x348] sm:$0xff]  ;;  %v282_v24 = vld [vmem:[%s613_s21 + $0x358] sm:$0xff]  ;;  %v279_v25 = vld [vmem:[%s613_s21 + $0x340] sm:$0xff] }
  0x2b   : > { %343 = vmatprep.subr.mxu0 %v180_v59  ;;  %420 = vmatprep.subr.mxu1 %v182_v60  ;;  %v281_v26 = vld [vmem:[%s613_s21 + $0x350] sm:$0xff]  ;;  %v276_v27 = vld [vmem:[%s613_s21 + $0x328] sm:$0xff]  ;;  %v278_v28 = vld [vmem:[%s613_s21 + $0x338] sm:$0xff] }
  0x2c   : > { %344 = vmatpush1.msra.mxu0 %v179_v61  ;;  %421 = vmatpush1.msra.mxu1 %v181_v62  ;;  %v275_v29 = vld [vmem:[%s613_s21 + $0x320] sm:$0xff]  ;;  %v277_v30 = vld [vmem:[%s613_s21 + $0x330] sm:$0xff]  ;;  %v272_v31 = vld [vmem:[%s613_s21 + $0x308] sm:$0xff] }
  0x2d   : > { %345 = vmatprep.subr.mxu0 %v176_v63  ;;  %422 = vmatprep.subr.mxu1 %v178_v0  ;;  %v274_v32 = vld [vmem:[%s613_s21 + $0x318] sm:$0xff]  ;;  %v271_v33 = vld [vmem:[%s613_s21 + $0x300] sm:$0xff]  ;;  %v273_v34 = vld [vmem:[%s613_s21 + $0x310] sm:$0xff] }
  0x2e   : > { %346 = vmatpush1.msra.mxu0 %v175_v1  ;;  %423 = vmatpush1.msra.mxu1 %v177_v2  ;;  %v268_v35 = vld [vmem:[%s613_s21 + $0x2e8] sm:$0xff]  ;;  %v270_v36 = vld [vmem:[%s613_s21 + $0x2f8] sm:$0xff]  ;;  %v267_v37 = vld [vmem:[%s613_s21 + $0x2e0] sm:$0xff] }
  0x2f   : > { %347 = vmatprep.subr.mxu0 %v300_v3  ;;  %424 = vmatprep.subr.mxu1 %v302_v4  ;;  %v269_v38 = vld [vmem:[%s613_s21 + $0x2f0] sm:$0xff]  ;;  %v264_v39 = vld [vmem:[%s613_s21 + $0x2c8] sm:$0xff]  ;;  %v266_v40 = vld [vmem:[%s613_s21 + $0x2d8] sm:$0xff] }
  0x30   : > { %348 = vmatpush2.msra.mxu0 %v299_v5  ;;  %425 = vmatpush2.msra.mxu1 %v301_v6  ;;  %v263_v41 = vld [vmem:[%s613_s21 + $0x2c0] sm:$0xff]  ;;  %v265_v42 = vld [vmem:[%s613_s21 + $0x2d0] sm:$0xff]  ;;  %v260_v43 = vld [vmem:[%s613_s21 + $0x2a8] sm:$0xff] }
  0x31   : > { %349 = vmatprep.subr.mxu0 %v296_v7  ;;  %426 = vmatprep.subr.mxu1 %v298_v8  ;;  %v262_v44 = vld [vmem:[%s613_s21 + $0x2b8] sm:$0xff]  ;;  %v259_v45 = vld [vmem:[%s613_s21 + $0x2a0] sm:$0xff]  ;;  %v261_v46 = vld [vmem:[%s613_s21 + $0x2b0] sm:$0xff] }
  0x32   : > { %350 = vmatpush2.msra.mxu0 %v295_v9  ;;  %427 = vmatpush2.msra.mxu1 %v297_v10  ;;  %v256_v47 = vld [vmem:[%s613_s21 + $0x288] sm:$0xff]  ;;  %v258_v48 = vld [vmem:[%s613_s21 + $0x298] sm:$0xff]  ;;  %v255_v49 = vld [vmem:[%s613_s21 + $0x280] sm:$0xff] }
  0x33   : > { %351 = vmatprep.subr.mxu0 %v292_v11  ;;  %428 = vmatprep.subr.mxu1 %v294_v12  ;;  %v257_v50 = vld [vmem:[%s613_s21 + $0x290] sm:$0xff]  ;;  %v252_v51 = vld [vmem:[%s613_s21 + $0x268] sm:$0xff]  ;;  %v254_v52 = vld [vmem:[%s613_s21 + $0x278] sm:$0xff] }
  0x34   : > { %352 = vmatpush2.msra.mxu0 %v291_v13  ;;  %429 = vmatpush2.msra.mxu1 %v293_v14  ;;  %v251_v53 = vld [vmem:[%s613_s21 + $0x260] sm:$0xff]  ;;  %v253_v54 = vld [vmem:[%s613_s21 + $0x270] sm:$0xff]  ;;  %v248_v55 = vld [vmem:[%s613_s21 + $0x248] sm:$0xff] }
  0x35   : > { %353 = vmatprep.subr.mxu0 %v288_v15  ;;  %430 = vmatprep.subr.mxu1 %v290_v16  ;;  %v250_v56 = vld [vmem:[%s613_s21 + $0x258] sm:$0xff]  ;;  %v247_v57 = vld [vmem:[%s613_s21 + $0x240] sm:$0xff]  ;;  %v249_v58 = vld [vmem:[%s613_s21 + $0x250] sm:$0xff] }
  0x36   : > { %354 = vmatpush2.msra.mxu0 %v287_v17  ;;  %431 = vmatpush2.msra.mxu1 %v289_v18  ;;  %v244_v59 = vld [vmem:[%s613_s21 + $0x228] sm:$0xff]  ;;  %v246_v60 = vld [vmem:[%s613_s21 + $0x238] sm:$0xff]  ;;  %v243_v61 = vld [vmem:[%s613_s21 + $0x220] sm:$0xff] }
  0x37   : > { %355 = vmatprep.subr.mxu0 %v284_v19  ;;  %432 = vmatprep.subr.mxu1 %v286_v20  ;;  %v245_v62 = vld [vmem:[%s613_s21 + $0x230] sm:$0xff]  ;;  %v240_v63 = vld [vmem:[%s613_s21 + $0x208] sm:$0xff]  ;;  %v242_v0 = vld [vmem:[%s613_s21 + $0x218] sm:$0xff] }
  0x38   : > { %356 = vmatpush2.msra.mxu0 %v283_v21  ;;  %433 = vmatpush2.msra.mxu1 %v285_v22  ;;  %v239_v1 = vld [vmem:[%s613_s21 + $0x200] sm:$0xff]  ;;  %v241_v2 = vld [vmem:[%s613_s21 + $0x210] sm:$0xff]  ;;  %v174_v4 = vld [vmem:[%s765_s1 + $0x18] sm:$0xff] }
  0x39   : > { %357 = vmatprep.subr.mxu0 %v280_v23  ;;  %434 = vmatprep.subr.mxu1 %v282_v24  ;;  %v171_v3 = vld [vmem:[%s765_s1] sm:$0xff]  ;;  %v304_v5 = vld [vmem:[%s766_s2 + $0x8] sm:$0xff]  ;;  %v173_v6 = vld [vmem:[%s765_s1 + $0x10] sm:$0xff] }
  0x3a   : > { %358 = vmatpush2.msra.mxu0 %v279_v25  ;;  %435 = vmatpush2.msra.mxu1 %v281_v26 }
  0x3b   : > { %359 = vmatprep.subr.mxu0 %v276_v27  ;;  %436 = vmatprep.subr.mxu1 %v278_v28 }
  0x3c   : > { %360 = vmatpush2.msra.mxu0 %v275_v29  ;;  %437 = vmatpush2.msra.mxu1 %v277_v30 }
  0x3d   : > { %361 = vmatprep.subr.mxu0 %v272_v31  ;;  %438 = vmatprep.subr.mxu1 %v274_v32 }
  0x3e   : > { %362 = vmatpush2.msra.mxu0 %v271_v33  ;;  %439 = vmatpush2.msra.mxu1 %v273_v34 }
  0x3f   : > { %363 = vmatprep.subr.mxu0 %v268_v35  ;;  %440 = vmatprep.subr.mxu1 %v270_v36 }
  0x40   : > { %364 = vmatpush2.msra.mxu0 %v267_v37  ;;  %441 = vmatpush2.msra.mxu1 %v269_v38 }
  0x41   : > { %365 = vmatprep.subr.mxu0 %v264_v39  ;;  %442 = vmatprep.subr.mxu1 %v266_v40 }
  0x42   : > { %366 = vmatpush2.msra.mxu0 %v263_v41  ;;  %443 = vmatpush2.msra.mxu1 %v265_v42 }
  0x43   : > { %367 = vmatprep.subr.mxu0 %v260_v43  ;;  %444 = vmatprep.subr.mxu1 %v262_v44 }
  0x44   : > { %368 = vmatpush2.msra.mxu0 %v259_v45  ;;  %445 = vmatpush2.msra.mxu1 %v261_v46 }
  0x45   : > { %369 = vmatprep.subr.mxu0 %v256_v47  ;;  %446 = vmatprep.subr.mxu1 %v258_v48 }
  0x46   : > { %370 = vmatpush2.msra.mxu0 %v255_v49  ;;  %447 = vmatpush2.msra.mxu1 %v257_v50 }
  0x47   : > { %371 = vmatprep.subr.mxu0 %v252_v51  ;;  %448 = vmatprep.subr.mxu1 %v254_v52 }
  0x48   : > { %372 = vmatpush2.msra.mxu0 %v251_v53  ;;  %449 = vmatpush2.msra.mxu1 %v253_v54 }
  0x49   : > { %373 = vmatprep.subr.mxu0 %v248_v55  ;;  %450 = vmatprep.subr.mxu1 %v250_v56 }
  0x4a   : > { %374 = vmatpush2.msra.mxu0 %v247_v57  ;;  %451 = vmatpush2.msra.mxu1 %v249_v58 }
  0x4b   : > { %375 = vmatprep.subr.mxu0 %v244_v59  ;;  %452 = vmatprep.subr.mxu1 %v246_v60 }
  0x4c   : > { %376 = vmatpush2.msra.mxu0 %v243_v61  ;;  %453 = vmatpush2.msra.mxu1 %v245_v62 }
  0x4d   : > { %377 = vmatprep.subr.mxu0 %v240_v63  ;;  %454 = vmatprep.subr.mxu1 %v242_v0 }
  0x4e   : > { %378 = vmatpush2.msra.mxu0 %v239_v1  ;;  %455 = vmatpush2.msra.mxu1 %v241_v2 }
  0x4f   : > { %380 = vmatmul.mubr.f32.vlgmr.msra.gmra.mxu0 %v171_v3  ;;  %457 = vmatmul.mubr.f32.vlgmr.msra.gmra.mxu1 %v171_v3 }
  0x50   : > { %385 = vmatprep.mubr.f32.mxu0 %v174_v4  ;;  %462 = vmatprep.mubr.f32.mxu1 %v174_v4 }
  0x51   : > { %312 = vperm.xlu0 %563, %v304_v5  }
  0x53   : > { %386 = vmatmul.mubr.f32.gmra.mxu0 %v173_v6  ;;  %463 = vmatmul.mubr.f32.gmra.mxu1 %v173_v6 }
  0x89   : > { %v308_v7 = vpop.permute.xlu0 %307 }
  0xcc   : > { %v313_v16 = vpop.permute.xlu0 %312 }
 0x10f   : > { %v381_v8 = vpop.f32.mrf.mxu0  ;;  %v458_v9 = vpop.f32.mrf.mxu1 }
 0x110   : > { %v382_v10 = vadd.f32 %v381_v8, %v308_v7  ;;  %v459_v11 = vadd.f32 %v458_v9, %v308_v7 }
 0x111   : > { %v383_v12 = vpop.f32.mrf.mxu0  ;;  %v460_v13 = vpop.f32.mrf.mxu1 }
 0x112   : > { %v469_v14 = vmax.f32 %v382_v10, 0.0  ;;  %v471_v15 = vmax.f32 %v459_v11, 0.0  ;;  %v384_v17 = vadd.f32 %v383_v12, %v308_v7  ;;  %v461_v18 = vadd.f32 %v460_v13, %v308_v7 }
 0x113   : > { %v387_v19 = vpop.f32.mrf.mxu0  ;;  %v464_v20 = vpop.f32.mrf.mxu1 }
 0x114   : > { %477 = vst [vmem:[%s170_s6] sm:$0xff] %v469_v14  ;;  %479 = vst [vmem:[%s170_s6 + $0x10] sm:$0xff] %v471_v15  ;;  %v470_v21 = vmax.f32 %v384_v17, 0.0  ;;  %v472_v22 = vmax.f32 %v461_v18, 0.0  ;;  %v388_v23 = vadd.f32 %v387_v19, %v313_v16  ;;  %v465_v24 = vadd.f32 %v464_v20, %v313_v16 }
 0x115   : > { %v389_v25 = vpop.f32.mrf.mxu0  ;;  %v466_v26 = vpop.f32.mrf.mxu1 }
 0x116   : > { %478 = vst [vmem:[%s170_s6 + $0x8] sm:$0xff] %v470_v21  ;;  %481 = vst.msk [vmem:[%s170_s6 + $0x18] sm:$0xff] %vm480_vm0, %v472_v22  ;;  %v473_v27 = vmax.f32 %v388_v23, 0.0  ;;  %v475_v28 = vmax.f32 %v465_v24, 0.0  ;;  %v390_v29 = vadd.f32 %v389_v25, %v313_v16  ;;  %v467_v30 = vadd.f32 %v466_v26, %v313_v16 }
 0x118   : > { %482 = vst [vmem:[%s170_s6 + $0x20] sm:$0xff] %v473_v27  ;;  %484 = vst [vmem:[%s170_s6 + $0x30] sm:$0xff] %v475_v28  ;;  %v474_v31 = vmax.f32 %v390_v29, 0.0  ;;  %v476_v32 = vmax.f32 %v467_v30, 0.0 }
 0x11a   : > { %483 = vst [vmem:[%s170_s6 + $0x28] sm:$0xff] %v474_v31  ;;  %485 = vst.msk [vmem:[%s170_s6 + $0x38] sm:$0xff] %vm480_vm0, %v476_v32 }
 0x11b PF: > { %s13_s12 = sadd.s32 1, %s570_s12  }
 0x11c   : > { %p10_p4 = scmp.ge.s32.totalorder %s13_s12, 4  }
 0x11e   :  { %12 = sbr.rel (!%p10_p4) target bundleno = 1 (0x1), region = 62 }

// kernel: dqn_forward.3
= control target key start
LH: loop header
LB: loop body
LE: loop exit
PB: predicated region body
PF: predicated region fallthrough
CT: control target
= control target key end

     0   :  { %12 = vsyncpa [#allocation3], 0  ;;  %s9044_s0 = inlined_call_operand.vmem [shape: f32[2,256,100], index: 0, kind: input, shape index: {}]   ;;  %s9045_s1 = inlined_call_operand.vmem [shape: f32[32,256], index: 1, kind: input, shape index: {}]   ;;  %s9046_s2 = inlined_call_operand.vmem [shape: f32[32,1], index: 2, kind: input, shape index: {}]   ;;  %s9047_s3 = inlined_call_operand.vmem [shape: bf16[32,100,256], index: 3, kind: input, shape index: {}]   ;;  %s9048_s4 = inlined_call_operand.vmem [shape: f32[1,256], index: 4, kind: input, shape index: {}]   ;;  %s9049_s5 = inlined_call_operand.vmem [shape: f32[256,2], index: 5, kind: input, shape index: {}]   ;;  %s9050_s6 = inlined_call_operand.vmem [shape: f32[1,2], index: 6, kind: input, shape index: {}]   ;;  %s9051_s7 = inlined_call_operand.hbm [shape: f32[2,1,2], index: 7, kind: output, shape index: {}]  }
   0x1   :  { %14 = vsyncpa [#allocation3 + $0x1], 0  ;;  %s7185_s24 = smov 0   ;;  %s7187_s25 = smov 0  }
   0x2   :  { %s7189_s26 = smov 0   ;;  %s7191_s27 = smov 0  }
   0x3 LB: > { %s7206_s28 = sadd.s32 4294967295, %s7140_s27   ;;  %s5393_s29 = sadd.s32 4294967294, %s7140_s27   ;;  %s7140_s27 = sphi %s7191_s27, %s9057_s27   ;;  %s7136_s26 = sphi %s7189_s26, %s9056_s26   ;;  %s7132_s25 = sphi %s7187_s25, %s9055_s25   ;;  %s7128_s24 = sphi %s7185_s24, %s9054_s24  }
   0x4   : > { %s7210_s30 = sadd.s32 1, %s7140_s27   ;;  %s179_s8 = sadd.s32 1, %s7136_s26 }
   0x5   : > { %s176_s9 = ssub.s32 %s7140_s27, %s7210_s30  ;;  %p189_p0 = scmp.ne.s32.totalorder %s7136_s26, %s7132_s25 }
   0x6   : > { %p177_p1 = scmp.eq.s32.totalorder %s176_s9, 0  ;;  %p190_p2 = scmp.eq.s32.totalorder %s7206_s28, 1 }
   0x7   : > { %p195_p3 = scmp.ne.s32.totalorder %s7132_s25, %s7128_s24  ;;  %p196_p4 = scmp.eq.s32.totalorder %s5393_s29, 1 }
   0x8   : > { %s7221_s10 = scalar_select %p177_p1, %s7136_s26, %s179_s8  }
   0x9   : > { %p7223_p5 = por %p190_p2, %p189_p0  ;;  %p7227_p6 = por %p196_p4, %p195_p3 }
   0xa   : > { %p5396_p7 = scmp.ge.s32.totalorder %s7140_s27, 1  ;;  %p240_p8 = scmp.lt.s32.totalorder %s7140_s27, 3 }
   0xc   : > { %p241_p9 = pnand %p5396_p7, %p240_p8 }
   0xd   : > { %p271_p10 = scmp.lt.s32.totalorder (!%p241_p9), %s7206_s28, 1  ;;  %s6314_s20 = sshll.u32 (!%p241_p9), %s7206_s28, 4 }
   0xe   : > { %244 = sbr.rel (%p241_p9) target bundleno = 1128 (0x468), region = 48  ;;  %s7144_s14 = smov (!%p241_p9), [#allocation2]  }
   0xf   : > { %s7084_s15 = sshll.u32 (!%p241_p9), %s7144_s14, 4  ;;  %s7085_s15 = int_to_ptr.vmem [resolvable:$false] %s7084_s15 }
  0x13   : > { %v278_v0 = vld [vmem:[%s9045_s1 + $0x8] sm:$0xff]  ;;  %v7142_v1 = vmov 0   ;;  %v317_v2 = vld [vmem:[%s9046_s2] sm:$0xff]  ;;  %s272_s17 = scalar_select %p271_p10, %s7206_s28, 1  ;;  %vm514_vm0 = vcmask 1041408   ;;  %v280_v51 = vld [vmem:[%s9045_s1 + $0x18] sm:$0xff] }
  0x14   : > { %405 = vmatprep.mubr.f32.mxu0 %v278_v0  ;;  %6438 = vset.pattern.permute.xlu0 %v7142_v1  ;;  %v444_v3 = vld [vmem:[%s9047_s3 + $0x60] sm:$0x33]  ;;  %v318_v4 = vld [vmem:[%s9046_s2 + $0x8] sm:$0xff]  ;;  %v6444_v7 = vld [vmem:[%s9047_s3 + $0x54] ss:$8 sps:$4 sm:$0xff]   ;;  %vm510_vm1 = vcmask 818176  }
  0x15   : > { %323 = vperm.xlu0 %6438, %v317_v2   ;;  %553 = vmatprep.mubr.bf16.mxu1 %v7142_v1  ;;  %v5412_v5 = vcombine.high %v444_v3, %v444_v3  ;;  %v5411_v6 = vcombine.low %v444_v3, %v444_v3  ;;  %s6317_s29 = sshll.u32 %s272_s17, 8  ;;  %v6446_v9 = vld [vmem:[%s9047_s3 + $0x50] ss:$8 sps:$4 sm:$0xff]   ;;  %v6450_v25 = vld [vmem:[%s9047_s3 + $0x44] ss:$8 sps:$4 sm:$0xff]   ;;  %s269_s17 = sand.u32 1, %s7132_s25  }
  0x16   : > { %6439 = vset.pattern.permute.xlu1 %v7142_v1  ;;  %s7256_s13 = scalar_lea.vmem %s9044_s0, %s6317_s29  ;;  %v6452_v26 = vld [vmem:[%s9047_s3 + $0x40] ss:$8 sps:$4 sm:$0xff]   ;;  %v6456_v30 = vld [vmem:[%s9047_s3 + $0x34] ss:$8 sps:$4 sm:$0xff]   ;;  %v6458_v31 = vld [vmem:[%s9047_s3 + $0x30] ss:$8 sps:$4 sm:$0xff]   ;;  %s5336_s29 = scalar_lea.hbm %s9051_s7, %s6314_s20 }
  0x17   : > { %5413 = vmatprep.subr.msk.bf16.mxu1 %vm514_vm0, %v5412_v5  ;;  %v516_v8 = vsel %vm514_vm0, %v5411_v6, 0  ;;  %v316_v10 = vld [vmem:[%s7256_s13 + $0xf8] sm:$0xff]  ;;  %v315_v12 = vld [vmem:[%s7256_s13 + $0xf0] sm:$0xff]  ;;  %v314_v14 = vld [vmem:[%s7256_s13 + $0xe8] sm:$0xff]  ;;  %s270_s21 = scalar_lea.vmem [#allocation2], %s269_s17  ;;  %vm5323_vm2 = vcmask 8192  }
  0x18   : > { %v300_v11 = vld [vmem:[%s7256_s13 + $0x78] sm:$0xff]  ;;  %524 = vmatpush1.bf16.msra.mxu1 %v516_v8  ;;  %6318 = vmatprep.subr.mxu0 %v316_v10  ;;  %v299_v13 = vld [vmem:[%s7256_s13 + $0x70] sm:$0xff]  ;;  %v298_v15 = vld [vmem:[%s7256_s13 + $0x68] sm:$0xff]  ;;  %s5338_s22 = sshll.u32 %s270_s21, 4  ;;  %s5326_s8 = scalar_lea.sflag [#allocation3], %s269_s17  ;;  %s5339_s22 = int_to_ptr.vmem [resolvable:$true] %s5338_s22 }
  0x19   : > { %328 = vperm.xlu0 %6438, %v318_v4   ;;  %525 = vmatprep.subr.bf16.mxu1 %v6444_v7  ;;  %v313_v16 = vld [vmem:[%s7256_s13 + $0xe0] sm:$0xff]  ;;  %v312_v18 = vld [vmem:[%s7256_s13 + $0xd8] sm:$0xff]  ;;  %v311_v20 = vld [vmem:[%s7256_s13 + $0xd0] sm:$0xff]  ;;  %s7080_s9 = scalar_lea.vmem %s5339_s22, 16  ;;  %s7086_s28 = scalar_lea.vmem %s7085_s15, 32 }
  0x1a   : > { %6319 = vmatpush3.msra.mxu0 %v300_v11  ;;  %v297_v17 = vld [vmem:[%s7256_s13 + $0x60] sm:$0xff]  ;;  %v296_v19 = vld [vmem:[%s7256_s13 + $0x58] sm:$0xff]  ;;  %v295_v21 = vld [vmem:[%s7256_s13 + $0x50] sm:$0xff]  ;;  %p7081_p11 = scmp.ne.s32.totalorder %s5339_s22, %s7080_s9  ;;  %p7087_p0 = scmp.lt.s32.totalorder %s5339_s22, %s7085_s15 }
  0x1b   : > { %6320 = vmatprep.subr.mxu0 %v315_v12  ;;  %v310_v22 = vld [vmem:[%s7256_s13 + $0xc8] sm:$0xff]  ;;  %v309_v24 = vld [vmem:[%s7256_s13 + $0xc0] sm:$0xff]  ;;  %v308_v28 = vld [vmem:[%s7256_s13 + $0xb8] sm:$0xff]  ;;  %p7088_p1 = scmp.lt.s32.totalorder %s7086_s28, %s7080_s9 }
  0x1c   : > { %6321 = vmatpush3.msra.mxu0 %v299_v13  ;;  %526 = vmatpush1.bf16.msra.mxu1 %v6446_v9  ;;  %v294_v23 = vld [vmem:[%s7256_s13 + $0x48] sm:$0xff]  ;;  %v293_v27 = vld [vmem:[%s7256_s13 + $0x40] sm:$0xff]  ;;  %v292_v29 = vld [vmem:[%s7256_s13 + $0x38] sm:$0xff]  ;;  %p7082_p12 = pnand %p7081_p11, %p7223_p5 }
  0x1d   : > { %6322 = vmatprep.subr.mxu0 %v314_v14  ;;  %527 = vmatprep.subr.bf16.mxu1 %v6450_v25  ;;  %v307_v32 = vld [vmem:[%s7256_s13 + $0xb0] sm:$0xff]  ;;  %v306_v34 = vld [vmem:[%s7256_s13 + $0xa8] sm:$0xff]  ;;  %v305_v38 = vld [vmem:[%s7256_s13 + $0xa0] sm:$0xff]  ;;  %p7089_p2 = por %p7088_p1, %p7087_p0 }
  0x1e   : > { %6323 = vmatpush3.msra.mxu0 %v298_v15  ;;  %v291_v33 = vld [vmem:[%s7256_s13 + $0x30] sm:$0xff]  ;;  %v6462_v35 = vld [vmem:[%s9047_s3 + $0x24] ss:$8 sps:$4 sm:$0xff]   ;;  %v6464_v36 = vld [vmem:[%s9047_s3 + $0x20] ss:$8 sps:$4 sm:$0xff]   ;;  %p7083_p13 = pneg %p7082_p12 }
  0x1f   : > { %6324 = vmatprep.subr.mxu0 %v313_v16  ;;  %v290_v37 = vld [vmem:[%s7256_s13 + $0x28] sm:$0xff]  ;;  %v289_v39 = vld [vmem:[%s7256_s13 + $0x20] sm:$0xff]  ;;  %v304_v40 = vld [vmem:[%s7256_s13 + $0x98] sm:$0xff] }
  0x20   : > { %6325 = vmatpush3.msra.mxu0 %v297_v17  ;;  %528 = vmatpush1.bf16.msra.mxu1 %v6452_v26  ;;  %v288_v41 = vld [vmem:[%s7256_s13 + $0x18] sm:$0xff]  ;;  %v303_v42 = vld [vmem:[%s7256_s13 + $0x90] sm:$0xff]  ;;  %v302_v45 = vld [vmem:[%s7256_s13 + $0x88] sm:$0xff]  ;;  %p7090_p3 = pnand %p7089_p2, %p7083_p13 }
  0x21   : > { %6326 = vmatprep.subr.mxu0 %v312_v18  ;;  %529 = vmatprep.subr.bf16.mxu1 %v6456_v30  ;;  %v5456_v43 = vld [vmem:[%s9047_s3 + $0x130] sm:$0x33]  ;;  %v286_v46 = vld [vmem:[%s7256_s13 + $0x8] sm:$0xff]  ;;  %v301_v47 = vld [vmem:[%s7256_s13 + $0x80] sm:$0xff] }
  0x22   : > { %6327 = vmatpush3.msra.mxu0 %v296_v19  ;;  %v287_v44 = vld [vmem:[%s7256_s13 + $0x10] sm:$0xff]  ;;  %v285_v48 = vld [vmem:[%s7256_s13] sm:$0xff]  ;;  %v5469_v49 = vcombine.low %v5456_v43, %v5456_v43  ;;  %v5470_v52 = vcombine.high %v5456_v43, %v5456_v43  ;;  %v282_v3 = vld [vmem:[%s9045_s1 + $0x28] sm:$0xff] }
  0x23   : > { %6328 = vmatprep.subr.mxu0 %v311_v20  ;;  %v277_v50 = vld [vmem:[%s9045_s1] sm:$0xff]  ;;  %v279_v55 = vld [vmem:[%s9045_s1 + $0x10] sm:$0xff]  ;;  %v284_v9 = vld [vmem:[%s9045_s1 + $0x38] sm:$0xff] }
  0x24   : > { %6329 = vmatpush3.msra.mxu0 %v295_v21  ;;  %530 = vmatpush1.bf16.msra.mxu1 %v6458_v31  ;;  %v6449_v53 = vld [vmem:[%s9047_s3 + $0x124] ss:$8 sps:$4 sm:$0xff]   ;;  %v816_v54 = vsel %vm514_vm0, %v5469_v49, 0  ;;  %v6447_v56 = vld [vmem:[%s9047_s3 + $0x120] ss:$8 sps:$4 sm:$0xff]   ;;  %v283_v12 = vld [vmem:[%s9045_s1 + $0x30] sm:$0xff] }
  0x25   : > { %6330 = vmatprep.subr.mxu0 %v310_v22  ;;  %531 = vmatprep.subr.bf16.mxu1 %v6462_v35  ;;  %v6455_v57 = vld [vmem:[%s9047_s3 + $0x114] ss:$8 sps:$4 sm:$0xff]   ;;  %v6453_v58 = vld [vmem:[%s9047_s3 + $0x110] ss:$8 sps:$4 sm:$0xff]   ;;  %v6461_v59 = vld [vmem:[%s9047_s3 + $0x104] ss:$8 sps:$4 sm:$0xff]  }
  0x26   : > { %6331 = vmatpush3.msra.mxu0 %v294_v23  ;;  %v6459_v60 = vld [vmem:[%s9047_s3 + $0x100] ss:$8 sps:$4 sm:$0xff]   ;;  %v6467_v61 = vld [vmem:[%s9047_s3 + $0xf4] ss:$8 sps:$4 sm:$0xff]   ;;  %v6465_v62 = vld [vmem:[%s9047_s3 + $0xf0] ss:$8 sps:$4 sm:$0xff]  }
  0x27   : > { %6332 = vmatprep.subr.mxu0 %v309_v24  ;;  %v6468_v63 = vld [vmem:[%s9047_s3 + $0x14] ss:$8 sps:$4 sm:$0xff]   ;;  %v6470_v0 = vld [vmem:[%s9047_s3 + $0x10] ss:$8 sps:$4 sm:$0xff]   ;;  %v6473_v2 = vld [vmem:[%s9047_s3 + $0xe4] ss:$8 sps:$4 sm:$0xff]  }
  0x28   : > { %6333 = vmatpush3.msra.mxu0 %v293_v27  ;;  %532 = vmatpush1.bf16.msra.mxu1 %v6464_v36  ;;  %v6471_v4 = vld [vmem:[%s9047_s3 + $0xe0] ss:$8 sps:$4 sm:$0xff]   ;;  %v6474_v6 = vld [vmem:[%s9047_s3 + $0x4] ss:$8 sps:$4 sm:$0xff]   ;;  %v6479_v8 = vld [vmem:[%s9047_s3 + $0xd4] ss:$8 sps:$4 sm:$0xff]  }
  0x29   : > { %6334 = vmatprep.subr.mxu0 %v308_v28  ;;  %533 = vmatprep.subr.bf16.mxu1 %v6468_v63  ;;  %v281_v5 = vld [vmem:[%s9045_s1 + $0x20] sm:$0xff]  ;;  %v6477_v10 = vld [vmem:[%s9047_s3 + $0xd0] ss:$8 sps:$4 sm:$0xff]   ;;  %v5427_v11 = vld [vmem:[%s9047_s3 + $0xc8] sm:$0x33] }
  0x2a   : > { %6335 = vmatpush3.msra.mxu0 %v292_v29  ;;  %v6476_v7 = vld [vmem:[%s9047_s3] ss:$8 sps:$4 sm:$0xff]   ;;  %v5441_v13 = vcombine.high %v5427_v11, %v5427_v11  ;;  %v319_v16 = vld [vmem:[%s9046_s2 + $0x10] sm:$0xff]  ;;  %v320_v19 = vld [vmem:[%s9046_s2 + $0x18] sm:$0xff]  ;;  %v5440_v23 = vcombine.low %v5427_v11, %v5427_v11 }
  0x2b   : > { %6336 = vmatprep.subr.mxu0 %v307_v32  ;;  %v5514_v14 = vld [vmem:[%s9047_s3 + $0x200] sm:$0x33]  ;;  %333 = vperm.xlu1 %6439, %v319_v16   ;;  %v6489_v31 = vld [vmem:[%s9047_s3 + $0x1f4] ss:$8 sps:$4 sm:$0xff]   ;;  %v6490_v36 = vld [vmem:[%s9047_s3 + $0xa8] ss:$8 sps:$4 sm:$0xff]  }
  0x2c   : > { %6337 = vmatpush3.msra.mxu0 %v291_v33  ;;  %534 = vmatpush1.bf16.msra.mxu1 %v6470_v0  ;;  %v5528_v15 = vcombine.high %v5514_v14, %v5514_v14  ;;  %v5527_v25 = vcombine.low %v5514_v14, %v5514_v14  ;;  %v666_v27 = vsel %vm514_vm0, %v5440_v23, 0  ;;  %v6486_v28 = vld [vmem:[%s9047_s3 + $0xbc] ss:$8 sps:$4 sm:$0xff]   ;;  %v6484_v32 = vld [vmem:[%s9047_s3 + $0xb8] ss:$8 sps:$4 sm:$0xff]  }
  0x2d   : > { %6338 = vmatprep.subr.mxu0 %v306_v34  ;;  %535 = vmatprep.subr.bf16.mxu1 %v6474_v6  ;;  %v6492_v33 = vld [vmem:[%s9047_s3 + $0xac] ss:$8 sps:$4 sm:$0xff]   ;;  %v6487_v34 = vld [vmem:[%s9047_s3 + $0x1f0] ss:$8 sps:$4 sm:$0xff]  }
  0x2e   : > { %6339 = vmatpush3.msra.mxu0 %v290_v37  ;;  %v1114_v30 = vsel %vm514_vm0, %v5527_v25, 0  ;;  %v6495_v35 = vld [vmem:[%s9047_s3 + $0x1e4] ss:$8 sps:$4 sm:$0xff]   ;;  %v6535_v6 = vld [vmem:[%s9047_s3 + $0x2b4] ss:$8 sps:$4 sm:$0xff]  }
  0x2f   : > { %6340 = vmatprep.subr.mxu0 %v305_v38  ;;  %338 = vperm.xlu1 %6439, %v320_v19   ;;  %v6498_v37 = vld [vmem:[%s9047_s3 + $0x9c] ss:$8 sps:$4 sm:$0xff]   ;;  %v6493_v38 = vld [vmem:[%s9047_s3 + $0x1e0] ss:$8 sps:$4 sm:$0xff]   ;;  %v6516_v49 = vld [vmem:[%s9047_s3 + $0x6c] ss:$8 sps:$4 sm:$0xff]  }
  0x30   : > { %6341 = vmatpush3.msra.mxu0 %v289_v39  ;;  %536 = vmatpush1.bf16.msra.mxu1 %v6476_v7  ;;  %v6501_v39 = vld [vmem:[%s9047_s3 + $0x1d4] ss:$8 sps:$4 sm:$0xff]   ;;  %v6507_v43 = vld [vmem:[%s9047_s3 + $0x1c4] ss:$8 sps:$4 sm:$0xff]   ;;  %v6530_v7 = vld [vmem:[%s9047_s3 + $0x178] ss:$8 sps:$4 sm:$0xff]  }
  0x31   : > { %6342 = vmatprep.subr.mxu0 %v304_v40  ;;  %5442 = vmatprep.subr.msk.bf16.mxu1 %vm514_vm0, %v5441_v13  ;;  %v6496_v40 = vld [vmem:[%s9047_s3 + $0x98] ss:$8 sps:$4 sm:$0xff]   ;;  %v6536_v11 = vld [vmem:[%s9047_s3 + $0x168] ss:$8 sps:$4 sm:$0xff]   ;;  %v6547_v14 = vld [vmem:[%s9047_s3 + $0x294] ss:$8 sps:$4 sm:$0xff]  }
  0x32   : > { %6343 = vmatpush3.msra.mxu0 %v288_v41  ;;  %v6504_v41 = vld [vmem:[%s9047_s3 + $0x8c] ss:$8 sps:$4 sm:$0xff]   ;;  %v6539_v13 = vld [vmem:[%s9047_s3 + $0x2a0] ss:$8 sps:$4 sm:$0xff]  }
  0x33   : > { %6344 = vmatprep.subr.mxu0 %v303_v42  ;;  %v6499_v42 = vld [vmem:[%s9047_s3 + $0x1d0] ss:$8 sps:$4 sm:$0xff]   ;;  %v6550_v16 = vld [vmem:[%s9047_s3 + $0x14c] ss:$8 sps:$4 sm:$0xff]   ;;  %v5630_v25 = vld [vmem:[%s9047_s3 + $0x3a0] sm:$0x33] }
  0x34   : > { %6345 = vmatpush3.msra.mxu0 %v287_v44  ;;  %v6502_v44 = vld [vmem:[%s9047_s3 + $0x88] ss:$8 sps:$4 sm:$0xff]   ;;  %v6559_v23 = vld [vmem:[%s9047_s3 + $0x274] ss:$8 sps:$4 sm:$0xff]  }
  0x35   : > { %6346 = vmatprep.subr.mxu0 %v302_v45  ;;  %v6510_v45 = vld [vmem:[%s9047_s3 + $0x7c] ss:$8 sps:$4 sm:$0xff]   ;;  %v6548_v19 = vld [vmem:[%s9047_s3 + $0x148] ss:$8 sps:$4 sm:$0xff]  }
  0x36   : > { %6347 = vmatpush3.msra.mxu0 %v286_v46  ;;  %v6505_v46 = vld [vmem:[%s9047_s3 + $0x1c0] ss:$8 sps:$4 sm:$0xff]  }
  0x37   : > { %6348 = vmatprep.subr.mxu0 %v301_v47  ;;  %v6513_v47 = vld [vmem:[%s9047_s3 + $0x1b4] ss:$8 sps:$4 sm:$0xff]  }
  0x38   : > { %6349 = vmatpush3.msra.mxu0 %v285_v48  ;;  %v6508_v48 = vld [vmem:[%s9047_s3 + $0x78] ss:$8 sps:$4 sm:$0xff]  }
  0x39   : > { %406 = vmatmul.mubr.f32.vlgmr.msra.gmra.mxu0 %v277_v50  ;;  %5471 = vmatprep.subr.msk.bf16.mxu0 %vm514_vm0, %v5470_v52  ;;  %v6511_v50 = vld [vmem:[%s9047_s3 + $0x1b0] ss:$8 sps:$4 sm:$0xff]   ;;  %v6519_v52 = vld [vmem:[%s9047_s3 + $0x1a4] ss:$8 sps:$4 sm:$0xff]  }
  0x3a   : > { %410 = vmatprep.mubr.f32.mxu0 %v280_v51  ;;  %824 = vmatpush1.bf16.msra.mxu0 %v816_v54  ;;  %v5485_v51 = vld [vmem:[%s9047_s3 + $0x198] sm:$0x33]  ;;  %v5572_v54 = vld [vmem:[%s9047_s3 + $0x2d0] sm:$0x33] }
  0x3b   : > { %825 = vmatprep.subr.bf16.mxu0 %v6449_v53  ;;  %v6514_v53 = vld [vmem:[%s9047_s3 + $0x68] ss:$8 sps:$4 sm:$0xff]  }
  0x3d   : > { %411 = vmatmul.mubr.f32.gmra.mxu0 %v279_v55  ;;  %v5499_v55 = vcombine.high %v5485_v51, %v5485_v51 }
  0x3e   : > { %826 = vmatpush1.bf16.msra.mxu0 %v6447_v56  ;;  %415 = vmatprep.mubr.f32.mxu0 %v282_v3  ;;  %v5498_v56 = vcombine.low %v5485_v51, %v5485_v51  ;;  %v6524_v3 = vld [vmem:[%s9047_s3 + $0x188] ss:$8 sps:$4 sm:$0xff]  }
  0x3f   : > { %827 = vmatprep.subr.bf16.mxu0 %v6455_v57  ;;  %v6517_v57 = vld [vmem:[%s9047_s3 + $0x1a0] ss:$8 sps:$4 sm:$0xff]  }
  0x40   : > { %v6582_v51 = vld [vmem:[%s9047_s3 + $0x228] ss:$8 sps:$4 sm:$0xff]  }
  0x41   : > { %416 = vmatmul.mubr.f32.gmra.mxu0 %v281_v5  ;;  %v6527_v5 = vld [vmem:[%s9047_s3 + $0x2c0] ss:$8 sps:$4 sm:$0xff]  }
  0x42   : > { %828 = vmatpush1.bf16.msra.mxu0 %v6453_v58  ;;  %420 = vmatprep.mubr.f32.mxu0 %v284_v9  ;;  %v5586_v58 = vcombine.high %v5572_v54, %v5572_v54  ;;  %v6533_v9 = vld [vmem:[%s9047_s3 + $0x2b0] ss:$8 sps:$4 sm:$0xff]  }
  0x43   : > { %829 = vmatprep.subr.bf16.mxu0 %v6461_v59  ;;  %v5585_v59 = vcombine.low %v5572_v54, %v5572_v54 }
  0x45   : > { %421 = vmatmul.mubr.f32.gmra.mxu0 %v283_v12  ;;  %v1412_v0 = vsel %vm514_vm0, %v5585_v59, 0  ;;  %v6544_v12 = vld [vmem:[%s9047_s3 + $0x15c] ss:$8 sps:$4 sm:$0xff]   ;;  %v6591_v59 = vld [vmem:[%s9047_s3 + $0x350] ss:$8 sps:$4 sm:$0xff]  }
  0x46   : > { %830 = vmatpush1.bf16.msra.mxu0 %v6459_v60  ;;  %853 = vmatprep.mubr.bf16.mxu0 %v7142_v1 }
  0x47   : > { %831 = vmatprep.subr.bf16.mxu0 %v6467_v61  ;;  %v965_v61 = vsel %vm514_vm0, %v5498_v56, 0  ;;  %v6588_v56 = vld [vmem:[%s9047_s3 + $0x218] ss:$8 sps:$4 sm:$0xff]  }
  0x4a   : > { %832 = vmatpush1.bf16.msra.mxu0 %v6465_v62  ;;  %v6526_v62 = vld [vmem:[%s9047_s3 + $0x18c] ss:$8 sps:$4 sm:$0xff]  }
  0x4b   : > { %833 = vmatprep.subr.bf16.mxu0 %v6473_v2  ;;  %v6529_v2 = vld [vmem:[%s9047_s3 + $0x2c4] ss:$8 sps:$4 sm:$0xff]  }
  0x4e   : > { %834 = vmatpush1.bf16.msra.mxu0 %v6471_v4  ;;  %v6532_v4 = vld [vmem:[%s9047_s3 + $0x17c] ss:$8 sps:$4 sm:$0xff]  }
  0x4f   : > { %835 = vmatprep.subr.bf16.mxu0 %v6479_v8  ;;  %v6538_v8 = vld [vmem:[%s9047_s3 + $0x16c] ss:$8 sps:$4 sm:$0xff]  }
  0x52   : > { %836 = vmatpush1.bf16.msra.mxu0 %v6477_v10  ;;  %v6541_v10 = vld [vmem:[%s9047_s3 + $0x2a4] ss:$8 sps:$4 sm:$0xff]  }
  0x53   : > { %5529 = vmatprep.subr.msk.bf16.mxu0 %vm514_vm0, %v5528_v15  ;;  %v6542_v15 = vld [vmem:[%s9047_s3 + $0x158] ss:$8 sps:$4 sm:$0xff]  }
  0x90   : > { %v324_v21 = vpop.permute.xlu0 %323 }
  0xf9   : > { %v6350_v17 = vpop.f32.mrf.mxu0 }
  0xfb   : > { %v6351_v18 = vpop.f32.mrf.mxu0 }
  0xfc   : > { %v6352_v20 = vadd.f32 %v6351_v18, %v6350_v17  ;;  %v6545_v17 = vld [vmem:[%s9047_s3 + $0x290] ss:$8 sps:$4 sm:$0xff]   ;;  %v6553_v18 = vld [vmem:[%s9047_s3 + $0x284] ss:$8 sps:$4 sm:$0xff]  }
  0xfe   : > { %v408_v22 = vadd.f32 %v6352_v20, %v324_v21  ;;  %v6556_v20 = vld [vmem:[%s9047_s3 + $0x13c] ss:$8 sps:$4 sm:$0xff]   ;;  %v6551_v21 = vld [vmem:[%s9047_s3 + $0x280] ss:$8 sps:$4 sm:$0xff]  }
 0x100   : > { %v426_v24 = vmax.f32 %v408_v22, 0.0  ;;  %v5543_v22 = vld [vmem:[%s9047_s3 + $0x268] sm:$0x33] }
 0x102   : > { %v7402_v26 = vpack.c.bf16 %v426_v24, %v426_v24  ;;  %v6554_v24 = vld [vmem:[%s9047_s3 + $0x138] ss:$8 sps:$4 sm:$0xff]  }
 0x104   : > { %v746_v29 = vrot.slane %v7402_v26, 1  ;;  %5414 = vmatmul.mubr.msk.bf16.vlgmr.msra.gmra.mxu1 %vm510_vm1, %v7402_v26  ;;  %v7491_v60 = vshrl.u32 %v7402_v26, 16  ;;  %v1044_v63 = vrot.slane %v7402_v26, 2 }
 0x105   : > { %674 = vmatpush1.bf16.msra.mxu1 %v666_v27  ;;  %703 = vmatprep.mubr.bf16.mxu1 %v7142_v1  ;;  %v5557_v27 = vcombine.high %v5543_v22, %v5543_v22 }
 0x106   : > { %5472 = vmatmul.mubr.msk.bf16.vlgmr.msra.gmra.mxu0 %vm510_vm1, %v746_v29  ;;  %675 = vmatprep.subr.bf16.mxu1 %v6486_v28  ;;  %v5556_v28 = vcombine.low %v5543_v22, %v5543_v22  ;;  %v6557_v29 = vld [vmem:[%s9047_s3 + $0x270] ss:$8 sps:$4 sm:$0xff]   ;;  %v6621_v22 = vld [vmem:[%s9047_s3 + $0x444] ss:$8 sps:$4 sm:$0xff]  }
 0x107   : > { %1122 = vmatpush1.bf16.msra.mxu0 %v1114_v30  ;;  %1151 = vmatprep.mubr.bf16.mxu0 %v7142_v1  ;;  %v5644_v30 = vcombine.high %v5630_v25, %v5630_v25 }
 0x108   : > { %1123 = vmatprep.subr.bf16.mxu0 %v6489_v31  ;;  %v5643_v31 = vcombine.low %v5630_v25, %v5630_v25  ;;  %v6619_v25 = vld [vmem:[%s9047_s3 + $0x440] ss:$8 sps:$4 sm:$0xff]  }
 0x109   : > { %676 = vmatpush1.bf16.msra.mxu1 %v6484_v32  ;;  %v895_v32 = vrot.slane %v7491_v60, 1 }
 0x10a   : > { %677 = vmatprep.subr.bf16.mxu1 %v6492_v33  ;;  %v1263_v33 = vsel %vm514_vm0, %v5556_v28, 0  ;;  %v6622_v28 = vld [vmem:[%s9047_s3 + $0x2f8] ss:$8 sps:$4 sm:$0xff]  }
 0x10b   : > { %1124 = vmatpush1.bf16.msra.mxu0 %v6487_v34  ;;  %v6566_v34 = vld [vmem:[%s9047_s3 + $0x25c] ss:$8 sps:$4 sm:$0xff]  }
 0x10c   : > { %1125 = vmatprep.subr.bf16.mxu0 %v6495_v35  ;;  %v1342_v35 = vrot.slane %v7402_v26, 3  ;;  %v6572_v26 = vld [vmem:[%s9047_s3 + $0x24c] ss:$8 sps:$4 sm:$0xff]  }
 0x10d   : > { %678 = vmatpush1.bf16.msra.mxu1 %v6490_v36  ;;  %v1710_v36 = vsel %vm514_vm0, %v5643_v31, 0  ;;  %v6633_v31 = vld [vmem:[%s9047_s3 + $0x424] ss:$8 sps:$4 sm:$0xff]  }
 0x10e   : > { %679 = vmatprep.subr.bf16.mxu1 %v6498_v37  ;;  %v6569_v37 = vld [vmem:[%s9047_s3 + $0x394] ss:$8 sps:$4 sm:$0xff]  }
 0x10f   : > { %1126 = vmatpush1.bf16.msra.mxu0 %v6493_v38  ;;  %v6564_v38 = vld [vmem:[%s9047_s3 + $0x258] ss:$8 sps:$4 sm:$0xff]  }
 0x110   : > { %1127 = vmatprep.subr.bf16.mxu0 %v6501_v39  ;;  %v6567_v39 = vld [vmem:[%s9047_s3 + $0x390] ss:$8 sps:$4 sm:$0xff]  }
 0x111   : > { %680 = vmatpush1.bf16.msra.mxu1 %v6496_v40  ;;  %v6575_v40 = vld [vmem:[%s9047_s3 + $0x384] ss:$8 sps:$4 sm:$0xff]  }
 0x112   : > { %681 = vmatprep.subr.bf16.mxu1 %v6504_v41  ;;  %v6570_v41 = vld [vmem:[%s9047_s3 + $0x248] ss:$8 sps:$4 sm:$0xff]  }
 0x113   : > { %1128 = vmatpush1.bf16.msra.mxu0 %v6499_v42  ;;  %v6578_v42 = vld [vmem:[%s9047_s3 + $0x23c] ss:$8 sps:$4 sm:$0xff]  }
 0x114   : > { %1129 = vmatprep.subr.bf16.mxu0 %v6507_v43  ;;  %v6573_v43 = vld [vmem:[%s9047_s3 + $0x380] ss:$8 sps:$4 sm:$0xff]  }
 0x115   : > { %682 = vmatpush1.bf16.msra.mxu1 %v6502_v44  ;;  %v6581_v44 = vld [vmem:[%s9047_s3 + $0x374] ss:$8 sps:$4 sm:$0xff]  }
 0x116   : > { %683 = vmatprep.subr.bf16.mxu1 %v6510_v45  ;;  %v6353_v45 = vpop.f32.mrf.mxu0 }
 0x117   : > { %1130 = vmatpush1.bf16.msra.mxu0 %v6505_v46  ;;  %v6576_v46 = vld [vmem:[%s9047_s3 + $0x238] ss:$8 sps:$4 sm:$0xff]  }
 0x118   : > { %1131 = vmatprep.subr.bf16.mxu0 %v6513_v47  ;;  %v6584_v47 = vld [vmem:[%s9047_s3 + $0x22c] ss:$8 sps:$4 sm:$0xff]  }
 0x119   : > { %684 = vmatpush1.bf16.msra.mxu1 %v6508_v48  ;;  %v6579_v48 = vld [vmem:[%s9047_s3 + $0x370] ss:$8 sps:$4 sm:$0xff]  }
 0x11a   : > { %685 = vmatprep.subr.bf16.mxu1 %v6516_v49  ;;  %v6587_v49 = vld [vmem:[%s9047_s3 + $0x364] ss:$8 sps:$4 sm:$0xff]  }
 0x11b   : > { %1132 = vmatpush1.bf16.msra.mxu0 %v6511_v50  ;;  %v6354_v50 = vpop.f32.mrf.mxu0 }
 0x11c   : > { %1133 = vmatprep.subr.bf16.mxu0 %v6519_v52  ;;  %v6590_v52 = vld [vmem:[%s9047_s3 + $0x21c] ss:$8 sps:$4 sm:$0xff]   ;;  %v6355_v54 = vadd.f32 %v6354_v50, %v6353_v45  ;;  %v6647_v50 = vld [vmem:[%s9047_s3 + $0x530] ss:$8 sps:$4 sm:$0xff]  }
 0x11d   : > { %686 = vmatpush1.bf16.msra.mxu1 %v6514_v53  ;;  %v6585_v53 = vld [vmem:[%s9047_s3 + $0x360] ss:$8 sps:$4 sm:$0xff]   ;;  %v6646_v45 = vld [vmem:[%s9047_s3 + $0x3fc] ss:$8 sps:$4 sm:$0xff]  }
 0x11e   : > { %5500 = vmatprep.subr.msk.bf16.mxu1 %vm514_vm0, %v5499_v55  ;;  %v6593_v55 = vld [vmem:[%s9047_s3 + $0x354] ss:$8 sps:$4 sm:$0xff]  }
 0x11f   : > { %1134 = vmatpush1.bf16.msra.mxu0 %v6517_v57  ;;  %v6596_v57 = vld [vmem:[%s9047_s3 + $0x20c] ss:$8 sps:$4 sm:$0xff]  }
 0x120   : > { %5443 = vmatmul.mubr.msk.bf16.vlgmr.msra.gmra.mxu1 %vm510_vm1, %v7491_v60  ;;  %5587 = vmatprep.subr.msk.bf16.mxu0 %vm514_vm0, %v5586_v58  ;;  %v329_v58 = vpop.permute.xlu0 %328 }
 0x121   : > { %973 = vmatpush1.bf16.msra.mxu1 %v965_v61  ;;  %1002 = vmatprep.mubr.bf16.mxu1 %v7142_v1  ;;  %v5601_v61 = vld [vmem:[%s9047_s3 + $0x338] sm:$0x33] }
 0x122   : > { %5530 = vmatmul.mubr.msk.bf16.vlgmr.msra.gmra.mxu0 %vm510_vm1, %v1044_v63  ;;  %974 = vmatprep.subr.bf16.mxu1 %v6526_v62  ;;  %v413_v62 = vadd.f32 %v6355_v54, %v329_v58  ;;  %v6599_v63 = vld [vmem:[%s9047_s3 + $0x344] ss:$8 sps:$4 sm:$0xff]   ;;  %v6653_v54 = vld [vmem:[%s9047_s3 + $0x520] ss:$8 sps:$4 sm:$0xff]   ;;  %v6659_v58 = vld [vmem:[%s9047_s3 + $0x510] ss:$8 sps:$4 sm:$0xff]  }
 0x123   : > { %1420 = vmatpush1.bf16.msra.mxu0 %v1412_v0  ;;  %1449 = vmatprep.mubr.bf16.mxu0 %v7142_v1  ;;  %v6594_v0 = vld [vmem:[%s9047_s3 + $0x208] ss:$8 sps:$4 sm:$0xff]  }
 0x124   : > { %1421 = vmatprep.subr.bf16.mxu0 %v6529_v2  ;;  %v5688_v2 = vld [vmem:[%s9047_s3 + $0x470] sm:$0x33] }
 0x125   : > { %975 = vmatpush1.bf16.msra.mxu1 %v6524_v3  ;;  %v5615_v3 = vcombine.high %v5601_v61, %v5601_v61 }
 0x126   : > { %976 = vmatprep.subr.bf16.mxu1 %v6532_v4  ;;  %v5614_v4 = vcombine.low %v5601_v61, %v5601_v61  ;;  %v6662_v61 = vld [vmem:[%s9047_s3 + $0x3c8] ss:$8 sps:$4 sm:$0xff]  }
 0x127   : > { %1422 = vmatpush1.bf16.msra.mxu0 %v6527_v5  ;;  %v6597_v5 = vld [vmem:[%s9047_s3 + $0x340] ss:$8 sps:$4 sm:$0xff]  }
 0x128   : > { %1423 = vmatprep.subr.bf16.mxu0 %v6535_v6  ;;  %v427_v6 = vmax.f32 %v413_v62, 0.0  ;;  %v6670_v62 = vld [vmem:[%s9047_s3 + $0x3bc] ss:$8 sps:$4 sm:$0xff]  }
 0x129   : > { %977 = vmatpush1.bf16.msra.mxu1 %v6530_v7  ;;  %v5702_v7 = vcombine.high %v5688_v2, %v5688_v2 }
 0x12a   : > { %978 = vmatprep.subr.bf16.mxu1 %v6538_v8  ;;  %v5701_v8 = vcombine.low %v5688_v2, %v5688_v2  ;;  %v6668_v2 = vld [vmem:[%s9047_s3 + $0x3b8] ss:$8 sps:$4 sm:$0xff]  }
 0x12b   : > { %1424 = vmatpush1.bf16.msra.mxu0 %v6533_v9  ;;  %v1193_v9 = vrot.slane %v7491_v60, 2 }
 0x12c   : > { %1425 = vmatprep.subr.bf16.mxu0 %v6541_v10  ;;  %v1561_v10 = vsel %vm514_vm0, %v5614_v4, 0  ;;  %v6671_v4 = vld [vmem:[%s9047_s3 + $0x4f0] ss:$8 sps:$4 sm:$0xff]  }
 0x12d   : > { %979 = vmatpush1.bf16.msra.mxu1 %v6536_v11  ;;  %v6606_v11 = vld [vmem:[%s9047_s3 + $0x32c] ss:$8 sps:$4 sm:$0xff]  }
 0x12e   : > { %980 = vmatprep.subr.bf16.mxu1 %v6544_v12  ;;  %v7675_v12 = vpack.c.bf16 %v427_v6, %v427_v6  ;;  %v6679_v6 = vld [vmem:[%s9047_s3 + $0x4e4] ss:$8 sps:$4 sm:$0xff]  }
 0x12f   : > { %1426 = vmatpush1.bf16.msra.mxu0 %v6539_v13  ;;  %v2010_v13 = vsel %vm514_vm0, %v5701_v8, 0  ;;  %v5804_v8 = vld [vmem:[%s9047_s3 + $0x610] sm:$0x33] }
 0x130   : > { %1427 = vmatprep.subr.bf16.mxu0 %v6547_v14  ;;  %v6609_v14 = vld [vmem:[%s9047_s3 + $0x464] ss:$8 sps:$4 sm:$0xff]  }
 0x131   : > { %981 = vmatpush1.bf16.msra.mxu1 %v6542_v15  ;;  %v6604_v15 = vld [vmem:[%s9047_s3 + $0x328] ss:$8 sps:$4 sm:$0xff]  }
 0x132   : > { %982 = vmatprep.subr.bf16.mxu1 %v6550_v16  ;;  %v6612_v16 = vld [vmem:[%s9047_s3 + $0x31c] ss:$8 sps:$4 sm:$0xff]  }
 0x133   : > { %1428 = vmatpush1.bf16.msra.mxu0 %v6545_v17  ;;  %v6607_v17 = vld [vmem:[%s9047_s3 + $0x460] ss:$8 sps:$4 sm:$0xff]  }
 0x134   : > { %1429 = vmatprep.subr.bf16.mxu0 %v6553_v18  ;;  %v6615_v18 = vld [vmem:[%s9047_s3 + $0x454] ss:$8 sps:$4 sm:$0xff]  }
 0x135   : > { %983 = vmatpush1.bf16.msra.mxu1 %v6548_v19  ;;  %v6610_v19 = vld [vmem:[%s9047_s3 + $0x318] ss:$8 sps:$4 sm:$0xff]  }
 0x136   : > { %984 = vmatprep.subr.bf16.mxu1 %v6556_v20  ;;  %v6618_v20 = vld [vmem:[%s9047_s3 + $0x30c] ss:$8 sps:$4 sm:$0xff]  }
 0x137   : > { %1430 = vmatpush1.bf16.msra.mxu0 %v6551_v21  ;;  %v6613_v21 = vld [vmem:[%s9047_s3 + $0x450] ss:$8 sps:$4 sm:$0xff]  }
 0x138   : > { %1431 = vmatprep.subr.bf16.mxu0 %v6559_v23  ;;  %v6616_v23 = vld [vmem:[%s9047_s3 + $0x308] ss:$8 sps:$4 sm:$0xff]  }
 0x139   : > { %985 = vmatpush1.bf16.msra.mxu1 %v6554_v24  ;;  %v6624_v24 = vld [vmem:[%s9047_s3 + $0x2fc] ss:$8 sps:$4 sm:$0xff]  }
 0x13a   : > { %5558 = vmatprep.subr.msk.bf16.mxu1 %vm514_vm0, %v5557_v27  ;;  %v6627_v27 = vld [vmem:[%s9047_s3 + $0x434] ss:$8 sps:$4 sm:$0xff]  }
 0x13b   : > { %1432 = vmatpush1.bf16.msra.mxu0 %v6557_v29  ;;  %v6630_v29 = vld [vmem:[%s9047_s3 + $0x2ec] ss:$8 sps:$4 sm:$0xff]  }
 0x13c   : > { %5501 = vmatmul.mubr.msk.bf16.vlgmr.msra.gmra.mxu1 %vm510_vm1, %v895_v32  ;;  %5645 = vmatprep.subr.msk.bf16.mxu0 %vm514_vm0, %v5644_v30  ;;  %v6625_v30 = vld [vmem:[%s9047_s3 + $0x430] ss:$8 sps:$4 sm:$0xff]  }
 0x13d   : > { %1271 = vmatpush1.bf16.msra.mxu1 %v1263_v33  ;;  %1300 = vmatprep.mubr.bf16.mxu1 %v7142_v1  ;;  %v6628_v32 = vld [vmem:[%s9047_s3 + $0x2e8] ss:$8 sps:$4 sm:$0xff]   ;;  %v6636_v33 = vld [vmem:[%s9047_s3 + $0x2dc] ss:$8 sps:$4 sm:$0xff]  }
 0x13e   : > { %5588 = vmatmul.mubr.msk.bf16.vlgmr.msra.gmra.mxu0 %vm510_vm1, %v1342_v35  ;;  %1272 = vmatprep.subr.bf16.mxu1 %v6566_v34  ;;  %v6631_v34 = vld [vmem:[%s9047_s3 + $0x420] ss:$8 sps:$4 sm:$0xff]  }
 0x13f   : > { %1718 = vmatpush1.bf16.msra.mxu0 %v1710_v36  ;;  %1747 = vmatprep.mubr.bf16.mxu0 %v7142_v1  ;;  %v5659_v35 = vld [vmem:[%s9047_s3 + $0x408] sm:$0x33]  ;;  %v6639_v36 = vld [vmem:[%s9047_s3 + $0x414] ss:$8 sps:$4 sm:$0xff]  }
 0x140   : > { %1719 = vmatprep.subr.bf16.mxu0 %v6569_v37  ;;  %v6634_v37 = vld [vmem:[%s9047_s3 + $0x2d8] ss:$8 sps:$4 sm:$0xff]  }
 0x141   : > { %1273 = vmatpush1.bf16.msra.mxu1 %v6564_v38  ;;  %v5746_v38 = vld [vmem:[%s9047_s3 + $0x540] sm:$0x33] }
 0x142   : > { %1274 = vmatprep.subr.bf16.mxu1 %v6572_v26  ;;  %v5673_v26 = vcombine.high %v5659_v35, %v5659_v35 }
 0x143   : > { %1720 = vmatpush1.bf16.msra.mxu0 %v6567_v39  ;;  %v5672_v39 = vcombine.low %v5659_v35, %v5659_v35  ;;  %v6710_v35 = vld [vmem:[%s9047_s3 + $0x48c] ss:$8 sps:$4 sm:$0xff]  }
 0x144   : > { %1721 = vmatprep.subr.bf16.mxu0 %v6575_v40  ;;  %v6637_v40 = vld [vmem:[%s9047_s3 + $0x410] ss:$8 sps:$4 sm:$0xff]  }
 0x145   : > { %1275 = vmatpush1.bf16.msra.mxu1 %v6570_v41  ;;  %v5760_v41 = vcombine.high %v5746_v38, %v5746_v38 }
 0x146   : > { %1276 = vmatprep.subr.bf16.mxu1 %v6578_v42  ;;  %v5759_v42 = vcombine.low %v5746_v38, %v5746_v38  ;;  %v6708_v38 = vld [vmem:[%s9047_s3 + $0x488] ss:$8 sps:$4 sm:$0xff]  }
 0x147   : > { %1722 = vmatpush1.bf16.msra.mxu0 %v6573_v43  ;;  %v1491_v43 = vrot.slane %v7491_v60, 3  ;;  %v6649_v60 = vld [vmem:[%s9047_s3 + $0x534] ss:$8 sps:$4 sm:$0xff]  }
 0x148   : > { %1723 = vmatprep.subr.bf16.mxu0 %v6581_v44  ;;  %v1860_v44 = vsel %vm514_vm0, %v5672_v39, 0  ;;  %v6711_v39 = vld [vmem:[%s9047_s3 + $0x5c0] ss:$8 sps:$4 sm:$0xff]  }
 0x149   : > { %1277 = vmatpush1.bf16.msra.mxu1 %v6576_v46  ;;  %v1940_v46 = vrot.slane %v7675_v12, 1 }
 0x14a   : > { %1278 = vmatprep.subr.bf16.mxu1 %v6584_v47  ;;  %v2308_v47 = vsel %vm514_vm0, %v5759_v42, 0  ;;  %v6714_v42 = vld [vmem:[%s9047_s3 + $0x478] ss:$8 sps:$4 sm:$0xff]  }
 0x14b   : > { %1724 = vmatpush1.bf16.msra.mxu0 %v6579_v48  ;;  %v6644_v48 = vld [vmem:[%s9047_s3 + $0x3f8] ss:$8 sps:$4 sm:$0xff]  }
 0x14c   : > { %1725 = vmatprep.subr.bf16.mxu0 %v6587_v49  ;;  %v6652_v49 = vld [vmem:[%s9047_s3 + $0x3ec] ss:$8 sps:$4 sm:$0xff]  }
 0x14d   : > { %1279 = vmatpush1.bf16.msra.mxu1 %v6582_v51  ;;  %v6655_v51 = vld [vmem:[%s9047_s3 + $0x524] ss:$8 sps:$4 sm:$0xff]  }
 0x14e   : > { %1280 = vmatprep.subr.bf16.mxu1 %v6590_v52  ;;  %v6650_v52 = vld [vmem:[%s9047_s3 + $0x3e8] ss:$8 sps:$4 sm:$0xff]  }
 0x14f   : > { %1726 = vmatpush1.bf16.msra.mxu0 %v6585_v53  ;;  %v6658_v53 = vld [vmem:[%s9047_s3 + $0x3dc] ss:$8 sps:$4 sm:$0xff]  }
 0x150   : > { %1727 = vmatprep.subr.bf16.mxu0 %v6593_v55  ;;  %v6661_v55 = vld [vmem:[%s9047_s3 + $0x514] ss:$8 sps:$4 sm:$0xff]  }
 0x151   : > { %1281 = vmatpush1.bf16.msra.mxu1 %v6588_v56  ;;  %v6656_v56 = vld [vmem:[%s9047_s3 + $0x3d8] ss:$8 sps:$4 sm:$0xff]  }
 0x152   : > { %1282 = vmatprep.subr.bf16.mxu1 %v6596_v57  ;;  %v6664_v57 = vld [vmem:[%s9047_s3 + $0x3cc] ss:$8 sps:$4 sm:$0xff]  }
 0x153   : > { %1728 = vmatpush1.bf16.msra.mxu0 %v6591_v59  ;;  %v6667_v59 = vld [vmem:[%s9047_s3 + $0x504] ss:$8 sps:$4 sm:$0xff]  }
 0x154   : > { %1729 = vmatprep.subr.bf16.mxu0 %v6599_v63  ;;  %v6665_v63 = vld [vmem:[%s9047_s3 + $0x500] ss:$8 sps:$4 sm:$0xff]  }
 0x155   : > { %1283 = vmatpush1.bf16.msra.mxu1 %v6594_v0  ;;  %v6673_v0 = vld [vmem:[%s9047_s3 + $0x4f4] ss:$8 sps:$4 sm:$0xff]  }
 0x156   : > { %5616 = vmatprep.subr.msk.bf16.mxu1 %vm514_vm0, %v5615_v3  ;;  %v6676_v3 = vld [vmem:[%s9047_s3 + $0x3ac] ss:$8 sps:$4 sm:$0xff]  }
 0x157   : > { %1730 = vmatpush1.bf16.msra.mxu0 %v6597_v5  ;;  %v5717_v5 = vld [vmem:[%s9047_s3 + $0x4d8] sm:$0x33] }
 0x158   : > { %5559 = vmatmul.mubr.msk.bf16.vlgmr.msra.gmra.mxu1 %vm510_vm1, %v1193_v9  ;;  %5703 = vmatprep.subr.msk.bf16.mxu0 %vm514_vm0, %v5702_v7  ;;  %v6674_v7 = vld [vmem:[%s9047_s3 + $0x3a8] ss:$8 sps:$4 sm:$0xff]   ;;  %v5731_v9 = vcombine.high %v5717_v5, %v5717_v5 }
 0x159   : > { %1569 = vmatpush1.bf16.msra.mxu1 %v1561_v10  ;;  %1598 = vmatprep.mubr.bf16.mxu1 %v7142_v1  ;;  %v5730_v10 = vcombine.low %v5717_v5, %v5717_v5  ;;  %v6742_v5 = vld [vmem:[%s9047_s3 + $0x568] ss:$8 sps:$4 sm:$0xff]  }
 0x15a   : > { %5646 = vmatmul.mubr.msk.bf16.vlgmr.msra.gmra.mxu0 %vm510_vm1, %v7675_v12  ;;  %1570 = vmatprep.subr.bf16.mxu1 %v6606_v11  ;;  %v6677_v11 = vld [vmem:[%s9047_s3 + $0x4e0] ss:$8 sps:$4 sm:$0xff]  }
 0x15b   : > { %2018 = vmatpush1.bf16.msra.mxu0 %v2010_v13  ;;  %2047 = vmatprep.mubr.bf16.mxu0 %v7142_v1  ;;  %v5818_v13 = vcombine.high %v5804_v8, %v5804_v8 }
 0x15c   : > { %2019 = vmatprep.subr.bf16.mxu0 %v6609_v14  ;;  %v5817_v14 = vcombine.low %v5804_v8, %v5804_v8  ;;  %v6745_v8 = vld [vmem:[%s9047_s3 + $0x6a0] ss:$8 sps:$4 sm:$0xff]  }
 0x15d   : > { %1571 = vmatpush1.bf16.msra.mxu1 %v6604_v15  ;;  %v7848_v15 = vshrl.u32 %v7675_v12, 16 }
 0x15e   : > { %1572 = vmatprep.subr.bf16.mxu1 %v6612_v16  ;;  %v2159_v16 = vsel %vm514_vm0, %v5730_v10, 0  ;;  %v6753_v10 = vld [vmem:[%s9047_s3 + $0x694] ss:$8 sps:$4 sm:$0xff]  }
 0x15f   : > { %2020 = vmatpush1.bf16.msra.mxu0 %v6607_v17  ;;  %v6686_v17 = vld [vmem:[%s9047_s3 + $0x4cc] ss:$8 sps:$4 sm:$0xff]  }
 0x160   : > { %2021 = vmatprep.subr.bf16.mxu0 %v6615_v18  ;;  %v2238_v18 = vrot.slane %v7675_v12, 2 }
 0x161   : > { %1573 = vmatpush1.bf16.msra.mxu1 %v6610_v19  ;;  %v2606_v19 = vsel %vm514_vm0, %v5817_v14, 0 }
 0x162   : > { %1574 = vmatprep.subr.bf16.mxu1 %v6618_v20  ;;  %v6689_v20 = vld [vmem:[%s9047_s3 + $0x604] ss:$8 sps:$4 sm:$0xff]  }
 0x163   : > { %2022 = vmatpush1.bf16.msra.mxu0 %v6613_v21  ;;  %v6684_v21 = vld [vmem:[%s9047_s3 + $0x4c8] ss:$8 sps:$4 sm:$0xff]  }
 0x164   : > { %2023 = vmatprep.subr.bf16.mxu0 %v6621_v22  ;;  %v6692_v22 = vld [vmem:[%s9047_s3 + $0x4bc] ss:$8 sps:$4 sm:$0xff]  }
 0x165   : > { %1575 = vmatpush1.bf16.msra.mxu1 %v6616_v23  ;;  %v6687_v23 = vld [vmem:[%s9047_s3 + $0x600] ss:$8 sps:$4 sm:$0xff]  }
 0x166   : > { %1576 = vmatprep.subr.bf16.mxu1 %v6624_v24  ;;  %v6695_v24 = vld [vmem:[%s9047_s3 + $0x5f4] ss:$8 sps:$4 sm:$0xff]  }
 0x167   : > { %2024 = vmatpush1.bf16.msra.mxu0 %v6619_v25  ;;  %v6690_v25 = vld [vmem:[%s9047_s3 + $0x4b8] ss:$8 sps:$4 sm:$0xff]  }
 0x168   : > { %2025 = vmatprep.subr.bf16.mxu0 %v6627_v27  ;;  %v6698_v27 = vld [vmem:[%s9047_s3 + $0x4ac] ss:$8 sps:$4 sm:$0xff]  }
 0x169   : > { %1577 = vmatpush1.bf16.msra.mxu1 %v6622_v28  ;;  %v6693_v28 = vld [vmem:[%s9047_s3 + $0x5f0] ss:$8 sps:$4 sm:$0xff]  }
 0x16a   : > { %1578 = vmatprep.subr.bf16.mxu1 %v6630_v29  ;;  %v6701_v29 = vld [vmem:[%s9047_s3 + $0x5e4] ss:$8 sps:$4 sm:$0xff]  }
 0x16b   : > { %2026 = vmatpush1.bf16.msra.mxu0 %v6625_v30  ;;  %v6696_v30 = vld [vmem:[%s9047_s3 + $0x4a8] ss:$8 sps:$4 sm:$0xff]  }
 0x16c   : > { %2027 = vmatprep.subr.bf16.mxu0 %v6633_v31  ;;  %v6704_v31 = vld [vmem:[%s9047_s3 + $0x49c] ss:$8 sps:$4 sm:$0xff]  }
 0x16d   : > { %1579 = vmatpush1.bf16.msra.mxu1 %v6628_v32  ;;  %v6699_v32 = vld [vmem:[%s9047_s3 + $0x5e0] ss:$8 sps:$4 sm:$0xff]  }
 0x16e   : > { %1580 = vmatprep.subr.bf16.mxu1 %v6636_v33  ;;  %v6707_v33 = vld [vmem:[%s9047_s3 + $0x5d4] ss:$8 sps:$4 sm:$0xff]  }
 0x16f   : > { %2028 = vmatpush1.bf16.msra.mxu0 %v6631_v34  ;;  %v6702_v34 = vld [vmem:[%s9047_s3 + $0x498] ss:$8 sps:$4 sm:$0xff]  }
 0x170   : > { %2029 = vmatprep.subr.bf16.mxu0 %v6639_v36  ;;  %v6705_v36 = vld [vmem:[%s9047_s3 + $0x5d0] ss:$8 sps:$4 sm:$0xff]  }
 0x171   : > { %1581 = vmatpush1.bf16.msra.mxu1 %v6634_v37  ;;  %v6713_v37 = vld [vmem:[%s9047_s3 + $0x5c4] ss:$8 sps:$4 sm:$0xff]  }
 0x172   : > { %5674 = vmatprep.subr.msk.bf16.mxu1 %vm514_vm0, %v5673_v26  ;;  %v6716_v26 = vld [vmem:[%s9047_s3 + $0x47c] ss:$8 sps:$4 sm:$0xff]  }
 0x173   : > { %2030 = vmatpush1.bf16.msra.mxu0 %v6637_v40  ;;  %v5775_v40 = vld [vmem:[%s9047_s3 + $0x5a8] sm:$0x33] }
 0x174   : > { %5617 = vmatmul.mubr.msk.bf16.vlgmr.msra.gmra.mxu1 %vm510_vm1, %v1491_v43  ;;  %5761 = vmatprep.subr.msk.bf16.mxu0 %vm514_vm0, %v5760_v41  ;;  %v6719_v41 = vld [vmem:[%s9047_s3 + $0x5b4] ss:$8 sps:$4 sm:$0xff]   ;;  %v5862_v43 = vld [vmem:[%s9047_s3 + $0x6e0] sm:$0x33] }
 0x175   : > { %1868 = vmatpush1.bf16.msra.mxu1 %v1860_v44  ;;  %1897 = vmatprep.mubr.bf16.mxu1 %v7142_v1  ;;  %v5789_v44 = vcombine.high %v5775_v40, %v5775_v40 }
 0x176   : > { %5704 = vmatmul.mubr.msk.bf16.vlgmr.msra.gmra.mxu0 %vm510_vm1, %v1940_v46  ;;  %1869 = vmatprep.subr.bf16.mxu1 %v6646_v45  ;;  %v5788_v45 = vcombine.low %v5775_v40, %v5775_v40  ;;  %v6717_v46 = vld [vmem:[%s9047_s3 + $0x5b0] ss:$8 sps:$4 sm:$0xff]   ;;  %v6769_v40 = vld [vmem:[%s9047_s3 + $0x7a4] ss:$8 sps:$4 sm:$0xff]  }
 0x177   : > { %2316 = vmatpush1.bf16.msra.mxu0 %v2308_v47  ;;  %2345 = vmatprep.mubr.bf16.mxu0 %v7142_v1  ;;  %v5876_v47 = vcombine.high %v5862_v43, %v5862_v43 }
 0x178   : > { %2317 = vmatprep.subr.bf16.mxu0 %v6649_v60  ;;  %v5875_v60 = vcombine.low %v5862_v43, %v5862_v43 }
 0x179   : > { %1870 = vmatpush1.bf16.msra.mxu1 %v6644_v48  ;;  %v2089_v48 = vrot.slane %v7848_v15, 1 }
 0x17a   : > { %1871 = vmatprep.subr.bf16.mxu1 %v6652_v49  ;;  %v2457_v49 = vsel %vm514_vm0, %v5788_v45, 0  ;;  %v6772_v45 = vld [vmem:[%s9047_s3 + $0x65c] ss:$8 sps:$4 sm:$0xff]  }
 0x17b   : > { %2318 = vmatpush1.bf16.msra.mxu0 %v6647_v50  ;;  %v6726_v50 = vld [vmem:[%s9047_s3 + $0x59c] ss:$8 sps:$4 sm:$0xff]  }
 0x17c   : > { %2319 = vmatprep.subr.bf16.mxu0 %v6655_v51  ;;  %v2536_v51 = vrot.slane %v7675_v12, 3  ;;  %v6732_v12 = vld [vmem:[%s9047_s3 + $0x58c] ss:$8 sps:$4 sm:$0xff]  }
 0x17d   : > { %1872 = vmatpush1.bf16.msra.mxu1 %v6650_v52  ;;  %v2904_v52 = vsel %vm514_vm0, %v5875_v60, 0  ;;  %v6775_v60 = vld [vmem:[%s9047_s3 + $0x794] ss:$8 sps:$4 sm:$0xff]  }
 0x17e   : > { %1873 = vmatprep.subr.bf16.mxu1 %v6658_v53  ;;  %v6729_v53 = vld [vmem:[%s9047_s3 + $0x6d4] ss:$8 sps:$4 sm:$0xff]  }
 0x17f   : > { %2320 = vmatpush1.bf16.msra.mxu0 %v6653_v54  ;;  %v6724_v54 = vld [vmem:[%s9047_s3 + $0x598] ss:$8 sps:$4 sm:$0xff]  }
 0x180   : > { %2321 = vmatprep.subr.bf16.mxu0 %v6661_v55  ;;  %v6727_v55 = vld [vmem:[%s9047_s3 + $0x6d0] ss:$8 sps:$4 sm:$0xff]  }
 0x181   : > { %1874 = vmatpush1.bf16.msra.mxu1 %v6656_v56  ;;  %v6735_v56 = vld [vmem:[%s9047_s3 + $0x6c4] ss:$8 sps:$4 sm:$0xff]  }
 0x182   : > { %1875 = vmatprep.subr.bf16.mxu1 %v6664_v57  ;;  %v6730_v57 = vld [vmem:[%s9047_s3 + $0x588] ss:$8 sps:$4 sm:$0xff]  }
 0x183   : > { %2322 = vmatpush1.bf16.msra.mxu0 %v6659_v58  ;;  %v6738_v58 = vld [vmem:[%s9047_s3 + $0x57c] ss:$8 sps:$4 sm:$0xff]  }
 0x184   : > { %2323 = vmatprep.subr.bf16.mxu0 %v6667_v59  ;;  %v6733_v59 = vld [vmem:[%s9047_s3 + $0x6c0] ss:$8 sps:$4 sm:$0xff]  }
 0x185   : > { %1876 = vmatpush1.bf16.msra.mxu1 %v6662_v61  ;;  %v6356_v61 = vpop.f32.mrf.mxu0 }
 0x186   : > { %1877 = vmatprep.subr.bf16.mxu1 %v6670_v62  ;;  %v6741_v62 = vld [vmem:[%s9047_s3 + $0x6b4] ss:$8 sps:$4 sm:$0xff]  }
 0x187   : > { %2324 = vmatpush1.bf16.msra.mxu0 %v6665_v63  ;;  %v6736_v63 = vld [vmem:[%s9047_s3 + $0x578] ss:$8 sps:$4 sm:$0xff]  }
 0x188   : > { %2325 = vmatprep.subr.bf16.mxu0 %v6673_v0  ;;  %v6744_v0 = vld [vmem:[%s9047_s3 + $0x56c] ss:$8 sps:$4 sm:$0xff]  }
 0x189   : > { %1878 = vmatpush1.bf16.msra.mxu1 %v6668_v2  ;;  %v6739_v2 = vld [vmem:[%s9047_s3 + $0x6b0] ss:$8 sps:$4 sm:$0xff]  }
 0x18a   : > { %1879 = vmatprep.subr.bf16.mxu1 %v6676_v3  ;;  %v6357_v3 = vpop.f32.mrf.mxu0 }
 0x18b   : > { %2326 = vmatpush1.bf16.msra.mxu0 %v6671_v4  ;;  %v6747_v4 = vld [vmem:[%s9047_s3 + $0x6a4] ss:$8 sps:$4 sm:$0xff]  }
 0x18c   : > { %2327 = vmatprep.subr.bf16.mxu0 %v6679_v6  ;;  %v6750_v6 = vld [vmem:[%s9047_s3 + $0x55c] ss:$8 sps:$4 sm:$0xff]  }
 0x18d   : > { %1880 = vmatpush1.bf16.msra.mxu1 %v6674_v7  ;;  %v6358_v7 = vadd.f32 %v6357_v3, %v6356_v61  ;;  %v6796_v3 = vld [vmem:[%s9047_s3 + $0x61c] ss:$8 sps:$4 sm:$0xff]  }
 0x18e   : > { %5732 = vmatprep.subr.msk.bf16.mxu1 %vm514_vm0, %v5731_v9  ;;  %v334_v9 = vpop.permute.xlu1 %333 }
 0x18f   : > { %2328 = vmatpush1.bf16.msra.mxu0 %v6677_v11  ;;  %v6748_v11 = vld [vmem:[%s9047_s3 + $0x558] ss:$8 sps:$4 sm:$0xff]   ;;  %v418_v14 = vadd.f32 %v6358_v7, %v334_v9  ;;  %v6799_v7 = vld [vmem:[%s9047_s3 + $0x754] ss:$8 sps:$4 sm:$0xff]  }
 0x190   : > { %5675 = vmatmul.mubr.msk.bf16.vlgmr.msra.gmra.mxu1 %vm510_vm1, %v7848_v15  ;;  %5819 = vmatprep.subr.msk.bf16.mxu0 %vm514_vm0, %v5818_v13  ;;  %v8005_v13 = vpop.f32.mrf.mxu0  ;;  %v5978_v9 = vld [vmem:[%s9047_s3 + $0x880] sm:$0x33] }
 0x191   : > { %2167 = vmatpush1.bf16.msra.mxu1 %v2159_v16  ;;  %2196 = vmatprep.mubr.bf16.mxu1 %v7142_v1  ;;  %v6756_v16 = vld [vmem:[%s9047_s3 + $0x54c] ss:$8 sps:$4 sm:$0xff]  }
 0x192   : > { %5762 = vmatmul.mubr.msk.bf16.vlgmr.msra.gmra.mxu0 %vm510_vm1, %v2238_v18  ;;  %2168 = vmatprep.subr.bf16.mxu1 %v6686_v17  ;;  %v6751_v17 = vld [vmem:[%s9047_s3 + $0x690] ss:$8 sps:$4 sm:$0xff]  }
 0x193   : > { %2614 = vmatpush1.bf16.msra.mxu0 %v2606_v19  ;;  %2643 = vmatprep.mubr.bf16.mxu0 %v7142_v1  ;;  %v5833_v18 = vld [vmem:[%s9047_s3 + $0x678] sm:$0x33]  ;;  %v6759_v19 = vld [vmem:[%s9047_s3 + $0x684] ss:$8 sps:$4 sm:$0xff]  }
 0x194   : > { %2615 = vmatprep.subr.bf16.mxu0 %v6689_v20  ;;  %v6754_v20 = vld [vmem:[%s9047_s3 + $0x548] ss:$8 sps:$4 sm:$0xff]  }
 0x195   : > { %2169 = vmatpush1.bf16.msra.mxu1 %v6684_v21  ;;  %v5920_v21 = vld [vmem:[%s9047_s3 + $0x7b0] sm:$0x33] }
 0x196   : > { %2170 = vmatprep.subr.bf16.mxu1 %v6692_v22  ;;  %v428_v22 = vmax.f32 %v418_v14, 0.0 }
 0x197   : > { %2616 = vmatpush1.bf16.msra.mxu0 %v6687_v23  ;;  %v8025_v23 = vpop.f32.mrf.mxu0 }
 0x198   : > { %2617 = vmatprep.subr.bf16.mxu0 %v6695_v24  ;;  %v5847_v24 = vcombine.high %v5833_v18, %v5833_v18 }
 0x199   : > { %2171 = vmatpush1.bf16.msra.mxu1 %v6690_v25  ;;  %v5846_v25 = vcombine.low %v5833_v18, %v5833_v18  ;;  %v5992_v18 = vcombine.high %v5978_v9, %v5978_v9 }
 0x19a   : > { %2172 = vmatprep.subr.bf16.mxu1 %v6698_v27  ;;  %v6757_v27 = vld [vmem:[%s9047_s3 + $0x680] ss:$8 sps:$4 sm:$0xff]  }
 0x19b   : > { %2618 = vmatpush1.bf16.msra.mxu0 %v6693_v28 }
 0x19c   : > { %2619 = vmatprep.subr.bf16.mxu0 %v6701_v29  ;;  %v5934_v29 = vcombine.high %v5920_v21, %v5920_v21 }
 0x19d   : > { %2173 = vmatpush1.bf16.msra.mxu1 %v6696_v30  ;;  %v5933_v30 = vcombine.low %v5920_v21, %v5920_v21 }
 0x19e   : > { %2174 = vmatprep.subr.bf16.mxu1 %v6704_v31  ;;  %v8032_v31 = vpack.c.bf16 %v428_v22, %v428_v22  ;;  %v2685_v22 = vrot.slane %v7848_v15, 3 }
 0x19f   : > { %2620 = vmatpush1.bf16.msra.mxu0 %v6699_v32 }
 0x1a0   : > { %2621 = vmatprep.subr.bf16.mxu0 %v6707_v33 }
 0x1a1   : > { %2175 = vmatpush1.bf16.msra.mxu1 %v6702_v34  ;;  %v2387_v34 = vrot.slane %v7848_v15, 2 }
 0x1a2   : > { %2176 = vmatprep.subr.bf16.mxu1 %v6710_v35  ;;  %v2755_v35 = vsel %vm514_vm0, %v5846_v25, 0  ;;  %v3134_v25 = vrot.slane %v8032_v31, 1 }
 0x1a3   : > { %2622 = vmatpush1.bf16.msra.mxu0 %v6705_v36  ;;  %v6766_v36 = vld [vmem:[%s9047_s3 + $0x66c] ss:$8 sps:$4 sm:$0xff]  }
 0x1a4   : > { %2623 = vmatprep.subr.bf16.mxu0 %v6713_v37 }
 0x1a5   : > { %2177 = vmatpush1.bf16.msra.mxu1 %v6708_v38 }
 0x1a6   : > { %2178 = vmatprep.subr.bf16.mxu1 %v6716_v26 }
 0x1a7   : > { %2624 = vmatpush1.bf16.msra.mxu0 %v6711_v39  ;;  %v3204_v39 = vsel %vm514_vm0, %v5933_v30, 0  ;;  %v430_v30 = vld [vmem:[%s9048_s4] sm:$0x3] }
 0x1a8   : > { %2625 = vmatprep.subr.bf16.mxu0 %v6719_v41 }
 0x1a9   : > { %2179 = vmatpush1.bf16.msra.mxu1 %v6714_v42  ;;  %v6764_v42 = vld [vmem:[%s9047_s3 + $0x668] ss:$8 sps:$4 sm:$0xff]  }
 0x1aa   : > { %5790 = vmatprep.subr.msk.bf16.mxu1 %vm514_vm0, %v5789_v44 }
 0x1ab   : > { %2626 = vmatpush1.bf16.msra.mxu0 %v6717_v46  ;;  %v6767_v46 = vld [vmem:[%s9047_s3 + $0x7a0] ss:$8 sps:$4 sm:$0xff]  }
 0x1ac   : > { %5733 = vmatmul.mubr.msk.bf16.vlgmr.msra.gmra.mxu1 %vm510_vm1, %v2089_v48  ;;  %5877 = vmatprep.subr.msk.bf16.mxu0 %vm514_vm0, %v5876_v47  ;;  %v6770_v48 = vld [vmem:[%s9047_s3 + $0x658] ss:$8 sps:$4 sm:$0xff]  }
 0x1ad   : > { %2465 = vmatpush1.bf16.msra.mxu1 %v2457_v49  ;;  %2494 = vmatprep.mubr.bf16.mxu1 %v7142_v1  ;;  %v6778_v49 = vld [vmem:[%s9047_s3 + $0x64c] ss:$8 sps:$4 sm:$0xff]  }
 0x1ae   : > { %5820 = vmatmul.mubr.msk.bf16.vlgmr.msra.gmra.mxu0 %vm510_vm1, %v2536_v51  ;;  %2466 = vmatprep.subr.bf16.mxu1 %v6726_v50  ;;  %v6773_v50 = vld [vmem:[%s9047_s3 + $0x790] ss:$8 sps:$4 sm:$0xff]   ;;  %v6781_v51 = vld [vmem:[%s9047_s3 + $0x784] ss:$8 sps:$4 sm:$0xff]  }
 0x1af   : > { %2912 = vmatpush1.bf16.msra.mxu0 %v2904_v52  ;;  %2941 = vmatprep.mubr.bf16.mxu0 %v7142_v1  ;;  %v6776_v52 = vld [vmem:[%s9047_s3 + $0x648] ss:$8 sps:$4 sm:$0xff]  }
 0x1b0   : > { %2913 = vmatprep.subr.bf16.mxu0 %v6729_v53  ;;  %v6784_v53 = vld [vmem:[%s9047_s3 + $0x63c] ss:$8 sps:$4 sm:$0xff]  }
 0x1b1   : > { %2467 = vmatpush1.bf16.msra.mxu1 %v6724_v54  ;;  %v7143_v54 = vmov 1966171168  }
 0x1b2   : > { %2468 = vmatprep.subr.bf16.mxu1 %v6732_v12  ;;  %v566_v12 = vunpack.c.l.s4 %v7143_v54  ;;  %v6819_v54 = vld [vmem:[%s9047_s3 + $0x850] ss:$8 sps:$4 sm:$0xff]  }
 0x1b3   : > { %2914 = vmatpush1.bf16.msra.mxu0 %v6727_v55  ;;  %v568_v55 = vlaneseq }
 0x1b4   : > { %2915 = vmatprep.subr.bf16.mxu0 %v6735_v56  ;;  %v6779_v56 = vld [vmem:[%s9047_s3 + $0x780] ss:$8 sps:$4 sm:$0xff]   ;;  %v567_v61 = vunpack.c.0.s8 %v566_v12  ;;  %v6827_v12 = vld [vmem:[%s9047_s3 + $0x844] ss:$8 sps:$4 sm:$0xff]  }
 0x1b5   : > { %2469 = vmatpush1.bf16.msra.mxu1 %v6730_v57  ;;  %v6787_v57 = vld [vmem:[%s9047_s3 + $0x774] ss:$8 sps:$4 sm:$0xff]  }
 0x1b6   : > { %2470 = vmatprep.subr.bf16.mxu1 %v6738_v58  ;;  %v6782_v58 = vld [vmem:[%s9047_s3 + $0x638] ss:$8 sps:$4 sm:$0xff]  }
 0x1b7   : > { %2916 = vmatpush1.bf16.msra.mxu0 %v6733_v59  ;;  %v6790_v59 = vld [vmem:[%s9047_s3 + $0x62c] ss:$8 sps:$4 sm:$0xff]  }
 0x1b8   : > { %2917 = vmatprep.subr.bf16.mxu0 %v6741_v62  ;;  %v8102_v62 = vshrl.u32 %v568_v55, 7  ;;  %v6822_v55 = vld [vmem:[%s9047_s3 + $0x708] ss:$8 sps:$4 sm:$0xff]  }
 0x1b9   : > { %2471 = vmatpush1.bf16.msra.mxu1 %v6736_v63  ;;  %v6785_v63 = vld [vmem:[%s9047_s3 + $0x770] ss:$8 sps:$4 sm:$0xff]  }
 0x1ba   : > { %2472 = vmatprep.subr.bf16.mxu1 %v6744_v0  ;;  %v6793_v0 = vld [vmem:[%s9047_s3 + $0x764] ss:$8 sps:$4 sm:$0xff]  }
 0x1bb   : > { %2918 = vmatpush1.bf16.msra.mxu0 %v6739_v2  ;;  %v6788_v2 = vld [vmem:[%s9047_s3 + $0x628] ss:$8 sps:$4 sm:$0xff]  }
 0x1bc   : > { %2919 = vmatprep.subr.bf16.mxu0 %v6747_v4  ;;  %v8117_v4 = vsub.s32 %v567_v61, %v8102_v62  ;;  %v6836_v61 = vld [vmem:[%s9047_s3 + $0x6ec] ss:$8 sps:$4 sm:$0xff]  }
 0x1bd   : > { %2473 = vmatpush1.bf16.msra.mxu1 %v6742_v5  ;;  %v6791_v5 = vld [vmem:[%s9047_s3 + $0x760] ss:$8 sps:$4 sm:$0xff]  }
 0x1be   : > { %2474 = vmatprep.subr.bf16.mxu1 %v6750_v6  ;;  %v5891_v6 = vld [vmem:[%s9047_s3 + $0x748] sm:$0x33] }
 0x1bf   : > { %2920 = vmatpush1.bf16.msra.mxu0 %v6745_v8  ;;  %v6794_v8 = vld [vmem:[%s9047_s3 + $0x618] ss:$8 sps:$4 sm:$0xff]  }
 0x1c0   : > { %2921 = vmatprep.subr.bf16.mxu0 %v6753_v10  ;;  %v5905_v10 = vcombine.high %v5891_v6, %v5891_v6 }
 0x1c1   : > { %2475 = vmatpush1.bf16.msra.mxu1 %v6748_v11  ;;  %v5904_v11 = vcombine.low %v5891_v6, %v5891_v6 }
 0x1c2   : > { %2476 = vmatprep.subr.bf16.mxu1 %v6756_v16  ;;  %v6797_v16 = vld [vmem:[%s9047_s3 + $0x750] ss:$8 sps:$4 sm:$0xff]  }
 0x1c3   : > { %2922 = vmatpush1.bf16.msra.mxu0 %v6751_v17 }
 0x1c4   : > { %v8030_v28 = vpop.f32.mrf.mxu1  ;;  %2923 = vmatprep.subr.bf16.mxu0 %v6759_v19  ;;  %v5991_v19 = vcombine.low %v5978_v9, %v5978_v9 }
 0x1c5   : > { %2477 = vmatpush1.bf16.msra.mxu1 %v6754_v20 }
 0x1c6   : > { %v8034_v32 = vpop.f32.mrf.mxu1  ;;  %v8036_v33 = vpop.f32.mrf.mxu0  ;;  %5848 = vmatprep.subr.msk.bf16.mxu1 %vm514_vm0, %v5847_v24  ;;  %v3054_v24 = vsel %vm514_vm0, %v5904_v11, 0 }
 0x1c7   : > { %v564_v37 = vcombine.low %v8030_v28, %v8034_v32  ;;  %2924 = vmatpush1.bf16.msra.mxu0 %v6757_v27  ;;  %v6806_v27 = vld [vmem:[%s9047_s3 + $0x73c] ss:$8 sps:$4 sm:$0xff]  }
 0x1c8   : > { %5791 = vmatmul.mubr.msk.bf16.vlgmr.msra.gmra.mxu1 %vm510_vm1, %v2387_v34  ;;  %v559_v38 = vpop.f32.mrf.mxu1  ;;  %v8047_v26 = vpop.f32.mrf.mxu0  ;;  %5935 = vmatprep.subr.msk.bf16.mxu0 %vm514_vm0, %v5934_v29  ;;  %v3502_v34 = vsel %vm514_vm0, %v5991_v19, 0  ;;  %v6846_v19 = vld [vmem:[%s9047_s3 + $0x80c] ss:$8 sps:$4 sm:$0xff]  }
 0x1c9   : > { %v864_v41 = vcombine.low %v8036_v33, %v8047_v26  ;;  %2763 = vmatpush1.bf16.msra.mxu1 %v2755_v35  ;;  %2792 = vmatprep.mubr.bf16.mxu1 %v7142_v1  ;;  %v571_v14 = vrot.slane %v564_v37, %v8117_v4  ;;  %v6809_v35 = vld [vmem:[%s9047_s3 + $0x874] ss:$8 sps:$4 sm:$0xff]  }
 0x1ca   : > { %v560_v43 = vpop.f32.mrf.mxu1  ;;  %v859_v44 = vpop.f32.mrf.mxu0  ;;  %5878 = vmatmul.mubr.msk.bf16.vlgmr.msra.gmra.mxu0 %vm510_vm1, %v8032_v31  ;;  %2764 = vmatprep.subr.bf16.mxu1 %v6766_v36  ;;  %v6812_v33 = vld [vmem:[%s9047_s3 + $0x72c] ss:$8 sps:$4 sm:$0xff]  }
 0x1cb   : > { %3212 = vmatpush1.bf16.msra.mxu0 %v3204_v39  ;;  %3241 = vmatprep.mubr.bf16.mxu0 %v7142_v1  ;;  %v578_v28 = vrot.slane %v571_v14, %v8117_v4  ;;  %v871_v36 = vrot.slane %v864_v41, %v8117_v4  ;;  %v6804_v39 = vld [vmem:[%s9047_s3 + $0x738] ss:$8 sps:$4 sm:$0xff]  }
 0x1cc   : > { %v860_v47 = vpop.f32.mrf.mxu0  ;;  %3213 = vmatprep.subr.bf16.mxu0 %v6769_v40  ;;  %v6807_v43 = vld [vmem:[%s9047_s3 + $0x870] ss:$8 sps:$4 sm:$0xff]  }
 0x1cd   : > { %2765 = vmatpush1.bf16.msra.mxu1 %v6764_v42  ;;  %v580_v26 = vadd.f32 %v578_v28, %v430_v30  ;;  %v6849_v28 = vld [vmem:[%s9047_s3 + $0x944] ss:$8 sps:$4 sm:$0xff]  }
 0x1ce   : > { %2766 = vmatprep.subr.bf16.mxu1 %v6772_v45  ;;  %v6815_v45 = vld [vmem:[%s9047_s3 + $0x864] ss:$8 sps:$4 sm:$0xff]  }
 0x1cf   : > { %3214 = vmatpush1.bf16.msra.mxu0 %v6767_v46  ;;  %v878_v46 = vrot.slane %v871_v36, %v8117_v4 }
 0x1d0   : > { %3215 = vmatprep.subr.bf16.mxu0 %v6775_v60  ;;  %v6810_v60 = vld [vmem:[%s9047_s3 + $0x728] ss:$8 sps:$4 sm:$0xff]  }
 0x1d1   : > { %2767 = vmatpush1.bf16.msra.mxu1 %v6770_v48  ;;  %v6818_v48 = vld [vmem:[%s9047_s3 + $0x71c] ss:$8 sps:$4 sm:$0xff]  }
 0x1d2   : > { %2768 = vmatprep.subr.bf16.mxu1 %v6778_v49  ;;  %v6813_v49 = vld [vmem:[%s9047_s3 + $0x860] ss:$8 sps:$4 sm:$0xff]  }
 0x1d3   : > { %3216 = vmatpush1.bf16.msra.mxu0 %v6773_v50 }
 0x1d4   : > { %3217 = vmatprep.subr.bf16.mxu0 %v6781_v51  ;;  %v6821_v51 = vld [vmem:[%s9047_s3 + $0x854] ss:$8 sps:$4 sm:$0xff]  }
 0x1d5   : > { %2769 = vmatpush1.bf16.msra.mxu1 %v6776_v52  ;;  %v6816_v52 = vld [vmem:[%s9047_s3 + $0x718] ss:$8 sps:$4 sm:$0xff]  }
 0x1d6   : > { %2770 = vmatprep.subr.bf16.mxu1 %v6784_v53  ;;  %v6824_v53 = vld [vmem:[%s9047_s3 + $0x70c] ss:$8 sps:$4 sm:$0xff]  }
 0x1d7   : > { %3218 = vmatpush1.bf16.msra.mxu0 %v6779_v56  ;;  %v6830_v56 = vld [vmem:[%s9047_s3 + $0x6fc] ss:$8 sps:$4 sm:$0xff]  }
 0x1d8   : > { %3219 = vmatprep.subr.bf16.mxu0 %v6787_v57  ;;  %v6825_v57 = vld [vmem:[%s9047_s3 + $0x840] ss:$8 sps:$4 sm:$0xff]  }
 0x1d9   : > { %2771 = vmatpush1.bf16.msra.mxu1 %v6782_v58  ;;  %v6833_v58 = vld [vmem:[%s9047_s3 + $0x834] ss:$8 sps:$4 sm:$0xff]  }
 0x1da   : > { %2772 = vmatprep.subr.bf16.mxu1 %v6790_v59  ;;  %v6828_v59 = vld [vmem:[%s9047_s3 + $0x6f8] ss:$8 sps:$4 sm:$0xff]  }
 0x1db   : > { %3220 = vmatpush1.bf16.msra.mxu0 %v6785_v63  ;;  %v6831_v63 = vld [vmem:[%s9047_s3 + $0x830] ss:$8 sps:$4 sm:$0xff]  }
 0x1dc   : > { %3221 = vmatprep.subr.bf16.mxu0 %v6793_v0  ;;  %v5949_v0 = vld [vmem:[%s9047_s3 + $0x818] sm:$0x33] }
 0x1dd   : > { %2773 = vmatpush1.bf16.msra.mxu1 %v6788_v2  ;;  %v6839_v2 = vld [vmem:[%s9047_s3 + $0x824] ss:$8 sps:$4 sm:$0xff]   ;;  %v5963_v6 = vcombine.high %v5949_v0, %v5949_v0 }
 0x1de   : > { %2774 = vmatprep.subr.bf16.mxu1 %v6796_v3  ;;  %v6834_v3 = vld [vmem:[%s9047_s3 + $0x6e8] ss:$8 sps:$4 sm:$0xff]  }
 0x1df   : > { %3222 = vmatpush1.bf16.msra.mxu0 %v6791_v5  ;;  %v6036_v5 = vld [vmem:[%s9047_s3 + $0x950] sm:$0x33] }
 0x1e0   : > { %v705_v17 = vpop.f32.mrf.mxu1  ;;  %3223 = vmatprep.subr.bf16.mxu0 %v6799_v7  ;;  %v5962_v7 = vcombine.low %v5949_v0, %v5949_v0  ;;  %v6049_v11 = vcombine.low %v6036_v5, %v6036_v5 }
 0x1e1   : > { %2775 = vmatpush1.bf16.msra.mxu1 %v6794_v8  ;;  %v6837_v8 = vld [vmem:[%s9047_s3 + $0x820] ss:$8 sps:$4 sm:$0xff]  }
 0x1e2   : > { %v707_v20 = vpop.f32.mrf.mxu1  ;;  %v8141_v21 = vpop.f32.mrf.mxu0  ;;  %5906 = vmatprep.subr.msk.bf16.mxu1 %vm514_vm0, %v5905_v10  ;;  %v6050_v10 = vcombine.high %v6036_v5, %v6036_v5 }
 0x1e3   : > { %v714_v29 = vcombine.low %v705_v17, %v707_v20  ;;  %3224 = vmatpush1.bf16.msra.mxu0 %v6797_v16  ;;  %v8251_v17 = vshrl.u32 %v8032_v31, 16 }
 0x1e4   : > { %v709_v32 = vpop.f32.mrf.mxu1  ;;  %v8154_v15 = vpop.f32.mrf.mxu0  ;;  %5849 = vmatmul.mubr.msk.bf16.vlgmr.msra.gmra.mxu1 %vm510_vm1, %v2685_v22  ;;  %5993 = vmatprep.subr.msk.bf16.mxu0 %vm514_vm0, %v5992_v18  ;;  %v3353_v18 = vsel %vm514_vm0, %v5962_v7, 0 }
 0x1e5   : > { %v721_v37 = vrot.slane %v714_v29, %v8117_v4  ;;  %v1162_v38 = vcombine.low %v8141_v21, %v8154_v15  ;;  %3062 = vmatpush1.bf16.msra.mxu1 %v3054_v24  ;;  %3091 = vmatprep.mubr.bf16.mxu1 %v7142_v1  ;;  %v6852_v21 = vld [vmem:[%s9047_s3 + $0x7fc] ss:$8 sps:$4 sm:$0xff]  }
 0x1e6   : > { %v710_v40 = vpop.f32.mrf.mxu1  ;;  %v1157_v42 = vpop.f32.mrf.mxu0  ;;  %5936 = vmatmul.mubr.msk.bf16.vlgmr.msra.gmra.mxu0 %vm510_vm1, %v3134_v25  ;;  %3063 = vmatprep.subr.bf16.mxu1 %v6806_v27  ;;  %v3432_v25 = vrot.slane %v8032_v31, 2  ;;  %v3800_v27 = vsel %vm514_vm0, %v6049_v11, 0 }
 0x1e7   : > { %v728_v41 = vrot.slane %v721_v37, %v8117_v4  ;;  %3510 = vmatpush1.bf16.msra.mxu0 %v3502_v34  ;;  %3539 = vmatprep.mubr.bf16.mxu0 %v7142_v1  ;;  %v1169_v29 = vrot.slane %v1162_v38, %v8117_v4  ;;  %v6844_v34 = vld [vmem:[%s9047_s3 + $0x808] ss:$8 sps:$4 sm:$0xff]  }
 0x1e8   : > { %v1158_v44 = vpop.f32.mrf.mxu0  ;;  %3511 = vmatprep.subr.bf16.mxu0 %v6809_v35  ;;  %v6847_v37 = vld [vmem:[%s9047_s3 + $0x940] ss:$8 sps:$4 sm:$0xff]  }
 0x1e9   : > { %v730_v47 = vadd.f32 %v728_v41, %v580_v26  ;;  %3064 = vmatpush1.bf16.msra.mxu1 %v6804_v39  ;;  %v6855_v39 = vld [vmem:[%s9047_s3 + $0x934] ss:$8 sps:$4 sm:$0xff]   ;;  %v1176_v40 = vrot.slane %v1169_v29, %v8117_v4  ;;  %v6853_v41 = vld [vmem:[%s9047_s3 + $0x930] ss:$8 sps:$4 sm:$0xff]   ;;  %v6861_v44 = vld [vmem:[%s9047_s3 + $0x924] ss:$8 sps:$4 sm:$0xff]  }
 0x1ea   : > { %3065 = vmatprep.subr.bf16.mxu1 %v6812_v33  ;;  %v6850_v33 = vld [vmem:[%s9047_s3 + $0x7f8] ss:$8 sps:$4 sm:$0xff]   ;;  %v6858_v26 = vld [vmem:[%s9047_s3 + $0x7ec] ss:$8 sps:$4 sm:$0xff]  }
 0x1eb   : > { %3512 = vmatpush1.bf16.msra.mxu0 %v6807_v43  ;;  %v8195_v50 = vadd.f32 %v878_v46, %v730_v47  ;;  %v6864_v46 = vld [vmem:[%s9047_s3 + $0x7dc] ss:$8 sps:$4 sm:$0xff]   ;;  %v6859_v47 = vld [vmem:[%s9047_s3 + $0x920] ss:$8 sps:$4 sm:$0xff]   ;;  %v6887_v29 = vld [vmem:[%s9047_s3 + $0xa10] ss:$8 sps:$4 sm:$0xff]  }
 0x1ec   : > { %3513 = vmatprep.subr.bf16.mxu0 %v6815_v45  ;;  %v6856_v45 = vld [vmem:[%s9047_s3 + $0x7e8] ss:$8 sps:$4 sm:$0xff]  }
 0x1ed   : > { %3066 = vmatpush1.bf16.msra.mxu1 %v6810_v60  ;;  %v6867_v60 = vld [vmem:[%s9047_s3 + $0x914] ss:$8 sps:$4 sm:$0xff]  }
 0x1ee   : > { %3067 = vmatprep.subr.bf16.mxu1 %v6818_v48  ;;  %v6862_v48 = vld [vmem:[%s9047_s3 + $0x7d8] ss:$8 sps:$4 sm:$0xff]  }
 0x1ef   : > { %3514 = vmatpush1.bf16.msra.mxu0 %v6813_v49  ;;  %v6870_v49 = vld [vmem:[%s9047_s3 + $0x7cc] ss:$8 sps:$4 sm:$0xff]  }
 0x1f0   : > { %3515 = vmatprep.subr.bf16.mxu0 %v6821_v51  ;;  %v6873_v51 = vld [vmem:[%s9047_s3 + $0x904] ss:$8 sps:$4 sm:$0xff]  }
 0x1f1   : > { %3068 = vmatpush1.bf16.msra.mxu1 %v6816_v52  ;;  %v6868_v52 = vld [vmem:[%s9047_s3 + $0x7c8] ss:$8 sps:$4 sm:$0xff]  }
 0x1f2   : > { %3069 = vmatprep.subr.bf16.mxu1 %v6824_v53  ;;  %v6876_v53 = vld [vmem:[%s9047_s3 + $0x7bc] ss:$8 sps:$4 sm:$0xff]  }
 0x1f3   : > { %3516 = vmatpush1.bf16.msra.mxu0 %v6819_v54  ;;  %v6871_v54 = vld [vmem:[%s9047_s3 + $0x900] ss:$8 sps:$4 sm:$0xff]  }
 0x1f4   : > { %3517 = vmatprep.subr.bf16.mxu0 %v6827_v12  ;;  %v6007_v12 = vld [vmem:[%s9047_s3 + $0x8e8] sm:$0x33] }
 0x1f5   : > { %3070 = vmatpush1.bf16.msra.mxu1 %v6822_v55  ;;  %v6879_v55 = vld [vmem:[%s9047_s3 + $0x8f4] ss:$8 sps:$4 sm:$0xff]  }
 0x1f6   : > { %3071 = vmatprep.subr.bf16.mxu1 %v6830_v56  ;;  %v6874_v56 = vld [vmem:[%s9047_s3 + $0x7b8] ss:$8 sps:$4 sm:$0xff]  }
 0x1f7   : > { %3518 = vmatpush1.bf16.msra.mxu0 %v6825_v57  ;;  %v6094_v57 = vld [vmem:[%s9047_s3 + $0xa20] sm:$0x33] }
 0x1f8   : > { %3519 = vmatprep.subr.bf16.mxu0 %v6833_v58  ;;  %v6021_v58 = vcombine.high %v6007_v12, %v6007_v12  ;;  %v6108_v0 = vcombine.high %v6094_v57, %v6094_v57 }
 0x1f9   : > { %3072 = vmatpush1.bf16.msra.mxu1 %v6828_v59  ;;  %v6020_v59 = vcombine.low %v6007_v12, %v6007_v12 }
 0x1fa   : > { %3073 = vmatprep.subr.bf16.mxu1 %v6836_v61  ;;  %v6877_v61 = vld [vmem:[%s9047_s3 + $0x8f0] ss:$8 sps:$4 sm:$0xff]  }
 0x1fb   : > { %3520 = vmatpush1.bf16.msra.mxu0 %v6831_v63  ;;  %v3651_v7 = vsel %vm514_vm0, %v6020_v59, 0 }
 0x1fc   : > { %v1004_v9 = vpop.f32.mrf.mxu1  ;;  %3521 = vmatprep.subr.bf16.mxu0 %v6839_v2  ;;  %v6107_v2 = vcombine.low %v6094_v57, %v6094_v57 }
 0x1fd   : > { %3074 = vmatpush1.bf16.msra.mxu1 %v6834_v3 }
 0x1fe   : > { %v1006_v14 = vpop.f32.mrf.mxu1  ;;  %v8248_v16 = vpop.f32.mrf.mxu0  ;;  %5964 = vmatprep.subr.msk.bf16.mxu1 %vm514_vm0, %v5963_v6  ;;  %v3283_v6 = vrot.slane %v8251_v17, 1 }
 0x1ff   : > { %v1013_v20 = vcombine.low %v1004_v9, %v1006_v14  ;;  %3522 = vmatpush1.bf16.msra.mxu0 %v6837_v8  ;;  %v6886_v8 = vld [vmem:[%s9047_s3 + $0x8dc] ss:$8 sps:$4 sm:$0xff]   ;;  %v3730_v14 = vrot.slane %v8032_v31, 3  ;;  %v6884_v31 = vld [vmem:[%s9047_s3 + $0x8d8] ss:$8 sps:$4 sm:$0xff]  }
 0x200   : > { %v1008_v22 = vpop.f32.mrf.mxu1  ;;  %v8258_v24 = vpop.f32.mrf.mxu0  ;;  %5907 = vmatmul.mubr.msk.bf16.vlgmr.msra.gmra.mxu1 %vm510_vm1, %v8251_v17  ;;  %6051 = vmatprep.subr.msk.bf16.mxu0 %vm514_vm0, %v6050_v10 }
 0x201   : > { %v1020_v30 = vrot.slane %v1013_v20, %v8117_v4  ;;  %v1460_v32 = vcombine.low %v8248_v16, %v8258_v24  ;;  %3361 = vmatpush1.bf16.msra.mxu1 %v3353_v18  ;;  %3390 = vmatprep.mubr.bf16.mxu1 %v7142_v1  ;;  %v4098_v18 = vsel %vm514_vm0, %v6107_v2, 0  ;;  %v6892_v16 = vld [vmem:[%s9047_s3 + $0x8cc] ss:$8 sps:$4 sm:$0xff]  }
 0x202   : > { %v1009_v35 = vpop.f32.mrf.mxu1  ;;  %v1455_v36 = vpop.f32.mrf.mxu0  ;;  %5994 = vmatmul.mubr.msk.bf16.vlgmr.msra.gmra.mxu0 %vm510_vm1, %v3432_v25  ;;  %3362 = vmatprep.subr.bf16.mxu1 %v6846_v19  ;;  %v6889_v19 = vld [vmem:[%s9047_s3 + $0xa14] ss:$8 sps:$4 sm:$0xff]  }
 0x203   : > { %v1027_v15 = vrot.slane %v1020_v30, %v8117_v4  ;;  %3808 = vmatpush1.bf16.msra.mxu0 %v3800_v27  ;;  %3837 = vmatprep.mubr.bf16.mxu0 %v7142_v1  ;;  %v1467_v20 = vrot.slane %v1460_v32, %v8117_v4  ;;  %v6895_v32 = vld [vmem:[%s9047_s3 + $0xa04] ss:$8 sps:$4 sm:$0xff]   ;;  %v6890_v36 = vld [vmem:[%s9047_s3 + $0x8c8] ss:$8 sps:$4 sm:$0xff]  }
 0x204   : > { %v1456_v38 = vpop.f32.mrf.mxu0  ;;  %3809 = vmatprep.subr.bf16.mxu0 %v6849_v28 }
 0x205   : > { %v1029_v42 = vadd.f32 %v1027_v15, %v8195_v50  ;;  %3363 = vmatpush1.bf16.msra.mxu1 %v6844_v34  ;;  %v6865_v50 = vld [vmem:[%s9047_s3 + $0x910] ss:$8 sps:$4 sm:$0xff]   ;;  %v1474_v34 = vrot.slane %v1467_v20, %v8117_v4  ;;  %v6893_v15 = vld [vmem:[%s9047_s3 + $0xa00] ss:$8 sps:$4 sm:$0xff]   ;;  %v6901_v38 = vld [vmem:[%s9047_s3 + $0x9f4] ss:$8 sps:$4 sm:$0xff]  }
 0x206   : > { %3364 = vmatprep.subr.bf16.mxu1 %v6852_v21  ;;  %v6898_v21 = vld [vmem:[%s9047_s3 + $0x8bc] ss:$8 sps:$4 sm:$0xff]  }
 0x207   : > { %3810 = vmatpush1.bf16.msra.mxu0 %v6847_v37  ;;  %v8302_v43 = vadd.f32 %v1176_v40, %v1029_v42  ;;  %v6904_v40 = vld [vmem:[%s9047_s3 + $0x8ac] ss:$8 sps:$4 sm:$0xff]   ;;  %v6899_v42 = vld [vmem:[%s9047_s3 + $0x9f0] ss:$8 sps:$4 sm:$0xff]  }
 0x208   : > { %3811 = vmatprep.subr.bf16.mxu0 %v6855_v39  ;;  %v6896_v39 = vld [vmem:[%s9047_s3 + $0x8b8] ss:$8 sps:$4 sm:$0xff]  }
 0x209   : > { %3365 = vmatpush1.bf16.msra.mxu1 %v6850_v33  ;;  %v6907_v33 = vld [vmem:[%s9047_s3 + $0x9e4] ss:$8 sps:$4 sm:$0xff]  }
 0x20a   : > { %3366 = vmatprep.subr.bf16.mxu1 %v6858_v26  ;;  %v6902_v26 = vld [vmem:[%s9047_s3 + $0x8a8] ss:$8 sps:$4 sm:$0xff]  }
 0x20b   : > { %3812 = vmatpush1.bf16.msra.mxu0 %v6853_v41  ;;  %v6910_v41 = vld [vmem:[%s9047_s3 + $0x89c] ss:$8 sps:$4 sm:$0xff]  }
 0x20c   : > { %3813 = vmatprep.subr.bf16.mxu0 %v6861_v44  ;;  %v6361_v44 = vadd.f32 %v8025_v23, %v8005_v13  ;;  %v6911_v13 = vld [vmem:[%s9047_s3 + $0x9d0] ss:$8 sps:$4 sm:$0xff]  }
 0x20d   : > { %3367 = vmatpush1.bf16.msra.mxu1 %v6856_v45  ;;  %v6913_v45 = vld [vmem:[%s9047_s3 + $0x9d4] ss:$8 sps:$4 sm:$0xff]  }
 0x20e   : > { %3368 = vmatprep.subr.bf16.mxu1 %v6864_v46  ;;  %v339_v46 = vpop.permute.xlu1 %338  ;;  %v6065_v23 = vld [vmem:[%s9047_s3 + $0x9b8] sm:$0x33] }
 0x20f   : > { %3814 = vmatpush1.bf16.msra.mxu0 %v6859_v47  ;;  %v6908_v47 = vld [vmem:[%s9047_s3 + $0x898] ss:$8 sps:$4 sm:$0xff]  }
 0x210   : > { %3815 = vmatprep.subr.bf16.mxu0 %v6867_v60  ;;  %v6916_v60 = vld [vmem:[%s9047_s3 + $0x88c] ss:$8 sps:$4 sm:$0xff]  }
 0x211   : > { %3369 = vmatpush1.bf16.msra.mxu1 %v6862_v48  ;;  %v423_v48 = vadd.f32 %v6361_v44, %v339_v46  ;;  %v6954_v44 = vld [vmem:[%s9047_s3 + $0x958] ss:$8 sps:$4 sm:$0xff]  }
 0x212   : > { %3370 = vmatprep.subr.bf16.mxu1 %v6870_v49  ;;  %v6919_v49 = vld [vmem:[%s9047_s3 + $0x9c4] ss:$8 sps:$4 sm:$0xff]  }
 0x213   : > { %3816 = vmatpush1.bf16.msra.mxu0 %v6865_v50  ;;  %v6914_v50 = vld [vmem:[%s9047_s3 + $0x888] ss:$8 sps:$4 sm:$0xff]   ;;  %v429_v12 = vmax.f32 %v423_v48, 0.0 }
 0x214   : > { %3817 = vmatprep.subr.bf16.mxu0 %v6873_v51  ;;  %v6152_v51 = vld [vmem:[%s9047_s3 + $0xaf0] sm:$0x33] }
 0x215   : > { %3371 = vmatpush1.bf16.msra.mxu1 %v6868_v52  ;;  %v6079_v52 = vcombine.high %v6065_v23, %v6065_v23  ;;  %v6165_v57 = vcombine.low %v6152_v51, %v6152_v51 }
 0x216   : > { %3372 = vmatprep.subr.bf16.mxu1 %v6876_v53  ;;  %v6078_v53 = vcombine.low %v6065_v23, %v6065_v23 }
 0x217   : > { %3818 = vmatpush1.bf16.msra.mxu0 %v6871_v54  ;;  %v6917_v54 = vld [vmem:[%s9047_s3 + $0x9c0] ss:$8 sps:$4 sm:$0xff]  }
 0x218   : > { %v1302_v63 = vpop.f32.mrf.mxu1  ;;  %3819 = vmatprep.subr.bf16.mxu0 %v6879_v55 }
 0x219   : > { %3373 = vmatpush1.bf16.msra.mxu1 %v6874_v56  ;;  %v6166_v56 = vcombine.high %v6152_v51, %v6152_v51  ;;  %v3879_v51 = vrot.slane %v8251_v17, 3 }
 0x21a   : > { %v1304_v3 = vpop.f32.mrf.mxu1  ;;  %v8355_v5 = vpop.f32.mrf.mxu0  ;;  %6022 = vmatprep.subr.msk.bf16.mxu1 %vm514_vm0, %v6021_v58 }
 0x21b   : > { %v1311_v9 = vcombine.low %v1302_v63, %v1304_v3  ;;  %3820 = vmatpush1.bf16.msra.mxu0 %v6877_v61  ;;  %v3581_v61 = vrot.slane %v8251_v17, 2  ;;  %v3949_v63 = vsel %vm514_vm0, %v6078_v53, 0  ;;  %v8469_v3 = vpack.c.bf16 %v429_v12, %v429_v12  ;;  %v6966_v53 = vld [vmem:[%s9047_s3 + $0xa7c] ss:$8 sps:$4 sm:$0xff]  }
 0x21c   : > { %v1306_v10 = vpop.f32.mrf.mxu1  ;;  %v8363_v11 = vpop.f32.mrf.mxu0  ;;  %5965 = vmatmul.mubr.msk.bf16.vlgmr.msra.gmra.mxu1 %vm510_vm1, %v3283_v6  ;;  %6109 = vmatprep.subr.msk.bf16.mxu0 %vm514_vm0, %v6108_v0  ;;  %v6926_v0 = vld [vmem:[%s9047_s3 + $0x9ac] ss:$8 sps:$4 sm:$0xff]  }
 0x21d   : > { %v1318_v22 = vrot.slane %v1311_v9, %v8117_v4  ;;  %v1758_v25 = vcombine.low %v8355_v5, %v8363_v11  ;;  %3659 = vmatpush1.bf16.msra.mxu1 %v3651_v7  ;;  %3688 = vmatprep.mubr.bf16.mxu1 %v7142_v1  ;;  %v6929_v9 = vld [vmem:[%s9047_s3 + $0xae4] ss:$8 sps:$4 sm:$0xff]  }
 0x21e   : > { %v1307_v27 = vpop.f32.mrf.mxu1  ;;  %v1753_v28 = vpop.f32.mrf.mxu0  ;;  %6052 = vmatmul.mubr.msk.bf16.vlgmr.msra.gmra.mxu0 %vm510_vm1, %v3730_v14  ;;  %3660 = vmatprep.subr.bf16.mxu1 %v6886_v8  ;;  %v4398_v8 = vsel %vm514_vm0, %v6165_v57, 0  ;;  %v6932_v5 = vld [vmem:[%s9047_s3 + $0x99c] ss:$8 sps:$4 sm:$0xff]  }
 0x21f   : > { %v1325_v24 = vrot.slane %v1318_v22, %v8117_v4  ;;  %4106 = vmatpush1.bf16.msra.mxu0 %v4098_v18  ;;  %4135 = vmatprep.mubr.bf16.mxu0 %v7142_v1  ;;  %v1765_v10 = vrot.slane %v1758_v25, %v8117_v4  ;;  %v6927_v25 = vld [vmem:[%s9047_s3 + $0xae0] ss:$8 sps:$4 sm:$0xff]   ;;  %v6935_v27 = vld [vmem:[%s9047_s3 + $0xad4] ss:$8 sps:$4 sm:$0xff]  }
 0x220   : > { %v1754_v30 = vpop.f32.mrf.mxu0  ;;  %4107 = vmatprep.subr.bf16.mxu0 %v6889_v19  ;;  %v6924_v19 = vld [vmem:[%s9047_s3 + $0x9a8] ss:$8 sps:$4 sm:$0xff]   ;;  %v6969_v57 = vld [vmem:[%s9047_s3 + $0xbb4] ss:$8 sps:$4 sm:$0xff]  }
 0x221   : > { %v1327_v35 = vadd.f32 %v1325_v24, %v8302_v43  ;;  %3661 = vmatpush1.bf16.msra.mxu1 %v6884_v31  ;;  %v6905_v43 = vld [vmem:[%s9047_s3 + $0x9e0] ss:$8 sps:$4 sm:$0xff]   ;;  %v1772_v28 = vrot.slane %v1765_v10, %v8117_v4  ;;  %v6933_v30 = vld [vmem:[%s9047_s3 + $0xad0] ss:$8 sps:$4 sm:$0xff]   ;;  %v6975_v10 = vld [vmem:[%s9047_s3 + $0xba4] ss:$8 sps:$4 sm:$0xff]  }
 0x222   : > { %3662 = vmatprep.subr.bf16.mxu1 %v6892_v16  ;;  %v6930_v24 = vld [vmem:[%s9047_s3 + $0x998] ss:$8 sps:$4 sm:$0xff]  }
 0x223   : > { %4108 = vmatpush1.bf16.msra.mxu0 %v6887_v29  ;;  %v8406_v37 = vadd.f32 %v1474_v34, %v1327_v35  ;;  %v6938_v29 = vld [vmem:[%s9047_s3 + $0x98c] ss:$8 sps:$4 sm:$0xff]   ;;  %v6936_v35 = vld [vmem:[%s9047_s3 + $0x988] ss:$8 sps:$4 sm:$0xff]  }
 0x224   : > { %4109 = vmatprep.subr.bf16.mxu0 %v6895_v32  ;;  %v6941_v34 = vld [vmem:[%s9047_s3 + $0xac4] ss:$8 sps:$4 sm:$0xff]  }
 0x225   : > { %3663 = vmatpush1.bf16.msra.mxu1 %v6890_v36  ;;  %v6944_v36 = vld [vmem:[%s9047_s3 + $0x97c] ss:$8 sps:$4 sm:$0xff]  }
 0x226   : > { %3664 = vmatprep.subr.bf16.mxu1 %v6898_v21  ;;  %v6939_v21 = vld [vmem:[%s9047_s3 + $0xac0] ss:$8 sps:$4 sm:$0xff]  }
 0x227   : > { %4110 = vmatpush1.bf16.msra.mxu0 %v6893_v15  ;;  %v6947_v15 = vld [vmem:[%s9047_s3 + $0xab4] ss:$8 sps:$4 sm:$0xff]  }
 0x228   : > { %4111 = vmatprep.subr.bf16.mxu0 %v6901_v38  ;;  %v6950_v38 = vld [vmem:[%s9047_s3 + $0x96c] ss:$8 sps:$4 sm:$0xff]  }
 0x229   : > { %3665 = vmatpush1.bf16.msra.mxu1 %v6896_v39  ;;  %v6945_v39 = vld [vmem:[%s9047_s3 + $0xab0] ss:$8 sps:$4 sm:$0xff]  }
 0x22a   : > { %3666 = vmatprep.subr.bf16.mxu1 %v6904_v40  ;;  %v6953_v40 = vld [vmem:[%s9047_s3 + $0xaa4] ss:$8 sps:$4 sm:$0xff]  }
 0x22b   : > { %4112 = vmatpush1.bf16.msra.mxu0 %v6899_v42  ;;  %v6948_v42 = vld [vmem:[%s9047_s3 + $0x968] ss:$8 sps:$4 sm:$0xff]  }
 0x22c   : > { %4113 = vmatprep.subr.bf16.mxu0 %v6907_v33  ;;  %v6956_v33 = vld [vmem:[%s9047_s3 + $0x95c] ss:$8 sps:$4 sm:$0xff]  }
 0x22d   : > { %3667 = vmatpush1.bf16.msra.mxu1 %v6902_v26  ;;  %v6951_v26 = vld [vmem:[%s9047_s3 + $0xaa0] ss:$8 sps:$4 sm:$0xff]  }
 0x22e   : > { %3668 = vmatprep.subr.bf16.mxu1 %v6910_v41  ;;  %v6123_v41 = vld [vmem:[%s9047_s3 + $0xa88] sm:$0x33] }
 0x22f   : > { %4114 = vmatpush1.bf16.msra.mxu0 %v6905_v43  ;;  %v6959_v43 = vld [vmem:[%s9047_s3 + $0xa94] ss:$8 sps:$4 sm:$0xff]   ;;  %v6137_v46 = vcombine.high %v6123_v41, %v6123_v41 }
 0x230   : > { %4115 = vmatprep.subr.bf16.mxu0 %v6913_v45  ;;  %v6210_v45 = vld [vmem:[%s9047_s3 + $0xbc0] sm:$0x33] }
 0x231   : > { %3669 = vmatpush1.bf16.msra.mxu1 %v6908_v47  ;;  %v6136_v47 = vcombine.low %v6123_v41, %v6123_v41  ;;  %v6224_v23 = vcombine.high %v6210_v45, %v6210_v45  ;;  %v6223_v48 = vcombine.low %v6210_v45, %v6210_v45 }
 0x232   : > { %3670 = vmatprep.subr.bf16.mxu1 %v6916_v60  ;;  %v6957_v60 = vld [vmem:[%s9047_s3 + $0xa90] ss:$8 sps:$4 sm:$0xff]  }
 0x233   : > { %4116 = vmatpush1.bf16.msra.mxu0 %v6911_v13  ;;  %v4696_v17 = vsel %vm514_vm0, %v6223_v48, 0 }
 0x234   : > { %v1600_v55 = vpop.f32.mrf.mxu1  ;;  %4117 = vmatprep.subr.bf16.mxu0 %v6919_v49 }
 0x235   : > { %3671 = vmatpush1.bf16.msra.mxu1 %v6914_v50 }
 0x236   : > { %v1602_v58 = vpop.f32.mrf.mxu1  ;;  %v8461_v59 = vpop.f32.mrf.mxu0  ;;  %6080 = vmatprep.subr.msk.bf16.mxu1 %vm514_vm0, %v6079_v52  ;;  %v4248_v52 = vsel %vm514_vm0, %v6136_v47, 0 }
 0x237   : > { %v1609_v2 = vcombine.low %v1600_v55, %v1602_v58  ;;  %4118 = vmatpush1.bf16.msra.mxu0 %v6917_v54 }
 0x238   : > { %v1604_v6 = vpop.f32.mrf.mxu1  ;;  %v8471_v7 = vpop.f32.mrf.mxu0  ;;  %6023 = vmatmul.mubr.msk.bf16.vlgmr.msra.gmra.mxu1 %vm510_vm1, %v3581_v61  ;;  %6167 = vmatprep.subr.msk.bf16.mxu0 %vm514_vm0, %v6166_v56  ;;  %v4328_v56 = vrot.slane %v8469_v3, 1 }
 0x239   : > { %v1616_v14 = vrot.slane %v1609_v2, %v8117_v4  ;;  %v2058_v18 = vcombine.low %v8461_v59, %v8471_v7  ;;  %3957 = vmatpush1.bf16.msra.mxu1 %v3949_v63  ;;  %3986 = vmatprep.mubr.bf16.mxu1 %v7142_v1  ;;  %v6972_v59 = vld [vmem:[%s9047_s3 + $0xa6c] ss:$8 sps:$4 sm:$0xff]  }
 0x23a   : > { %v1605_v20 = vpop.f32.mrf.mxu1  ;;  %v2053_v22 = vpop.f32.mrf.mxu0  ;;  %6110 = vmatmul.mubr.msk.bf16.vlgmr.msra.gmra.mxu0 %vm510_vm1, %v8469_v3  ;;  %3958 = vmatprep.subr.bf16.mxu1 %v6926_v0  ;;  %v6964_v0 = vld [vmem:[%s9047_s3 + $0xa78] ss:$8 sps:$4 sm:$0xff]  }
 0x23b   : > { %v1623_v11 = vrot.slane %v1616_v14, %v8117_v4  ;;  %4406 = vmatpush1.bf16.msra.mxu0 %v4398_v8  ;;  %4435 = vmatprep.mubr.bf16.mxu0 %v7142_v1  ;;  %v2065_v58 = vrot.slane %v2058_v18, %v8117_v4  ;;  %v6967_v8 = vld [vmem:[%s9047_s3 + $0xbb0] ss:$8 sps:$4 sm:$0xff]   ;;  %v6978_v20 = vld [vmem:[%s9047_s3 + $0xa5c] ss:$8 sps:$4 sm:$0xff]   ;;  %v6973_v22 = vld [vmem:[%s9047_s3 + $0xba0] ss:$8 sps:$4 sm:$0xff]  }
 0x23c   : > { %v2054_v31 = vpop.f32.mrf.mxu0  ;;  %4407 = vmatprep.subr.bf16.mxu0 %v6929_v9 }
 0x23d   : > { %v1625_v16 = vadd.f32 %v1623_v11, %v8406_v37  ;;  %3959 = vmatpush1.bf16.msra.mxu1 %v6924_v19  ;;  %v6942_v37 = vld [vmem:[%s9047_s3 + $0x978] ss:$8 sps:$4 sm:$0xff]   ;;  %v2072_v14 = vrot.slane %v2065_v58, %v8117_v4  ;;  %v6970_v19 = vld [vmem:[%s9047_s3 + $0xa68] ss:$8 sps:$4 sm:$0xff]   ;;  %v6981_v11 = vld [vmem:[%s9047_s3 + $0xb94] ss:$8 sps:$4 sm:$0xff]  }
 0x23e   : > { %3960 = vmatprep.subr.bf16.mxu1 %v6932_v5  ;;  %v6984_v31 = vld [vmem:[%s9047_s3 + $0xa4c] ss:$8 sps:$4 sm:$0xff]  }
 0x23f   : > { %4408 = vmatpush1.bf16.msra.mxu0 %v6927_v25  ;;  %v8514_v32 = vadd.f32 %v1772_v28, %v1625_v16  ;;  %v6976_v25 = vld [vmem:[%s9047_s3 + $0xa58] ss:$8 sps:$4 sm:$0xff]   ;;  %v6987_v28 = vld [vmem:[%s9047_s3 + $0xb84] ss:$8 sps:$4 sm:$0xff]   ;;  %v6982_v16 = vld [vmem:[%s9047_s3 + $0xa48] ss:$8 sps:$4 sm:$0xff]  }
 0x240   : > { %4409 = vmatprep.subr.bf16.mxu0 %v6935_v27  ;;  %v6979_v27 = vld [vmem:[%s9047_s3 + $0xb90] ss:$8 sps:$4 sm:$0xff]   ;;  %v7015_v58 = vld [vmem:[%s9047_s3 + $0xc74] ss:$8 sps:$4 sm:$0xff]  }
 0x241   : > { %3961 = vmatpush1.bf16.msra.mxu1 %v6930_v24  ;;  %v6990_v24 = vld [vmem:[%s9047_s3 + $0xa3c] ss:$8 sps:$4 sm:$0xff]  }
 0x242   : > { %3962 = vmatprep.subr.bf16.mxu1 %v6938_v29  ;;  %v6985_v29 = vld [vmem:[%s9047_s3 + $0xb80] ss:$8 sps:$4 sm:$0xff]  }
 0x243   : > { %4410 = vmatpush1.bf16.msra.mxu0 %v6933_v30  ;;  %v6993_v30 = vld [vmem:[%s9047_s3 + $0xb74] ss:$8 sps:$4 sm:$0xff]  }
 0x244   : > { %4411 = vmatprep.subr.bf16.mxu0 %v6941_v34  ;;  %v6996_v34 = vld [vmem:[%s9047_s3 + $0xa2c] ss:$8 sps:$4 sm:$0xff]  }
 0x245   : > { %3963 = vmatpush1.bf16.msra.mxu1 %v6936_v35  ;;  %v6991_v35 = vld [vmem:[%s9047_s3 + $0xb70] ss:$8 sps:$4 sm:$0xff]  }
 0x246   : > { %3964 = vmatprep.subr.bf16.mxu1 %v6944_v36  ;;  %v6181_v36 = vld [vmem:[%s9047_s3 + $0xb58] sm:$0x33] }
 0x247   : > { %4412 = vmatpush1.bf16.msra.mxu0 %v6939_v21  ;;  %v6999_v21 = vld [vmem:[%s9047_s3 + $0xb64] ss:$8 sps:$4 sm:$0xff]  }
 0x248   : > { %4413 = vmatprep.subr.bf16.mxu0 %v6947_v15  ;;  %v6994_v15 = vld [vmem:[%s9047_s3 + $0xa28] ss:$8 sps:$4 sm:$0xff]  }
 0x249   : > { %3965 = vmatpush1.bf16.msra.mxu1 %v6942_v37  ;;  %v6268_v37 = vld [vmem:[%s9047_s3 + $0xc90] sm:$0x33] }
 0x24a   : > { %3966 = vmatprep.subr.bf16.mxu1 %v6950_v38  ;;  %v6195_v38 = vcombine.high %v6181_v36, %v6181_v36 }
 0x24b   : > { %4414 = vmatpush1.bf16.msra.mxu0 %v6945_v39  ;;  %v6194_v39 = vcombine.low %v6181_v36, %v6181_v36  ;;  %v7044_v36 = vld [vmem:[%s9047_s3 + $0xc1c] ss:$8 sps:$4 sm:$0xff]  }
 0x24c   : > { %4415 = vmatprep.subr.bf16.mxu0 %v6953_v40  ;;  %v6997_v40 = vld [vmem:[%s9047_s3 + $0xb60] ss:$8 sps:$4 sm:$0xff]  }
 0x24d   : > { %3967 = vmatpush1.bf16.msra.mxu1 %v6948_v42  ;;  %v4547_v45 = vsel %vm514_vm0, %v6194_v39, 0 }
 0x24e   : > { %3968 = vmatprep.subr.bf16.mxu1 %v6956_v33  ;;  %v6282_v33 = vcombine.high %v6268_v37, %v6268_v37 }
 0x24f   : > { %4416 = vmatpush1.bf16.msra.mxu0 %v6951_v26  ;;  %v6281_v26 = vcombine.low %v6268_v37, %v6268_v37 }
 0x250   : > { %v1899_v13 = vpop.f32.mrf.mxu1  ;;  %4417 = vmatprep.subr.bf16.mxu0 %v6959_v43 }
 0x251   : > { %3969 = vmatpush1.bf16.msra.mxu1 %v6954_v44  ;;  %v8674_v44 = vshrl.u32 %v8469_v3, 16  ;;  %v4994_v48 = vsel %vm514_vm0, %v6281_v26, 0 }
 0x252   : > { %v1901_v49 = vpop.f32.mrf.mxu1  ;;  %v8567_v50 = vpop.f32.mrf.mxu0  ;;  %6138 = vmatprep.subr.msk.bf16.mxu1 %vm514_vm0, %v6137_v46  ;;  %v7006_v46 = vld [vmem:[%s9047_s3 + $0xb4c] ss:$8 sps:$4 sm:$0xff]  }
 0x253   : > { %v1908_v54 = vcombine.low %v1899_v13, %v1901_v49  ;;  %4418 = vmatpush1.bf16.msra.mxu0 %v6957_v60  ;;  %v7009_v49 = vld [vmem:[%s9047_s3 + $0xc84] ss:$8 sps:$4 sm:$0xff]  }
 0x254   : > { %v1903_v12 = vpop.f32.mrf.mxu1  ;;  %v8575_v55 = vpop.f32.mrf.mxu0  ;;  %6081 = vmatmul.mubr.msk.bf16.vlgmr.msra.gmra.mxu1 %vm510_vm1, %v3879_v51  ;;  %6225 = vmatprep.subr.msk.bf16.mxu0 %vm514_vm0, %v6224_v23  ;;  %v4626_v23 = vrot.slane %v8469_v3, 2 }
 0x255   : > { %v1915_v61 = vrot.slane %v1908_v54, %v8117_v4  ;;  %v2356_v63 = vcombine.low %v8567_v50, %v8575_v55  ;;  %4256 = vmatpush1.bf16.msra.mxu1 %v4248_v52  ;;  %4285 = vmatprep.mubr.bf16.mxu1 %v7142_v1  ;;  %v7004_v54 = vld [vmem:[%s9047_s3 + $0xb48] ss:$8 sps:$4 sm:$0xff]   ;;  %v7012_v50 = vld [vmem:[%s9047_s3 + $0xb3c] ss:$8 sps:$4 sm:$0xff]  }
 0x256   : > { %v1904_v2 = vpop.f32.mrf.mxu1  ;;  %v2351_v6 = vpop.f32.mrf.mxu0  ;;  %6168 = vmatmul.mubr.msk.bf16.vlgmr.msra.gmra.mxu0 %vm510_vm1, %v4328_v56  ;;  %4257 = vmatprep.subr.bf16.mxu1 %v6966_v53 }
 0x257   : > { %v1922_v7 = vrot.slane %v1915_v61, %v8117_v4  ;;  %4704 = vmatpush1.bf16.msra.mxu0 %v4696_v17  ;;  %4733 = vmatprep.mubr.bf16.mxu0 %v7142_v1  ;;  %v2363_v51 = vrot.slane %v2356_v63, %v8117_v4  ;;  %v7007_v17 = vld [vmem:[%s9047_s3 + $0xc80] ss:$8 sps:$4 sm:$0xff]   ;;  %v7018_v2 = vld [vmem:[%s9047_s3 + $0xb2c] ss:$8 sps:$4 sm:$0xff]   ;;  %v7013_v6 = vld [vmem:[%s9047_s3 + $0xc70] ss:$8 sps:$4 sm:$0xff]  }
 0x258   : > { %v2352_v9 = vpop.f32.mrf.mxu0  ;;  %4705 = vmatprep.subr.bf16.mxu0 %v6969_v57 }
 0x259   : > { %v1924_v18 = vadd.f32 %v1922_v7, %v8514_v32  ;;  %4258 = vmatpush1.bf16.msra.mxu1 %v6964_v0  ;;  %v6988_v32 = vld [vmem:[%s9047_s3 + $0xa38] ss:$8 sps:$4 sm:$0xff]   ;;  %v2370_v61 = vrot.slane %v2363_v51, %v8117_v4  ;;  %v7021_v7 = vld [vmem:[%s9047_s3 + $0xc64] ss:$8 sps:$4 sm:$0xff]  }
 0x25a   : > { %4259 = vmatprep.subr.bf16.mxu1 %v6972_v59  ;;  %v7010_v0 = vld [vmem:[%s9047_s3 + $0xb38] ss:$8 sps:$4 sm:$0xff]   ;;  %v7024_v9 = vld [vmem:[%s9047_s3 + $0xb1c] ss:$8 sps:$4 sm:$0xff]   ;;  %v7053_v51 = vld [vmem:[%s9047_s3 + $0xbec] ss:$8 sps:$4 sm:$0xff]  }
 0x25b   : > { %4706 = vmatpush1.bf16.msra.mxu0 %v6967_v8  ;;  %v8618_v5 = vadd.f32 %v2072_v14, %v1924_v18  ;;  %v7016_v8 = vld [vmem:[%s9047_s3 + $0xb28] ss:$8 sps:$4 sm:$0xff]   ;;  %v7027_v14 = vld [vmem:[%s9047_s3 + $0xc54] ss:$8 sps:$4 sm:$0xff]   ;;  %v7022_v18 = vld [vmem:[%s9047_s3 + $0xb18] ss:$8 sps:$4 sm:$0xff]  }
 0x25c   : > { %4707 = vmatprep.subr.bf16.mxu0 %v6975_v10  ;;  %v7019_v10 = vld [vmem:[%s9047_s3 + $0xc60] ss:$8 sps:$4 sm:$0xff]  }
 0x25d   : > { %4260 = vmatpush1.bf16.msra.mxu1 %v6970_v19  ;;  %v7030_v19 = vld [vmem:[%s9047_s3 + $0xb0c] ss:$8 sps:$4 sm:$0xff]  }
 0x25e   : > { %4261 = vmatprep.subr.bf16.mxu1 %v6978_v20  ;;  %v7025_v20 = vld [vmem:[%s9047_s3 + $0xc50] ss:$8 sps:$4 sm:$0xff]  }
 0x25f   : > { %4708 = vmatpush1.bf16.msra.mxu0 %v6973_v22  ;;  %v7033_v22 = vld [vmem:[%s9047_s3 + $0xc44] ss:$8 sps:$4 sm:$0xff]  }
 0x260   : > { %4709 = vmatprep.subr.bf16.mxu0 %v6981_v11  ;;  %v7036_v11 = vld [vmem:[%s9047_s3 + $0xafc] ss:$8 sps:$4 sm:$0xff]  }
 0x261   : > { %4262 = vmatpush1.bf16.msra.mxu1 %v6976_v25  ;;  %v7031_v25 = vld [vmem:[%s9047_s3 + $0xc40] ss:$8 sps:$4 sm:$0xff]  }
 0x262   : > { %4263 = vmatprep.subr.bf16.mxu1 %v6984_v31  ;;  %v6239_v31 = vld [vmem:[%s9047_s3 + $0xc28] sm:$0x33] }
 0x263   : > { %4710 = vmatpush1.bf16.msra.mxu0 %v6979_v27  ;;  %v7039_v27 = vld [vmem:[%s9047_s3 + $0xc34] ss:$8 sps:$4 sm:$0xff]  }
 0x264   : > { %4711 = vmatprep.subr.bf16.mxu0 %v6987_v28  ;;  %v7034_v28 = vld [vmem:[%s9047_s3 + $0xaf8] ss:$8 sps:$4 sm:$0xff]  }
 0x265   : > { %4264 = vmatpush1.bf16.msra.mxu1 %v6982_v16  ;;  %v6253_v16 = vcombine.high %v6239_v31, %v6239_v31 }
 0x266   : > { %4265 = vmatprep.subr.bf16.mxu1 %v6990_v24  ;;  %v6252_v24 = vcombine.low %v6239_v31, %v6239_v31  ;;  %v7065_v31 = vld [vmem:[%s9047_s3 + $0xcd8] ss:$8 sps:$4 sm:$0xff]  }
 0x267   : > { %4712 = vmatpush1.bf16.msra.mxu0 %v6985_v29  ;;  %v7037_v29 = vld [vmem:[%s9047_s3 + $0xc30] ss:$8 sps:$4 sm:$0xff]  }
 0x268   : > { %4713 = vmatprep.subr.bf16.mxu0 %v6993_v30 }
 0x269   : > { %4266 = vmatpush1.bf16.msra.mxu1 %v6988_v32 }
 0x26a   : > { %4267 = vmatprep.subr.bf16.mxu1 %v6996_v34  ;;  %v4477_v34 = vrot.slane %v8674_v44, 1 }
 0x26b   : > { %4714 = vmatpush1.bf16.msra.mxu0 %v6991_v35  ;;  %v4845_v35 = vsel %vm514_vm0, %v6252_v24, 0  ;;  %v7071_v24 = vld [vmem:[%s9047_s3 + $0xcb8] ss:$8 sps:$4 sm:$0xff]  }
 0x26c   : > { %v2198_v42 = vpop.f32.mrf.mxu1  ;;  %4715 = vmatprep.subr.bf16.mxu0 %v6999_v21 }
 0x26d   : > { %4268 = vmatpush1.bf16.msra.mxu1 %v6994_v15 }
 0x26e   : > { %v2200_v41 = vpop.f32.mrf.mxu1  ;;  %v8671_v43 = vpop.f32.mrf.mxu0  ;;  %6196 = vmatprep.subr.msk.bf16.mxu1 %vm514_vm0, %v6195_v38  ;;  %v4924_v38 = vrot.slane %v8469_v3, 3  ;;  %v7047_v3 = vld [vmem:[%s9047_s3 + $0xc0c] ss:$8 sps:$4 sm:$0xff]  }
 0x26f   : > { %v2207_v47 = vcombine.low %v2198_v42, %v2200_v41  ;;  %4716 = vmatpush1.bf16.msra.mxu0 %v6997_v40 }
 0x270   : > { %v2202_v60 = vpop.f32.mrf.mxu1  ;;  %v8681_v13 = vpop.f32.mrf.mxu0  ;;  %6139 = vmatmul.mubr.msk.bf16.vlgmr.msra.gmra.mxu1 %vm510_vm1, %v8674_v44  ;;  %6283 = vmatprep.subr.msk.bf16.mxu0 %vm514_vm0, %v6282_v33  ;;  %v7042_v33 = vld [vmem:[%s9047_s3 + $0xc18] ss:$8 sps:$4 sm:$0xff]  }
 0x271   : > { %v2214_v52 = vrot.slane %v2207_v47, %v8117_v4  ;;  %v2654_v53 = vcombine.low %v8671_v43, %v8681_v13  ;;  %4555 = vmatpush1.bf16.msra.mxu1 %v4547_v45  ;;  %4584 = vmatprep.mubr.bf16.mxu1 %v7142_v1  ;;  %v7045_v13 = vld [vmem:[%s9047_s3 + $0xc08] ss:$8 sps:$4 sm:$0xff]  }
 0x272   : > { %v2203_v12 = vpop.f32.mrf.mxu1  ;;  %v2649_v56 = vpop.f32.mrf.mxu0  ;;  %6226 = vmatmul.mubr.msk.bf16.vlgmr.msra.gmra.mxu0 %vm510_vm1, %v4626_v23  ;;  %4556 = vmatprep.subr.bf16.mxu1 %v7006_v46  ;;  %v7050_v23 = vld [vmem:[%s9047_s3 + $0xbfc] ss:$8 sps:$4 sm:$0xff]  }
 0x273   : > { %v2221_v55 = vrot.slane %v2214_v52, %v8117_v4  ;;  %5002 = vmatpush1.bf16.msra.mxu0 %v4994_v48  ;;  %5031 = vmatprep.mubr.bf16.mxu0 %v7142_v1  ;;  %v2661_v40 = vrot.slane %v2654_v53, %v8117_v4  ;;  %v7051_v52 = vld [vmem:[%s9047_s3 + $0xbe8] ss:$8 sps:$4 sm:$0xff]   ;;  %v7056_v53 = vld [vmem:[%s9047_s3 + $0xbdc] ss:$8 sps:$4 sm:$0xff]   ;;  %v7059_v12 = vld [vmem:[%s9047_s3 + $0xbcc] ss:$8 sps:$4 sm:$0xff]  }
 0x274   : > { %v2650_v57 = vpop.f32.mrf.mxu0  ;;  %5003 = vmatprep.subr.bf16.mxu0 %v7009_v49  ;;  %v7048_v49 = vld [vmem:[%s9047_s3 + $0xbf8] ss:$8 sps:$4 sm:$0xff]  }
 0x275   : > { %v2223_v63 = vadd.f32 %v2221_v55, %v8618_v5  ;;  %4557 = vmatpush1.bf16.msra.mxu1 %v7004_v54  ;;  %v7028_v5 = vld [vmem:[%s9047_s3 + $0xb08] ss:$8 sps:$4 sm:$0xff]   ;;  %v2668_v47 = vrot.slane %v2661_v40, %v8117_v4  ;;  %v7054_v54 = vld [vmem:[%s9047_s3 + $0xbd8] ss:$8 sps:$4 sm:$0xff]  }
 0x276   : > { %4558 = vmatprep.subr.bf16.mxu1 %v7012_v50  ;;  %v6297_v56 = vld [vmem:[%s9047_s3 + $0xcf8] sm:$0x33]  ;;  %v7057_v50 = vld [vmem:[%s9047_s3 + $0xbc8] ss:$8 sps:$4 sm:$0xff]  }
 0x277   : > { %5004 = vmatpush1.bf16.msra.mxu0 %v7007_v17  ;;  %v8725_v59 = vadd.f32 %v2370_v61, %v2223_v63  ;;  %v6311_v55 = vcombine.high %v6297_v56, %v6297_v56  ;;  %v6310_v17 = vcombine.low %v6297_v56, %v6297_v56  ;;  %v4775_v61 = vrot.slane %v8674_v44, 2 }
 0x278   : > { %5005 = vmatprep.subr.bf16.mxu0 %v7015_v58 }
 0x279   : > { %4559 = vmatpush1.bf16.msra.mxu1 %v7010_v0  ;;  %v5143_v63 = vsel %vm514_vm0, %v6310_v17, 0  ;;  %v7064_v0 = vld [vmem:[%s9047_s3 + $0xcec] ss:$8 sps:$4 sm:$0xff]  }
 0x27a   : > { %4560 = vmatprep.subr.bf16.mxu1 %v7018_v2 }
 0x27b   : > { %5006 = vmatpush1.bf16.msra.mxu0 %v7013_v6 }
 0x27c   : > { %5007 = vmatprep.subr.bf16.mxu0 %v7021_v7 }
 0x27d   : > { %4561 = vmatpush1.bf16.msra.mxu1 %v7016_v8 }
 0x27e   : > { %4562 = vmatprep.subr.bf16.mxu1 %v7024_v9 }
 0x27f   : > { %5008 = vmatpush1.bf16.msra.mxu0 %v7019_v10  ;;  %v7062_v10 = vld [vmem:[%s9047_s3 + $0xce8] ss:$8 sps:$4 sm:$0xff]  }
 0x280   : > { %5009 = vmatprep.subr.bf16.mxu0 %v7027_v14 }
 0x281   : > { %4563 = vmatpush1.bf16.msra.mxu1 %v7022_v18 }
 0x282   : > { %4564 = vmatprep.subr.bf16.mxu1 %v7030_v19  ;;  %v7067_v19 = vld [vmem:[%s9047_s3 + $0xcdc] ss:$8 sps:$4 sm:$0xff]  }
 0x283   : > { %5010 = vmatpush1.bf16.msra.mxu0 %v7025_v20 }
 0x284   : > { %5011 = vmatprep.subr.bf16.mxu0 %v7033_v22 }
 0x285   : > { %4565 = vmatpush1.bf16.msra.mxu1 %v7028_v5 }
 0x286   : > { %4566 = vmatprep.subr.bf16.mxu1 %v7036_v11 }
 0x287   : > { %5012 = vmatpush1.bf16.msra.mxu0 %v7031_v25 }
 0x288   : > { %v2496_v30 = vpop.f32.mrf.mxu1  ;;  %5013 = vmatprep.subr.bf16.mxu0 %v7039_v27 }
 0x289   : > { %4567 = vmatpush1.bf16.msra.mxu1 %v7034_v28  ;;  %v7068_v28 = vld [vmem:[%s9047_s3 + $0xcc8] ss:$8 sps:$4 sm:$0xff]  }
 0x28a   : > { %v2498_v32 = vpop.f32.mrf.mxu1  ;;  %6254 = vmatprep.subr.msk.bf16.mxu1 %vm514_vm0, %v6253_v16  ;;  %v2943_v21 = vpop.f32.mrf.mxu0  ;;  %v7073_v16 = vld [vmem:[%s9047_s3 + $0xcbc] ss:$8 sps:$4 sm:$0xff]  }
 0x28b   : > { %v2505_v15 = vcombine.low %v2496_v30, %v2498_v32  ;;  %5014 = vmatpush1.bf16.msra.mxu0 %v7037_v29  ;;  %v7076_v29 = vld [vmem:[%s9047_s3 + $0xcac] ss:$8 sps:$4 sm:$0xff]   ;;  %v7074_v30 = vld [vmem:[%s9047_s3 + $0xca8] ss:$8 sps:$4 sm:$0xff]   ;;  %v7079_v32 = vld [vmem:[%s9047_s3 + $0xc9c] ss:$8 sps:$4 sm:$0xff]  }
 0x28c   : > { %v2500_v37 = vpop.f32.mrf.mxu1  ;;  %6197 = vmatmul.mubr.msk.bf16.vlgmr.msra.gmra.mxu1 %vm510_vm1, %v4477_v34  ;;  %v2945_v39 = vpop.f32.mrf.mxu0  ;;  %v7077_v34 = vld [vmem:[%s9047_s3 + $0xc98] ss:$8 sps:$4 sm:$0xff]  }
 0x28d   : > { %v2512_v42 = vrot.slane %v2505_v15, %v8117_v4  ;;  %4853 = vmatpush1.bf16.msra.mxu1 %v4845_v35  ;;  %4882 = vmatprep.mubr.bf16.mxu1 %v7142_v1  ;;  %v2952_v26 = vcombine.low %v2943_v21, %v2945_v39  ;;  %v5073_v15 = vrot.slane %v8674_v44, 3 }
 0x28e   : > { %v2501_v41 = vpop.f32.mrf.mxu1  ;;  %6284 = vmatmul.mubr.msk.bf16.vlgmr.msra.gmra.mxu0 %vm510_vm1, %v4924_v38  ;;  %4854 = vmatprep.subr.bf16.mxu1 %v7044_v36  ;;  %v2947_v43 = vpop.f32.mrf.mxu0 }
 0x28f   : > { %v2519_v45 = vrot.slane %v2512_v42, %v8117_v4 }
 0x290   : > { %v2948_v46 = vpop.f32.mrf.mxu0 }
 0x291   : > { %v2521_v60 = vadd.f32 %v2519_v45, %v8725_v59  ;;  %4855 = vmatpush1.bf16.msra.mxu1 %v7042_v33  ;;  %v2959_v59 = vrot.slane %v2952_v26, %v8117_v4 }
 0x292   : > { %4856 = vmatprep.subr.bf16.mxu1 %v7047_v3 }
 0x293   : > { %v2670_v48 = vadd.f32 %v2668_v47, %v2521_v60  ;;  %v2966_v5 = vrot.slane %v2959_v59, %v8117_v4  ;;  %v5237_v59 = vld [vmem:[%s9049_s5 + $0xe0] sm:$0xff] }
 0x295   : > { %4857 = vmatpush1.bf16.msra.mxu1 %v7045_v13 }
 0x296   : > { %4858 = vmatprep.subr.bf16.mxu1 %v7050_v23 }
 0x299   : > { %4859 = vmatpush1.bf16.msra.mxu1 %v7048_v49 }
 0x29a   : > { %4860 = vmatprep.subr.bf16.mxu1 %v7053_v51 }
 0x29d   : > { %4861 = vmatpush1.bf16.msra.mxu1 %v7051_v52 }
 0x29e   : > { %4862 = vmatprep.subr.bf16.mxu1 %v7056_v53 }
 0x2a1   : > { %4863 = vmatpush1.bf16.msra.mxu1 %v7054_v54 }
 0x2a2   : > { %4864 = vmatprep.subr.bf16.mxu1 %v7059_v12 }
 0x2a4   : > { %v2794_v57 = vpop.f32.mrf.mxu1 }
 0x2a5   : > { %4865 = vmatpush1.bf16.msra.mxu1 %v7057_v50 }
 0x2a6   : > { %v2796_v58 = vpop.f32.mrf.mxu1  ;;  %6312 = vmatprep.subr.msk.bf16.mxu1 %vm514_vm0, %v6311_v55  ;;  %v3243_v2 = vpop.f32.mrf.mxu0 }
 0x2a7   : > { %v2803_v6 = vcombine.low %v2794_v57, %v2796_v58  ;;  %v5240_v58 = vld [vmem:[%s9049_s5 + $0xf8] sm:$0xff] }
 0x2a8   : > { %v2798_v7 = vpop.f32.mrf.mxu1  ;;  %6255 = vmatmul.mubr.msk.bf16.vlgmr.msra.gmra.mxu1 %vm510_vm1, %v4775_v61  ;;  %v3245_v8 = vpop.f32.mrf.mxu0  ;;  %v5224_v61 = vld [vmem:[%s9049_s5 + $0x78] sm:$0xff]  ;;  %6362 = vmatprep.subr.mxu0 %v5240_v58 }
 0x2a9   : > { %v2810_v9 = vrot.slane %v2803_v6, %v8117_v4  ;;  %5151 = vmatpush1.bf16.msra.mxu1 %v5143_v63  ;;  %v3252_v14 = vcombine.low %v3243_v2, %v3245_v8  ;;  %5180 = vmatprep.mubr.bf16.mxu1 %v7142_v1  ;;  %v7070_v1 = vld [vmem:[%s9047_s3 + $0xccc] ss:$8 sps:$4 sm:$0xff]   ;;  %v5221_v7 = vld [vmem:[%s9049_s5 + $0x60] sm:$0xff]  ;;  %v5236_v8 = vld [vmem:[%s9049_s5 + $0xd8] sm:$0xff] }
 0x2aa   : > { %v2799_v18 = vpop.f32.mrf.mxu1  ;;  %5152 = vmatprep.subr.bf16.mxu1 %v7064_v0  ;;  %v3247_v20 = vpop.f32.mrf.mxu0  ;;  %v5239_v63 = vld [vmem:[%s9049_s5 + $0xf0] sm:$0xff]  ;;  %6363 = vmatpush3.msra.mxu0 %v5224_v61  ;;  %v5238_v2 = vld [vmem:[%s9049_s5 + $0xe8] sm:$0xff] }
 0x2ab   : > { %v2817_v22 = vrot.slane %v2810_v9, %v8117_v4  ;;  %v3259_v40 = vrot.slane %v3252_v14, %v8117_v4  ;;  %v5223_v0 = vld [vmem:[%s9049_s5 + $0x70] sm:$0xff]  ;;  %6364 = vmatprep.subr.mxu0 %v5239_v63  ;;  %v5222_v6 = vld [vmem:[%s9049_s5 + $0x68] sm:$0xff] }
 0x2ac   : > { %v3248_v11 = vpop.f32.mrf.mxu0  ;;  %6365 = vmatpush3.msra.mxu0 %v5223_v0  ;;  %v5235_v14 = vld [vmem:[%s9049_s5 + $0xd0] sm:$0xff] }
 0x2ad   : > { %v2819_v25 = vadd.f32 %v2817_v22, %v2670_v48  ;;  %5153 = vmatpush1.bf16.msra.mxu1 %v7062_v10  ;;  %v3266_v45 = vrot.slane %v3259_v40, %v8117_v4  ;;  %6366 = vmatprep.subr.mxu0 %v5238_v2  ;;  %v5220_v10 = vld [vmem:[%s9049_s5 + $0x58] sm:$0xff]  ;;  %v5219_v20 = vld [vmem:[%s9049_s5 + $0x50] sm:$0xff]  ;;  %v5230_v40 = vld [vmem:[%s9049_s5 + $0xa8] sm:$0xff] }
 0x2ae   : > { %5154 = vmatprep.subr.bf16.mxu1 %v7067_v19  ;;  %6367 = vmatpush3.msra.mxu0 %v5222_v6 }
 0x2af   : > { %v2968_v27 = vadd.f32 %v2966_v5, %v2819_v25  ;;  %6368 = vmatprep.subr.mxu0 %v5237_v59  ;;  %v5234_v5 = vld [vmem:[%s9049_s5 + $0xc8] sm:$0xff] }
 0x2b0   : > { %6369 = vmatpush3.msra.mxu0 %v5221_v7 }
 0x2b1   : > { %5155 = vmatpush1.bf16.msra.mxu1 %v7065_v31  ;;  %6370 = vmatprep.subr.mxu0 %v5236_v8  ;;  %v5218_v31 = vld [vmem:[%s9049_s5 + $0x48] sm:$0xff] }
 0x2b2   : > { %5156 = vmatprep.subr.bf16.mxu1 %v7070_v1  ;;  %6371 = vmatpush3.msra.mxu0 %v5220_v10 }
 0x2b3   : > { %6372 = vmatprep.subr.mxu0 %v5235_v14 }
 0x2b4   : > { %6373 = vmatpush3.msra.mxu0 %v5219_v20 }
 0x2b5   : > { %5157 = vmatpush1.bf16.msra.mxu1 %v7068_v28  ;;  %6374 = vmatprep.subr.mxu0 %v5234_v5 }
 0x2b6   : > { %5158 = vmatprep.subr.bf16.mxu1 %v7073_v16  ;;  %v5233_v16 = vld [vmem:[%s9049_s5 + $0xc0] sm:$0xff]  ;;  %6375 = vmatpush3.msra.mxu0 %v5218_v31 }
 0x2b7   : > { %6376 = vmatprep.subr.mxu0 %v5233_v16 }
 0x2b9   : > { %5159 = vmatpush1.bf16.msra.mxu1 %v7071_v24 }
 0x2ba   : > { %5160 = vmatprep.subr.bf16.mxu1 %v7076_v29 }
 0x2bd   : > { %5161 = vmatpush1.bf16.msra.mxu1 %v7074_v30  ;;  %v5217_v30 = vld [vmem:[%s9049_s5 + $0x40] sm:$0xff] }
 0x2be   : > { %5162 = vmatprep.subr.bf16.mxu1 %v7079_v32  ;;  %6377 = vmatpush3.msra.mxu0 %v5217_v30 }
 0x2c0   : > { %v3093_v35 = vpop.f32.mrf.mxu1 }
 0x2c1   : > { %5163 = vmatpush1.bf16.msra.mxu1 %v7077_v34 }
 0x2c2   : > { %v3095_v36 = vpop.f32.mrf.mxu1  ;;  %v3541_v21 = vpop.f32.mrf.mxu0 }
 0x2c3   : > { %v3102_v37 = vcombine.low %v3093_v35, %v3095_v36 }
 0x2c4   : > { %v3097_v38 = vpop.f32.mrf.mxu1  ;;  %v3543_v39 = vpop.f32.mrf.mxu0  ;;  %6313 = vmatmul.mubr.msk.bf16.vlgmr.msra.gmra.mxu1 %vm510_vm1, %v5073_v15  ;;  %v5232_v15 = vld [vmem:[%s9049_s5 + $0xb8] sm:$0xff] }
 0x2c5   : > { %v3109_v42 = vrot.slane %v3102_v37, %v8117_v4  ;;  %v3550_v33 = vcombine.low %v3541_v21, %v3543_v39  ;;  %6378 = vmatprep.subr.mxu0 %v5232_v15  ;;  %v5216_v37 = vld [vmem:[%s9049_s5 + $0x38] sm:$0xff]  ;;  %v5231_v38 = vld [vmem:[%s9049_s5 + $0xb0] sm:$0xff] }
 0x2c6   : > { %v3098_v26 = vpop.f32.mrf.mxu1  ;;  %v3545_v41 = vpop.f32.mrf.mxu0  ;;  %6379 = vmatpush3.msra.mxu0 %v5216_v37  ;;  %v5215_v39 = vld [vmem:[%s9049_s5 + $0x30] sm:$0xff] }
 0x2c7   : > { %v3116_v3 = vrot.slane %v3109_v42, %v8117_v4  ;;  %v3557_v51 = vrot.slane %v3550_v33, %v8117_v4  ;;  %6380 = vmatprep.subr.mxu0 %v5231_v38  ;;  %v5214_v42 = vld [vmem:[%s9049_s5 + $0x28] sm:$0xff]  ;;  %v5229_v33 = vld [vmem:[%s9049_s5 + $0xa0] sm:$0xff]  ;;  %v5228_v41 = vld [vmem:[%s9049_s5 + $0x98] sm:$0xff] }
 0x2c8   : > { %v3546_v43 = vpop.f32.mrf.mxu0  ;;  %6381 = vmatpush3.msra.mxu0 %v5215_v39  ;;  %v5213_v26 = vld [vmem:[%s9049_s5 + $0x20] sm:$0xff] }
 0x2c9   : > { %v3118_v46 = vadd.f32 %v3116_v3, %v2968_v27  ;;  %v3564_v55 = vrot.slane %v3557_v51, %v8117_v4  ;;  %6382 = vmatprep.subr.mxu0 %v5230_v40  ;;  %v5212_v3 = vld [vmem:[%s9049_s5 + $0x18] sm:$0xff]  ;;  %v5227_v43 = vld [vmem:[%s9049_s5 + $0x90] sm:$0xff] }
 0x2ca   : > { %6383 = vmatpush3.msra.mxu0 %v5214_v42 }
 0x2cb   : > { %v3268_v47 = vadd.f32 %v3266_v45, %v3118_v46  ;;  %6384 = vmatprep.subr.mxu0 %v5229_v33  ;;  %v5211_v45 = vld [vmem:[%s9049_s5 + $0x10] sm:$0xff]  ;;  %v5226_v46 = vld [vmem:[%s9049_s5 + $0x88] sm:$0xff] }
 0x2cc   : > { %6385 = vmatpush3.msra.mxu0 %v5213_v26 }
 0x2cd   : > { %6386 = vmatprep.subr.mxu0 %v5228_v41 }
 0x2ce   : > { %6387 = vmatpush3.msra.mxu0 %v5212_v3 }
 0x2cf   : > { %6388 = vmatprep.subr.mxu0 %v5227_v43 }
 0x2d0   : > { %6389 = vmatpush3.msra.mxu0 %v5211_v45 }
 0x2d1   : > { %6390 = vmatprep.subr.mxu0 %v5226_v46 }
 0x2dc   : > { %v3392_v44 = vpop.f32.mrf.mxu1 }
 0x2de   : > { %v3394_v60 = vpop.f32.mrf.mxu1  ;;  %v3839_v13 = vpop.f32.mrf.mxu0 }
 0x2df   : > { %v3401_v23 = vcombine.low %v3392_v44, %v3394_v60  ;;  %v5225_v44 = vld [vmem:[%s9049_s5 + $0x80] sm:$0xff] }
 0x2e0   : > { %v3396_v48 = vpop.f32.mrf.mxu1  ;;  %v3841_v49 = vpop.f32.mrf.mxu0  ;;  %v5209_v60 = vld [vmem:[%s9049_s5] sm:$0xff] }
 0x2e1   : > { %v3408_v52 = vrot.slane %v3401_v23, %v8117_v4  ;;  %v3848_v53 = vcombine.low %v3839_v13, %v3841_v49 }
 0x2e2   : > { %v3397_v54 = vpop.f32.mrf.mxu1  ;;  %v3843_v12 = vpop.f32.mrf.mxu0 }
 0x2e3   : > { %v3415_v56 = vrot.slane %v3408_v52, %v8117_v4  ;;  %v3855_v1 = vrot.slane %v3848_v53, %v8117_v4 }
 0x2e4   : > { %v3844_v50 = vpop.f32.mrf.mxu0 }
 0x2e5   : > { %v3417_v17 = vadd.f32 %v3415_v56, %v3268_v47  ;;  %v3862_v35 = vrot.slane %v3855_v1, %v8117_v4  ;;  %v5210_v47 = vld [vmem:[%s9049_s5 + $0x8] sm:$0xff] }
 0x2e6   : > { %6391 = vmatpush3.msra.mxu0 %v5210_v47 }
 0x2e7   : > { %v3566_v57 = vadd.f32 %v3564_v55, %v3417_v17  ;;  %6392 = vmatprep.subr.mxu0 %v5225_v44 }
 0x2e8   : > { %6393 = vmatpush3.msra.mxu0 %v5209_v60 }
 0x2f8   : > { %v3690_v9 = vpop.f32.mrf.mxu1 }
 0x2fa   : > { %v3692_v18 = vpop.f32.mrf.mxu1  ;;  %v8917_v19 = vpop.f32.mrf.mxu0 }
 0x2fb   : > { %v3699_v22 = vcombine.low %v3690_v9, %v3692_v18 }
 0x2fc   : > { %v3694_v11 = vpop.f32.mrf.mxu1  ;;  %v4139_v25 = vpop.f32.mrf.mxu0 }
 0x2fd   : > { %v3706_v27 = vrot.slane %v3699_v22, %v8117_v4  ;;  %v4146_v28 = vcombine.low %v8917_v19, %v4139_v25 }
 0x2fe   : > { %v3695_v24 = vpop.f32.mrf.mxu1  ;;  %v4141_v29 = vpop.f32.mrf.mxu0 }
 0x2ff   : > { %v3713_v32 = vrot.slane %v3706_v27, %v8117_v4  ;;  %v4153_v53 = vrot.slane %v4146_v28, %v8117_v4 }
 0x300   : > { %v4142_v34 = vpop.f32.mrf.mxu0 }
 0x301   : > { %v3715_v36 = vadd.f32 %v3713_v32, %v3566_v57  ;;  %v4160_v57 = vrot.slane %v4153_v53, %v8117_v4  ;;  %v5245_v53 = vsub.s32 0, %v8102_v62 }
 0x303   : > { %v3864_v21 = vadd.f32 %v3862_v35, %v3715_v36 }
 0x314   : > { %v3988_v13 = vpop.f32.mrf.mxu1 }
 0x316   : > { %v3990_v23 = vpop.f32.mrf.mxu1  ;;  %v4437_v48 = vpop.f32.mrf.mxu0 }
 0x317   : > { %v3997_v49 = vcombine.low %v3988_v13, %v3990_v23 }
 0x318   : > { %v3992_v51 = vpop.f32.mrf.mxu1  ;;  %v4439_v52 = vpop.f32.mrf.mxu0 }
 0x319   : > { %v4004_v54 = vrot.slane %v3997_v49, %v8117_v4  ;;  %v4446_v12 = vcombine.low %v4437_v48, %v4439_v52  ;;  %v5249_v52 = vsub.s32 1, %v8102_v62 }
 0x31a   : > { %v3993_v56 = vpop.f32.mrf.mxu1  ;;  %v4441_v50 = vpop.f32.mrf.mxu0 }
 0x31b   : > { %v4011_v55 = vrot.slane %v4004_v54, %v8117_v4  ;;  %v4453_v8 = vrot.slane %v4446_v12, %v8117_v4 }
 0x31c   : > { %v4442_v17 = vpop.f32.mrf.mxu0 }
 0x31d   : > { %v4013_v58 = vadd.f32 %v4011_v55, %v3864_v21  ;;  %v4460_v22 = vrot.slane %v4453_v8, %v8117_v4  ;;  %v5241_v55 = vld [vmem:[%s9050_s6] sm:$0x1] }
 0x31f   : > { %v4162_v61 = vadd.f32 %v4160_v57, %v4013_v58 }
 0x330   : > { %v4287_v63 = vpop.f32.mrf.mxu1 }
 0x332   : > { %v4289_v0 = vpop.f32.mrf.mxu1  ;;  %v4735_v2 = vpop.f32.mrf.mxu0 }
 0x333   : > { %v4296_v6 = vcombine.low %v4287_v63, %v4289_v0 }
 0x334   : > { %v4291_v59 = vpop.f32.mrf.mxu1  ;;  %v4737_v7 = vpop.f32.mrf.mxu0 }
 0x335   : > { %v4303_v9 = vrot.slane %v4296_v6, %v8117_v4  ;;  %v4744_v10 = vcombine.low %v4735_v2, %v4737_v7 }
 0x336   : > { %v4292_v14 = vpop.f32.mrf.mxu1  ;;  %v4739_v18 = vpop.f32.mrf.mxu0 }
 0x337   : > { %v4310_v19 = vrot.slane %v4303_v9, %v8117_v4  ;;  %v4751_v24 = vrot.slane %v4744_v10, %v8117_v4 }
 0x338   : > { %v4740_v20 = vpop.f32.mrf.mxu0 }
 0x339   : > { %v4312_v5 = vadd.f32 %v4310_v19, %v4162_v61  ;;  %v4758_v36 = vrot.slane %v4751_v24, %v8117_v4 }
 0x33b   : > { %v4462_v11 = vadd.f32 %v4460_v22, %v4312_v5 }
 0x34c   : > { %v4586_v25 = vpop.f32.mrf.mxu1 }
 0x34e   : > { %v4588_v31 = vpop.f32.mrf.mxu1  ;;  %v5033_v1 = vpop.f32.mrf.mxu0 }
 0x34f   : > { %v4595_v27 = vcombine.low %v4586_v25, %v4588_v31 }
 0x350   : > { %v4590_v28 = vpop.f32.mrf.mxu1  ;;  %v5035_v16 = vpop.f32.mrf.mxu0 }
 0x351   : > { %v4602_v29 = vrot.slane %v4595_v27, %v8117_v4  ;;  %v5042_v26 = vcombine.low %v5033_v1, %v5035_v16 }
 0x352   : > { %v4591_v30 = vpop.f32.mrf.mxu1  ;;  %v5037_v32 = vpop.f32.mrf.mxu0 }
 0x353   : > { %v4609_v34 = vrot.slane %v4602_v29, %v8117_v4  ;;  %v5049_v43 = vrot.slane %v5042_v26, %v8117_v4 }
 0x354   : > { %v5038_v35 = vpop.f32.mrf.mxu0 }
 0x355   : > { %v4611_v21 = vadd.f32 %v4609_v34, %v4462_v11  ;;  %v5056_v60 = vrot.slane %v5049_v43, %v8117_v4 }
 0x357   : > { %v4760_v15 = vadd.f32 %v4758_v36, %v4611_v21 }
 0x368   : > { %v4884_v37 = vpop.f32.mrf.mxu1 }
 0x36a   : > { %v4886_v38 = vpop.f32.mrf.mxu1 }
 0x36b   : > { %v4893_v42 = vcombine.low %v4884_v37, %v4886_v38 }
 0x36c   : > { %v4888_v39 = vpop.f32.mrf.mxu1 }
 0x36d   : > { %v4900_v33 = vrot.slane %v4893_v42, %v8117_v4 }
 0x36e   : > { %v4889_v40 = vpop.f32.mrf.mxu1 }
 0x36f   : > { %v4907_v41 = vrot.slane %v4900_v33, %v8117_v4 }
 0x371   : > { %v4909_v46 = vadd.f32 %v4907_v41, %v4760_v15 }
 0x373   : > { %v5058_v49 = vadd.f32 %v5056_v60, %v4909_v46 }
 0x384   : > { %v5182_v3 = vpop.f32.mrf.mxu1 }
 0x386   : > { %v5184_v45 = vpop.f32.mrf.mxu1 }
 0x387   : > { %v5191_v47 = vcombine.low %v5182_v3, %v5184_v45 }
 0x388   : > { %v5186_v44 = vpop.f32.mrf.mxu1 }
 0x389   : > { %v5198_v13 = vrot.slane %v5191_v47, %v8117_v4 }
 0x38a   : > { %v5187_v23 = vpop.f32.mrf.mxu1 }
 0x38b   : > { %v5205_v48 = vrot.slane %v5198_v13, %v8117_v4 }
 0x38d   : > { %v5207_v51 = vadd.f32 %v5205_v48, %v5058_v49 }
 0x38f   : > { %v5208_v54 = vmax.f32 %v5207_v51, 0.0 }
 0x391   : > { %v5250_v12 = vrot.slane %v5208_v54, %v5249_v52  ;;  %v5246_v56 = vrot.slane %v5208_v54, %v5245_v53 }
 0x393   : > { %5317 = vmatprep.mubr.f32.mxu0 %v5250_v12 }
 0x394   : > { %5318 = vmatmul.mubr.f32.vlgmr.msra.gmra.mxu0 %v5246_v56 }
 0x454   : > { %v6394_v50 = vpop.f32.mrf.mxu0 }
 0x456   : > { %v6395_v17 = vpop.f32.mrf.mxu0 }
 0x457   : > { %v6396_v4 = vadd.f32 %v6395_v17, %v6394_v50 }
 0x459   : > { %v5320_v57 = vadd.f32 %v6396_v4, %v5241_v55 }
 0x45b   : > { %5324 = vst.msk [vmem:[%s270_s21] sm:$0x1] %vm5323_vm2, %v5320_v57 }
 0x45c   : > { %7093 = shalt.err (!%p7090_p3)
}
 0x45d   : > { %s7094_s16 = scalar_lea.hbm %s5336_s29, 16  ;;  %s7098_s19 = scalar_lea.hbm %s9051_s7, 32 }
 0x45e   : > { %p7095_p4 = scmp.ne.s32.totalorder %s5336_s29, %s7094_s16  ;;  %p7099_p9 = scmp.lt.s32.totalorder %s5336_s29, %s9051_s7 }
 0x45f   : > { %p7100_p10 = scmp.lt.s32.totalorder %s7098_s19, %s7094_s16 }
 0x460   : > { %p7096_p7 = pnand %p7095_p4, %p7223_p5 }
 0x461   : > { %p7101_p11 = por %p7100_p10, %p7099_p9 }
 0x462   : > { %p7097_p8 = pneg %p7096_p7 }
 0x464   : > { %p7102_p12 = pnand %p7101_p11, %p7097_p8 }
 0x466   : > { %7105 = shalt.err (!%p7102_p12)
}
 0x467   : > { %6397 = dma.vmem_to_hbm [thread:$0]  (%p7223_p5), %s5339_s22, 16, %s5336_s29, %s5326_s8  }
 0x468 PF: > { %p6403_p13 = scmp.ge.s32.totalorder %s7140_s27, 2  ;;  %s5350_s13 = sand.u32 1, %s7128_s24  }
 0x469   : > { %s5351_s23 = scalar_lea.sflag [#allocation3], %s5350_s13 }
 0x46a   : > { %p6400_p0 = pnand %p6403_p13, %p7227_p6 }
 0x46c   : > { %p6401_p1 = pneg %p6400_p0 }
 0x46e   : > { %7123 = dma.done.wait (%p6401_p1), %s5351_s23, 16  }
 0x46f   : > { %7125 = vsyncadd (%p6401_p1), %s5351_s23, 4294967280  ;;  %p17_p2 = scmp.ge.s32.totalorder %s7210_s30, 4   ;;  %s9054_s24 = smov %s7132_s25 }
 0x470   : > { %s9055_s25 = smov %s7136_s26  ;;  %s9056_s26 = smov %s7221_s10 }
 0x471   : > { %s9057_s27 = smov %s7210_s30  ;;  %19 = sbr.rel (!%p17_p2) target bundleno = 3 (0x3), region = 114 }
 0x476   :  { %5355 = vsyncpa [#allocation3], 1 }
 0x477   :  { %5357 = vsyncpa [#allocation3 + $0x1], 1 }

</bundles_post_ra>
